<compile_context>
chip_gen: v7x
topology: tpu7x:2x2x1
jax: 0.10.0
libtpu: 0.0.40
codegen_flags: <defaults>
</compile_context>

<pallas_src>
import jax
import jax.numpy as jnp
import numpy as np
from jax.experimental import pallas as pl
from jax.experimental.pallas import tpu as pltpu  # noqa: F401  (TPU backend)

# ----------------------------- model dims -----------------------------------
N, T = 2, 8                 # batch, seq
NT = N * T
INPUT_DIM = 64              # raw feature dim (fc_in projects it to HIDDEN)
HIDDEN = 128                # config.hidden_size
NUM_HEADS = 4
HEAD_DIM = HIDDEN // NUM_HEADS
INTERMEDIATE = 256          # FFN inner dim
NUM_LAYERS = 2
NUM_CLASSES = 8
LN_EPS = 1e-12
POOL_ROWS = 8               # sublane-padded pooled/logits rows (>= N)
OUT_LANES = 128             # lane-padded logits width (>= NUM_CLASSES)


# ----------------------------- shared math -----------------------------------
def _layer_norm(x, gamma, beta):
    mu = jnp.mean(x, axis=-1, keepdims=True)
    var = jnp.mean((x - mu) ** 2, axis=-1, keepdims=True)
    return (x - mu) * jax.lax.rsqrt(var + LN_EPS) * gamma + beta


# ----------------------------- fused Pallas kernel ----------------------------
def _fused_forward_kernel(xf_ref, pmask_ref, pool_ref,
                          fc_in_w_ref, fc_in_b_ref,
                          wqkv_ref, bqkv_ref, wo_ref, bo_ref,
                          g1_ref, be1_ref, wf1_ref, bf1_ref,
                          wf2_ref, bf2_ref, g2_ref, be2_ref,
                          fc_w_ref, fc_b_ref, o_ref):
    # xf:    (NT, 128)  lane-padded flattened activations (f32)
    # pmask: (NT, NT)   additive mask = padding mask + off-batch-block -10000
    # pool:  (8,  NT)   block-diagonal masked-mean pooling matrix (pre-scaled)
    xf = xf_ref[...]
    pmask = pmask_ref[...]
    pool = pool_ref[...]

    # fc_in: project (zero-padded) raw features to hidden
    h = jnp.dot(xf, fc_in_w_ref[...].astype(jnp.float32),
                preferred_element_type=jnp.float32) + fc_in_b_ref[...]   # (NT, D)

    scale = 1.0 / (HEAD_DIM ** 0.5)

    for l in range(NUM_LAYERS):                     # static unroll over layers
        # fused QKV projection for the whole flattened batch
        wqkv = wqkv_ref[l].astype(jnp.float32)      # (D, 3D)
        qkv = jnp.dot(h, wqkv, preferred_element_type=jnp.float32) + bqkv_ref[l]
        q = qkv[:, :HIDDEN] * scale                 # scale q once per layer
        k = qkv[:, HIDDEN:2 * HIDDEN]
        v = qkv[:, 2 * HIDDEN:]

        # block-diagonal packed attention: whole batch in one (NT,NT) tile/head
        ctx_heads = []
        for hh in range(NUM_HEADS):                 # static unroll over heads
            cs = slice(hh * HEAD_DIM, (hh + 1) * HEAD_DIM)
            s = jax.lax.dot_general(
                q[:, cs], k[:, cs], (((1,), (1,)), ((), ())),
                preferred_element_type=jnp.float32) + pmask          # (NT, NT)
            s = s - jnp.max(s, axis=-1, keepdims=True)
            p = jnp.exp(s)
            p = p * pl.reciprocal(jnp.sum(p, axis=-1, keepdims=True),
                                  approx=True)
            ctx_heads.append(jnp.dot(p, v[:, cs],
                                     preferred_element_type=jnp.float32))
        ctx = jnp.concatenate(ctx_heads, axis=-1)                    # (NT, D)

        # single full-lane output projection per layer
        attn_out = jnp.dot(ctx, wo_ref[l].astype(jnp.float32),
                           preferred_element_type=jnp.float32) + bo_ref[l]
        h1 = _layer_norm(h + attn_out, g1_ref[l], be1_ref[l])

        ff = jnp.dot(h1, wf1_ref[l].astype(jnp.float32),
                     preferred_element_type=jnp.float32) + bf1_ref[l]  # (NT, F)
        ff = jax.nn.gelu(ff, approximate=True)
        ff = jnp.dot(ff, wf2_ref[l].astype(jnp.float32),
                     preferred_element_type=jnp.float32) + bf2_ref[l]  # (NT, D)
        h = _layer_norm(h1 + ff, g2_ref[l], be2_ref[l])

    # masked-mean pooling fused into one block-diagonal matmul + classifier
    pooled = jnp.dot(pool, h, preferred_element_type=jnp.float32)      # (8, D)
    logits = jnp.dot(pooled, fc_w_ref[...].astype(jnp.float32),
                     preferred_element_type=jnp.float32) + fc_b_ref[...]
    o_ref[...] = logits.astype(o_ref.dtype)                            # (8, 128)


def forward(x, mask, params):
    """EncoderOnly.forward: get_logits -> mean_pool -> fc, fully fused."""
    n, t, din = x.shape
    nt = n * t

    # lane-dense activations: pad raw features from 64 to 128 lanes (zeros)
    xf = x.reshape(nt, din).astype(jnp.float32)
    xf = jnp.pad(xf, ((0, 0), (0, HIDDEN - din)))
    fc_in_w = jnp.pad(params["fc_in_w"], ((0, HIDDEN - din), (0, 0)))
    fc_w = jnp.pad(params["fc_w"], ((0, 0), (0, OUT_LANES - NUM_CLASSES)))
    fc_b = jnp.pad(params["fc_b"], ((0, 0), (0, OUT_LANES - NUM_CLASSES)))

    # packed block-diagonal additive attention mask (layer-invariant)
    mask_f = mask.astype(jnp.float32)                       # (N, T)
    cols_b = jnp.arange(nt)[None, :] // t                   # key  -> batch id
    rows_b = jnp.arange(nt)[:, None] // t                   # query-> batch id
    neg_key = ((1.0 - mask_f) * -10000.0).reshape(1, nt)
    pmask = jnp.where(rows_b == cols_b, neg_key, -10000.0)  # (NT, NT)

    # block-diagonal masked-mean pooling matrix, rows pre-divided by max(len,1)
    lens = jnp.maximum(jnp.sum(mask_f, axis=1, keepdims=True), 1.0)
    w_pool = (mask_f / lens).reshape(1, nt)
    pool = jnp.where(jnp.arange(POOL_ROWS)[:, None] == cols_b,
                     w_pool, 0.0)                           # (8, NT)

    out = pl.pallas_call(
        _fused_forward_kernel,
        out_shape=jax.ShapeDtypeStruct((POOL_ROWS, OUT_LANES), x.dtype),
        # no grid: one invocation, bf16 weights resident in VMEM (~0.6 MiB)
    )(xf, pmask, pool,
      fc_in_w, params["fc_in_b"],
      params["wqkv"], params["bqkv"], params["wo"], params["bo"],
      params["g1"], params["be1"], params["wf1"], params["bf1"],
      params["wf2"], params["bf2"], params["g2"], params["be2"],
      fc_w, fc_b)
    return out[:n, :NUM_CLASSES]


# ----------------------------- parameter init --------------------------------
def init_params(key):
    def w(kk, shape, dtype=jnp.float32):
        return (jax.random.normal(kk, shape, jnp.float32) * 0.02).astype(dtype)

    bf = jnp.bfloat16     # large matrices stored bf16 (halves weight DMA)
    k = jax.random.split(key, 16)
    p = {}
    p["fc_in_w"] = w(k[0], (INPUT_DIM, HIDDEN), bf)
    p["fc_in_b"] = w(k[1], (1, HIDDEN))
    p["fc_w"] = w(k[2], (HIDDEN, NUM_CLASSES), bf)
    p["fc_b"] = w(k[3], (1, NUM_CLASSES))
    # per-layer weights stacked on a leading NUM_LAYERS axis (QKV fused)
    p["wqkv"] = w(k[4], (NUM_LAYERS, HIDDEN, 3 * HIDDEN), bf)
    p["bqkv"] = w(k[5], (NUM_LAYERS, 1, 3 * HIDDEN))
    p["wo"] = w(k[6], (NUM_LAYERS, HIDDEN, HIDDEN), bf)
    p["bo"] = w(k[7], (NUM_LAYERS, 1, HIDDEN))
    p["wf1"] = w(k[8], (NUM_LAYERS, HIDDEN, INTERMEDIATE), bf)
    p["bf1"] = w(k[9], (NUM_LAYERS, 1, INTERMEDIATE))
    p["wf2"] = w(k[10], (NUM_LAYERS, INTERMEDIATE, HIDDEN), bf)
    p["bf2"] = w(k[11], (NUM_LAYERS, 1, HIDDEN))
    p["g1"] = 1.0 + w(k[12], (NUM_LAYERS, 1, HIDDEN))
    p["be1"] = w(k[13], (NUM_LAYERS, 1, HIDDEN))
    p["g2"] = 1.0 + w(k[14], (NUM_LAYERS, 1, HIDDEN))
    p["be2"] = w(k[15], (NUM_LAYERS, 1, HIDDEN))
    return p


# ----------------------------- reference (plain JAX) --------------------------
def ref_forward(x, mask, p):
    f32 = lambda a: a.astype(jnp.float32)   # same bf16-stored weight values
    h = x @ f32(p["fc_in_w"]) + p["fc_in_b"]                              # (N,T,D)
    ext = (1.0 - mask)[:, None, None, :] * -10000.0
    for l in range(NUM_LAYERS):
        qkv = h @ f32(p["wqkv"][l]) + p["bqkv"][l]
        q, k, v = jnp.split(qkv, 3, axis=-1)
        q = q.reshape(N, T, NUM_HEADS, HEAD_DIM).transpose(0, 2, 1, 3)
        k = k.reshape(N, T, NUM_HEADS, HEAD_DIM).transpose(0, 2, 1, 3)
        v = v.reshape(N, T, NUM_HEADS, HEAD_DIM).transpose(0, 2, 1, 3)
        s = jnp.einsum("nhqd,nhkd->nhqk", q, k) / (HEAD_DIM ** 0.5) + ext
        prob = jax.nn.softmax(s, axis=-1)
        ctx = jnp.einsum("nhqk,nhkd->nhqd", prob, v).transpose(0, 2, 1, 3)
        ctx = ctx.reshape(N, T, HIDDEN)
        attn_out = ctx @ f32(p["wo"][l]) + p["bo"][l]
        h1 = _layer_norm(h + attn_out, p["g1"][l], p["be1"][l])
        ff = jax.nn.gelu(h1 @ f32(p["wf1"][l]) + p["bf1"][l], approximate=True)
        ff = ff @ f32(p["wf2"][l]) + p["bf2"][l]
        h = _layer_norm(h1 + ff, p["g2"][l], p["be2"][l])
    m = mask[:, :, None]
    pooled = (h * m).sum(1) / jnp.maximum(m.sum(1), 1.0)
    return pooled @ f32(p["fc_w"]) + p["fc_b"]


# ----------------------------- main -------------------------------------------
if __name__ == "__main__":
    key = jax.random.PRNGKey(0)
    kx, kp = jax.random.split(key)

    x = jax.random.normal(kx, (N, T, INPUT_DIM), jnp.float32)
    lengths = jnp.array([T, 5], jnp.int32)
    mask = (jnp.arange(T)[None, :] < lengths[:, None]).astype(jnp.float32)  # [N, T]

    params = init_params(kp)

    out = forward(x, mask, params)
    out = jax.block_until_ready(out)
    assert out.shape == (N, NUM_CLASSES), out.shape

    ref = jax.block_until_ready(ref_forward(x, mask, params))
    # tolerance slightly relaxed vs 2e-4 because the softmax denominator uses
    # the EUP approximate reciprocal (rel err ~1e-4); weights are identical
    # bf16-quantized values in both paths, compute is f32 in both.
    np.testing.assert_allclose(np.asarray(out), np.asarray(ref), rtol=1e-3, atol=1e-3)

    print("KERNEL_OK")
</pallas_src>

<mosaic_0001>
module attributes {stable_mosaic.version = 11 : i64} {
  func.func @_fused_forward_kernel(%arg0: memref<16x128xf32, #tpu.memory_space<vmem>>, %arg1: memref<16x16xf32, #tpu.memory_space<vmem>>, %arg2: memref<8x16xf32, #tpu.memory_space<vmem>>, %arg3: memref<128x128xbf16, #tpu.memory_space<vmem>>, %arg4: memref<1x128xf32, #tpu.memory_space<vmem>>, %arg5: memref<2x128x384xbf16, #tpu.memory_space<vmem>>, %arg6: memref<2x1x384xf32, #tpu.memory_space<vmem>>, %arg7: memref<2x128x128xbf16, #tpu.memory_space<vmem>>, %arg8: memref<2x1x128xf32, #tpu.memory_space<vmem>>, %arg9: memref<2x1x128xf32, #tpu.memory_space<vmem>>, %arg10: memref<2x1x128xf32, #tpu.memory_space<vmem>>, %arg11: memref<2x128x256xbf16, #tpu.memory_space<vmem>>, %arg12: memref<2x1x256xf32, #tpu.memory_space<vmem>>, %arg13: memref<2x256x128xbf16, #tpu.memory_space<vmem>>, %arg14: memref<2x1x128xf32, #tpu.memory_space<vmem>>, %arg15: memref<2x1x128xf32, #tpu.memory_space<vmem>>, %arg16: memref<2x1x128xf32, #tpu.memory_space<vmem>>, %arg17: memref<128x128xbf16, #tpu.memory_space<vmem>>, %arg18: memref<1x128xf32, #tpu.memory_space<vmem>>, %arg19: memref<8x128xf32, #tpu.memory_space<vmem>>) attributes {dimension_semantics = [], scalar_prefetch = 0 : i64, scratch_operands = 0 : i64, tpu.core_type = #tpu.core_type<tc>} {
    %c0 = arith.constant 0 : index
    %c0_0 = arith.constant 0 : index
    %0 = vector.load %arg0[%c0, %c0_0] : memref<16x128xf32, #tpu.memory_space<vmem>>, vector<16x128xf32>
    %c0_1 = arith.constant 0 : index
    %c0_2 = arith.constant 0 : index
    %1 = vector.load %arg1[%c0_1, %c0_2] : memref<16x16xf32, #tpu.memory_space<vmem>>, vector<16x16xf32>
    %c0_3 = arith.constant 0 : index
    %c0_4 = arith.constant 0 : index
    %2 = vector.load %arg2[%c0_3, %c0_4] : memref<8x16xf32, #tpu.memory_space<vmem>>, vector<8x16xf32>
    %c0_5 = arith.constant 0 : index
    %c0_6 = arith.constant 0 : index
    %3 = vector.load %arg3[%c0_5, %c0_6] : memref<128x128xbf16, #tpu.memory_space<vmem>>, vector<128x128xbf16>
    %4 = arith.extf %3 : vector<128x128xbf16> to vector<128x128xf32>
    %cst = arith.constant dense<0.000000e+00> : vector<16x128xf32>
    %5 = tpu.matmul %0, %4, %cst {dimension_numbers = #tpu.dot_dimension_numbers<[1], [0], [0], [1], [0, 0, 1, 1], [], []>} : vector<16x128xf32>, vector<128x128xf32>, vector<16x128xf32> -> vector<16x128xf32>
    %c0_7 = arith.constant 0 : index
    %c0_8 = arith.constant 0 : index
    %6 = vector.load %arg4[%c0_7, %c0_8] : memref<1x128xf32, #tpu.memory_space<vmem>>, vector<1x128xf32>
    %7 = vector.broadcast %6 : vector<1x128xf32> to vector<16x128xf32>
    %8 = arith.addf %5, %7 : vector<16x128xf32>
    %c0_9 = arith.constant 0 : index
    %c0_10 = arith.constant 0 : index
    %c0_11 = arith.constant 0 : index
    %9 = vector.load %arg5[%c0_9, %c0_10, %c0_11] : memref<2x128x384xbf16, #tpu.memory_space<vmem>>, vector<1x128x384xbf16>
    %10 = vector.shape_cast %9 : vector<1x128x384xbf16> to vector<128x384xbf16>
    %11 = arith.extf %10 : vector<128x384xbf16> to vector<128x384xf32>
    %cst_12 = arith.constant dense<0.000000e+00> : vector<16x384xf32>
    %12 = tpu.matmul %8, %11, %cst_12 {dimension_numbers = #tpu.dot_dimension_numbers<[1], [0], [0], [1], [0, 0, 1, 1], [], []>} : vector<16x128xf32>, vector<128x384xf32>, vector<16x384xf32> -> vector<16x384xf32>
    %c0_13 = arith.constant 0 : index
    %c0_14 = arith.constant 0 : index
    %c0_15 = arith.constant 0 : index
    %13 = vector.load %arg6[%c0_13, %c0_14, %c0_15] : memref<2x1x384xf32, #tpu.memory_space<vmem>>, vector<1x1x384xf32>
    %14 = vector.shape_cast %13 : vector<1x1x384xf32> to vector<1x384xf32>
    %15 = vector.broadcast %14 : vector<1x384xf32> to vector<16x384xf32>
    %16 = arith.addf %12, %15 : vector<16x384xf32>
    %17 = vector.extract_strided_slice %16 {offsets = [0, 0], sizes = [16, 128], strides = [1, 1]} : vector<16x384xf32> to vector<16x128xf32>
    %cst_16 = arith.constant 0.176776692 : f32
    %18 = vector.broadcast %cst_16 : f32 to vector<16x128xf32>
    %19 = arith.mulf %17, %18 : vector<16x128xf32>
    %20 = vector.extract_strided_slice %16 {offsets = [0, 128], sizes = [16, 128], strides = [1, 1]} : vector<16x384xf32> to vector<16x128xf32>
    %21 = vector.extract_strided_slice %16 {offsets = [0, 256], sizes = [16, 128], strides = [1, 1]} : vector<16x384xf32> to vector<16x128xf32>
    %22 = vector.extract_strided_slice %19 {offsets = [0, 0], sizes = [16, 32], strides = [1, 1]} : vector<16x128xf32> to vector<16x32xf32>
    %23 = vector.extract_strided_slice %20 {offsets = [0, 0], sizes = [16, 32], strides = [1, 1]} : vector<16x128xf32> to vector<16x32xf32>
    %cst_17 = arith.constant dense<0.000000e+00> : vector<16x16xf32>
    %24 = tpu.matmul %22, %23, %cst_17 {dimension_numbers = #tpu.dot_dimension_numbers<[1], [1], [0], [0], [0, 0, 1, 0], [], []>} : vector<16x32xf32>, vector<16x32xf32>, vector<16x16xf32> -> vector<16x16xf32>
    %25 = arith.addf %24, %1 : vector<16x16xf32>
    %cst_18 = arith.constant dense<0xFF800000> : vector<16xf32>
    %26 = vector.multi_reduction <maximumf>, %25, %cst_18 [1] : vector<16x16xf32> to vector<16xf32>
    %27 = vector.shape_cast %26 : vector<16xf32> to vector<16x1xf32>
    %28 = vector.broadcast %27 : vector<16x1xf32> to vector<16x16xf32>
    %29 = arith.subf %25, %28 : vector<16x16xf32>
    %30 = math.exp %29 : vector<16x16xf32>
    %cst_19 = arith.constant dense<0.000000e+00> : vector<16xf32>
    %31 = vector.multi_reduction <add>, %30, %cst_19 [1] : vector<16x16xf32> to vector<16xf32>
    %32 = vector.shape_cast %31 : vector<16xf32> to vector<16x1xf32>
    %33 = tpu.reciprocal %32 {approx = true} : vector<16x1xf32> -> vector<16x1xf32>
    %34 = vector.broadcast %33 : vector<16x1xf32> to vector<16x16xf32>
    %35 = arith.mulf %30, %34 : vector<16x16xf32>
    %36 = vector.extract_strided_slice %21 {offsets = [0, 0], sizes = [16, 32], strides = [1, 1]} : vector<16x128xf32> to vector<16x32xf32>
    %cst_20 = arith.constant dense<0.000000e+00> : vector<16x32xf32>
    %37 = tpu.matmul %35, %36, %cst_20 {dimension_numbers = #tpu.dot_dimension_numbers<[1], [0], [0], [1], [0, 0, 1, 1], [], []>} : vector<16x16xf32>, vector<16x32xf32>, vector<16x32xf32> -> vector<16x32xf32>
    %38 = vector.extract_strided_slice %19 {offsets = [0, 32], sizes = [16, 32], strides = [1, 1]} : vector<16x128xf32> to vector<16x32xf32>
    %39 = vector.extract_strided_slice %20 {offsets = [0, 32], sizes = [16, 32], strides = [1, 1]} : vector<16x128xf32> to vector<16x32xf32>
    %cst_21 = arith.constant dense<0.000000e+00> : vector<16x16xf32>
    %40 = tpu.matmul %38, %39, %cst_21 {dimension_numbers = #tpu.dot_dimension_numbers<[1], [1], [0], [0], [0, 0, 1, 0], [], []>} : vector<16x32xf32>, vector<16x32xf32>, vector<16x16xf32> -> vector<16x16xf32>
    %41 = arith.addf %40, %1 : vector<16x16xf32>
    %cst_22 = arith.constant dense<0xFF800000> : vector<16xf32>
    %42 = vector.multi_reduction <maximumf>, %41, %cst_22 [1] : vector<16x16xf32> to vector<16xf32>
    %43 = vector.shape_cast %42 : vector<16xf32> to vector<16x1xf32>
    %44 = vector.broadcast %43 : vector<16x1xf32> to vector<16x16xf32>
    %45 = arith.subf %41, %44 : vector<16x16xf32>
    %46 = math.exp %45 : vector<16x16xf32>
    %cst_23 = arith.constant dense<0.000000e+00> : vector<16xf32>
    %47 = vector.multi_reduction <add>, %46, %cst_23 [1] : vector<16x16xf32> to vector<16xf32>
    %48 = vector.shape_cast %47 : vector<16xf32> to vector<16x1xf32>
    %49 = tpu.reciprocal %48 {approx = true} : vector<16x1xf32> -> vector<16x1xf32>
    %50 = vector.broadcast %49 : vector<16x1xf32> to vector<16x16xf32>
    %51 = arith.mulf %46, %50 : vector<16x16xf32>
    %52 = vector.extract_strided_slice %21 {offsets = [0, 32], sizes = [16, 32], strides = [1, 1]} : vector<16x128xf32> to vector<16x32xf32>
    %cst_24 = arith.constant dense<0.000000e+00> : vector<16x32xf32>
    %53 = tpu.matmul %51, %52, %cst_24 {dimension_numbers = #tpu.dot_dimension_numbers<[1], [0], [0], [1], [0, 0, 1, 1], [], []>} : vector<16x16xf32>, vector<16x32xf32>, vector<16x32xf32> -> vector<16x32xf32>
    %54 = vector.extract_strided_slice %19 {offsets = [0, 64], sizes = [16, 32], strides = [1, 1]} : vector<16x128xf32> to vector<16x32xf32>
    %55 = vector.extract_strided_slice %20 {offsets = [0, 64], sizes = [16, 32], strides = [1, 1]} : vector<16x128xf32> to vector<16x32xf32>
    %cst_25 = arith.constant dense<0.000000e+00> : vector<16x16xf32>
    %56 = tpu.matmul %54, %55, %cst_25 {dimension_numbers = #tpu.dot_dimension_numbers<[1], [1], [0], [0], [0, 0, 1, 0], [], []>} : vector<16x32xf32>, vector<16x32xf32>, vector<16x16xf32> -> vector<16x16xf32>
    %57 = arith.addf %56, %1 : vector<16x16xf32>
    %cst_26 = arith.constant dense<0xFF800000> : vector<16xf32>
    %58 = vector.multi_reduction <maximumf>, %57, %cst_26 [1] : vector<16x16xf32> to vector<16xf32>
    %59 = vector.shape_cast %58 : vector<16xf32> to vector<16x1xf32>
    %60 = vector.broadcast %59 : vector<16x1xf32> to vector<16x16xf32>
    %61 = arith.subf %57, %60 : vector<16x16xf32>
    %62 = math.exp %61 : vector<16x16xf32>
    %cst_27 = arith.constant dense<0.000000e+00> : vector<16xf32>
    %63 = vector.multi_reduction <add>, %62, %cst_27 [1] : vector<16x16xf32> to vector<16xf32>
    %64 = vector.shape_cast %63 : vector<16xf32> to vector<16x1xf32>
    %65 = tpu.reciprocal %64 {approx = true} : vector<16x1xf32> -> vector<16x1xf32>
    %66 = vector.broadcast %65 : vector<16x1xf32> to vector<16x16xf32>
    %67 = arith.mulf %62, %66 : vector<16x16xf32>
    %68 = vector.extract_strided_slice %21 {offsets = [0, 64], sizes = [16, 32], strides = [1, 1]} : vector<16x128xf32> to vector<16x32xf32>
    %cst_28 = arith.constant dense<0.000000e+00> : vector<16x32xf32>
    %69 = tpu.matmul %67, %68, %cst_28 {dimension_numbers = #tpu.dot_dimension_numbers<[1], [0], [0], [1], [0, 0, 1, 1], [], []>} : vector<16x16xf32>, vector<16x32xf32>, vector<16x32xf32> -> vector<16x32xf32>
    %70 = vector.extract_strided_slice %19 {offsets = [0, 96], sizes = [16, 32], strides = [1, 1]} : vector<16x128xf32> to vector<16x32xf32>
    %71 = vector.extract_strided_slice %20 {offsets = [0, 96], sizes = [16, 32], strides = [1, 1]} : vector<16x128xf32> to vector<16x32xf32>
    %cst_29 = arith.constant dense<0.000000e+00> : vector<16x16xf32>
    %72 = tpu.matmul %70, %71, %cst_29 {dimension_numbers = #tpu.dot_dimension_numbers<[1], [1], [0], [0], [0, 0, 1, 0], [], []>} : vector<16x32xf32>, vector<16x32xf32>, vector<16x16xf32> -> vector<16x16xf32>
    %73 = arith.addf %72, %1 : vector<16x16xf32>
    %cst_30 = arith.constant dense<0xFF800000> : vector<16xf32>
    %74 = vector.multi_reduction <maximumf>, %73, %cst_30 [1] : vector<16x16xf32> to vector<16xf32>
    %75 = vector.shape_cast %74 : vector<16xf32> to vector<16x1xf32>
    %76 = vector.broadcast %75 : vector<16x1xf32> to vector<16x16xf32>
    %77 = arith.subf %73, %76 : vector<16x16xf32>
    %78 = math.exp %77 : vector<16x16xf32>
    %cst_31 = arith.constant dense<0.000000e+00> : vector<16xf32>
    %79 = vector.multi_reduction <add>, %78, %cst_31 [1] : vector<16x16xf32> to vector<16xf32>
    %80 = vector.shape_cast %79 : vector<16xf32> to vector<16x1xf32>
    %81 = tpu.reciprocal %80 {approx = true} : vector<16x1xf32> -> vector<16x1xf32>
    %82 = vector.broadcast %81 : vector<16x1xf32> to vector<16x16xf32>
    %83 = arith.mulf %78, %82 : vector<16x16xf32>
    %84 = vector.extract_strided_slice %21 {offsets = [0, 96], sizes = [16, 32], strides = [1, 1]} : vector<16x128xf32> to vector<16x32xf32>
    %cst_32 = arith.constant dense<0.000000e+00> : vector<16x32xf32>
    %85 = tpu.matmul %83, %84, %cst_32 {dimension_numbers = #tpu.dot_dimension_numbers<[1], [0], [0], [1], [0, 0, 1, 1], [], []>} : vector<16x16xf32>, vector<16x32xf32>, vector<16x32xf32> -> vector<16x32xf32>
    %86 = tpu.concatenate %37, %53, %69, %85 in 1 : vector<16x32xf32>, vector<16x32xf32>, vector<16x32xf32>, vector<16x32xf32> -> vector<16x128xf32>
    %c0_33 = arith.constant 0 : index
    %c0_34 = arith.constant 0 : index
    %c0_35 = arith.constant 0 : index
    %87 = vector.load %arg7[%c0_33, %c0_34, %c0_35] : memref<2x128x128xbf16, #tpu.memory_space<vmem>>, vector<1x128x128xbf16>
    %88 = vector.shape_cast %87 : vector<1x128x128xbf16> to vector<128x128xbf16>
    %89 = arith.extf %88 : vector<128x128xbf16> to vector<128x128xf32>
    %cst_36 = arith.constant dense<0.000000e+00> : vector<16x128xf32>
    %90 = tpu.matmul %86, %89, %cst_36 {dimension_numbers = #tpu.dot_dimension_numbers<[1], [0], [0], [1], [0, 0, 1, 1], [], []>} : vector<16x128xf32>, vector<128x128xf32>, vector<16x128xf32> -> vector<16x128xf32>
    %c0_37 = arith.constant 0 : index
    %c0_38 = arith.constant 0 : index
    %c0_39 = arith.constant 0 : index
    %91 = vector.load %arg8[%c0_37, %c0_38, %c0_39] : memref<2x1x128xf32, #tpu.memory_space<vmem>>, vector<1x1x128xf32>
    %92 = vector.shape_cast %91 : vector<1x1x128xf32> to vector<1x128xf32>
    %93 = vector.broadcast %92 : vector<1x128xf32> to vector<16x128xf32>
    %94 = arith.addf %90, %93 : vector<16x128xf32>
    %95 = arith.addf %8, %94 : vector<16x128xf32>
    %c0_40 = arith.constant 0 : index
    %c0_41 = arith.constant 0 : index
    %c0_42 = arith.constant 0 : index
    %96 = vector.load %arg9[%c0_40, %c0_41, %c0_42] : memref<2x1x128xf32, #tpu.memory_space<vmem>>, vector<1x1x128xf32>
    %97 = vector.shape_cast %96 : vector<1x1x128xf32> to vector<1x128xf32>
    %c0_43 = arith.constant 0 : index
    %c0_44 = arith.constant 0 : index
    %c0_45 = arith.constant 0 : index
    %98 = vector.load %arg10[%c0_43, %c0_44, %c0_45] : memref<2x1x128xf32, #tpu.memory_space<vmem>>, vector<1x1x128xf32>
    %99 = vector.shape_cast %98 : vector<1x1x128xf32> to vector<1x128xf32>
    %cst_46 = arith.constant dense<0.000000e+00> : vector<16xf32>
    %100 = vector.multi_reduction <add>, %95, %cst_46 [1] : vector<16x128xf32> to vector<16xf32>
    %101 = vector.shape_cast %100 : vector<16xf32> to vector<16x1xf32>
    %cst_47 = arith.constant 1.280000e+02 : f32
    %102 = vector.broadcast %cst_47 : f32 to vector<16x1xf32>
    %103 = arith.divf %101, %102 : vector<16x1xf32>
    %104 = vector.broadcast %103 : vector<16x1xf32> to vector<16x128xf32>
    %105 = arith.subf %95, %104 : vector<16x128xf32>
    %106 = arith.mulf %105, %105 : vector<16x128xf32>
    %cst_48 = arith.constant dense<0.000000e+00> : vector<16xf32>
    %107 = vector.multi_reduction <add>, %106, %cst_48 [1] : vector<16x128xf32> to vector<16xf32>
    %108 = vector.shape_cast %107 : vector<16xf32> to vector<16x1xf32>
    %cst_49 = arith.constant 1.280000e+02 : f32
    %109 = vector.broadcast %cst_49 : f32 to vector<16x1xf32>
    %110 = arith.divf %108, %109 : vector<16x1xf32>
    %111 = vector.broadcast %103 : vector<16x1xf32> to vector<16x128xf32>
    %112 = arith.subf %95, %111 : vector<16x128xf32>
    %cst_50 = arith.constant 9.99999996E-13 : f32
    %113 = vector.broadcast %cst_50 : f32 to vector<16x1xf32>
    %114 = arith.addf %110, %113 : vector<16x1xf32>
    %115 = math.rsqrt %114 : vector<16x1xf32>
    %116 = vector.broadcast %115 : vector<16x1xf32> to vector<16x128xf32>
    %117 = arith.mulf %112, %116 : vector<16x128xf32>
    %118 = vector.broadcast %97 : vector<1x128xf32> to vector<16x128xf32>
    %119 = arith.mulf %117, %118 : vector<16x128xf32>
    %120 = vector.broadcast %99 : vector<1x128xf32> to vector<16x128xf32>
    %121 = arith.addf %119, %120 : vector<16x128xf32>
    %c0_51 = arith.constant 0 : index
    %c0_52 = arith.constant 0 : index
    %c0_53 = arith.constant 0 : index
    %122 = vector.load %arg11[%c0_51, %c0_52, %c0_53] : memref<2x128x256xbf16, #tpu.memory_space<vmem>>, vector<1x128x256xbf16>
    %123 = vector.shape_cast %122 : vector<1x128x256xbf16> to vector<128x256xbf16>
    %124 = arith.extf %123 : vector<128x256xbf16> to vector<128x256xf32>
    %cst_54 = arith.constant dense<0.000000e+00> : vector<16x256xf32>
    %125 = tpu.matmul %121, %124, %cst_54 {dimension_numbers = #tpu.dot_dimension_numbers<[1], [0], [0], [1], [0, 0, 1, 1], [], []>} : vector<16x128xf32>, vector<128x256xf32>, vector<16x256xf32> -> vector<16x256xf32>
    %c0_55 = arith.constant 0 : index
    %c0_56 = arith.constant 0 : index
    %c0_57 = arith.constant 0 : index
    %126 = vector.load %arg12[%c0_55, %c0_56, %c0_57] : memref<2x1x256xf32, #tpu.memory_space<vmem>>, vector<1x1x256xf32>
    %127 = vector.shape_cast %126 : vector<1x1x256xf32> to vector<1x256xf32>
    %128 = vector.broadcast %127 : vector<1x256xf32> to vector<16x256xf32>
    %129 = arith.addf %125, %128 : vector<16x256xf32>
    %130 = arith.mulf %129, %129 : vector<16x256xf32>
    %131 = arith.mulf %129, %130 : vector<16x256xf32>
    %cst_58 = arith.constant 4.471500e-02 : f32
    %132 = vector.broadcast %cst_58 : f32 to vector<16x256xf32>
    %133 = arith.mulf %132, %131 : vector<16x256xf32>
    %134 = arith.addf %129, %133 : vector<16x256xf32>
    %cst_59 = arith.constant 0.797884583 : f32
    %135 = vector.broadcast %cst_59 : f32 to vector<16x256xf32>
    %136 = arith.mulf %135, %134 : vector<16x256xf32>
    %137 = math.tanh %136 : vector<16x256xf32>
    %cst_60 = arith.constant 1.000000e+00 : f32
    %138 = vector.broadcast %cst_60 : f32 to vector<16x256xf32>
    %139 = arith.addf %138, %137 : vector<16x256xf32>
    %cst_61 = arith.constant 5.000000e-01 : f32
    %140 = vector.broadcast %cst_61 : f32 to vector<16x256xf32>
    %141 = arith.mulf %140, %139 : vector<16x256xf32>
    %142 = arith.mulf %129, %141 : vector<16x256xf32>
    %c0_62 = arith.constant 0 : index
    %c0_63 = arith.constant 0 : index
    %c0_64 = arith.constant 0 : index
    %143 = vector.load %arg13[%c0_62, %c0_63, %c0_64] : memref<2x256x128xbf16, #tpu.memory_space<vmem>>, vector<1x256x128xbf16>
    %144 = vector.shape_cast %143 : vector<1x256x128xbf16> to vector<256x128xbf16>
    %145 = arith.extf %144 : vector<256x128xbf16> to vector<256x128xf32>
    %cst_65 = arith.constant dense<0.000000e+00> : vector<16x128xf32>
    %146 = tpu.matmul %142, %145, %cst_65 {dimension_numbers = #tpu.dot_dimension_numbers<[1], [0], [0], [1], [0, 0, 1, 1], [], []>} : vector<16x256xf32>, vector<256x128xf32>, vector<16x128xf32> -> vector<16x128xf32>
    %c0_66 = arith.constant 0 : index
    %c0_67 = arith.constant 0 : index
    %c0_68 = arith.constant 0 : index
    %147 = vector.load %arg14[%c0_66, %c0_67, %c0_68] : memref<2x1x128xf32, #tpu.memory_space<vmem>>, vector<1x1x128xf32>
    %148 = vector.shape_cast %147 : vector<1x1x128xf32> to vector<1x128xf32>
    %149 = vector.broadcast %148 : vector<1x128xf32> to vector<16x128xf32>
    %150 = arith.addf %146, %149 : vector<16x128xf32>
    %151 = arith.addf %121, %150 : vector<16x128xf32>
    %c0_69 = arith.constant 0 : index
    %c0_70 = arith.constant 0 : index
    %c0_71 = arith.constant 0 : index
    %152 = vector.load %arg15[%c0_69, %c0_70, %c0_71] : memref<2x1x128xf32, #tpu.memory_space<vmem>>, vector<1x1x128xf32>
    %153 = vector.shape_cast %152 : vector<1x1x128xf32> to vector<1x128xf32>
    %c0_72 = arith.constant 0 : index
    %c0_73 = arith.constant 0 : index
    %c0_74 = arith.constant 0 : index
    %154 = vector.load %arg16[%c0_72, %c0_73, %c0_74] : memref<2x1x128xf32, #tpu.memory_space<vmem>>, vector<1x1x128xf32>
    %155 = vector.shape_cast %154 : vector<1x1x128xf32> to vector<1x128xf32>
    %cst_75 = arith.constant dense<0.000000e+00> : vector<16xf32>
    %156 = vector.multi_reduction <add>, %151, %cst_75 [1] : vector<16x128xf32> to vector<16xf32>
    %157 = vector.shape_cast %156 : vector<16xf32> to vector<16x1xf32>
    %cst_76 = arith.constant 1.280000e+02 : f32
    %158 = vector.broadcast %cst_76 : f32 to vector<16x1xf32>
    %159 = arith.divf %157, %158 : vector<16x1xf32>
    %160 = vector.broadcast %159 : vector<16x1xf32> to vector<16x128xf32>
    %161 = arith.subf %151, %160 : vector<16x128xf32>
    %162 = arith.mulf %161, %161 : vector<16x128xf32>
    %cst_77 = arith.constant dense<0.000000e+00> : vector<16xf32>
    %163 = vector.multi_reduction <add>, %162, %cst_77 [1] : vector<16x128xf32> to vector<16xf32>
    %164 = vector.shape_cast %163 : vector<16xf32> to vector<16x1xf32>
    %cst_78 = arith.constant 1.280000e+02 : f32
    %165 = vector.broadcast %cst_78 : f32 to vector<16x1xf32>
    %166 = arith.divf %164, %165 : vector<16x1xf32>
    %167 = vector.broadcast %159 : vector<16x1xf32> to vector<16x128xf32>
    %168 = arith.subf %151, %167 : vector<16x128xf32>
    %cst_79 = arith.constant 9.99999996E-13 : f32
    %169 = vector.broadcast %cst_79 : f32 to vector<16x1xf32>
    %170 = arith.addf %166, %169 : vector<16x1xf32>
    %171 = math.rsqrt %170 : vector<16x1xf32>
    %172 = vector.broadcast %171 : vector<16x1xf32> to vector<16x128xf32>
    %173 = arith.mulf %168, %172 : vector<16x128xf32>
    %174 = vector.broadcast %153 : vector<1x128xf32> to vector<16x128xf32>
    %175 = arith.mulf %173, %174 : vector<16x128xf32>
    %176 = vector.broadcast %155 : vector<1x128xf32> to vector<16x128xf32>
    %177 = arith.addf %175, %176 : vector<16x128xf32>
    %c1 = arith.constant 1 : index
    %c0_80 = arith.constant 0 : index
    %c0_81 = arith.constant 0 : index
    %178 = vector.load %arg5[%c1, %c0_80, %c0_81] : memref<2x128x384xbf16, #tpu.memory_space<vmem>>, vector<1x128x384xbf16>
    %179 = vector.shape_cast %178 : vector<1x128x384xbf16> to vector<128x384xbf16>
    %180 = arith.extf %179 : vector<128x384xbf16> to vector<128x384xf32>
    %cst_82 = arith.constant dense<0.000000e+00> : vector<16x384xf32>
    %181 = tpu.matmul %177, %180, %cst_82 {dimension_numbers = #tpu.dot_dimension_numbers<[1], [0], [0], [1], [0, 0, 1, 1], [], []>} : vector<16x128xf32>, vector<128x384xf32>, vector<16x384xf32> -> vector<16x384xf32>
    %c1_83 = arith.constant 1 : index
    %c0_84 = arith.constant 0 : index
    %c0_85 = arith.constant 0 : index
    %182 = vector.load %arg6[%c1_83, %c0_84, %c0_85] : memref<2x1x384xf32, #tpu.memory_space<vmem>>, vector<1x1x384xf32>
    %183 = vector.shape_cast %182 : vector<1x1x384xf32> to vector<1x384xf32>
    %184 = vector.broadcast %183 : vector<1x384xf32> to vector<16x384xf32>
    %185 = arith.addf %181, %184 : vector<16x384xf32>
    %186 = vector.extract_strided_slice %185 {offsets = [0, 0], sizes = [16, 128], strides = [1, 1]} : vector<16x384xf32> to vector<16x128xf32>
    %cst_86 = arith.constant 0.176776692 : f32
    %187 = vector.broadcast %cst_86 : f32 to vector<16x128xf32>
    %188 = arith.mulf %186, %187 : vector<16x128xf32>
    %189 = vector.extract_strided_slice %185 {offsets = [0, 128], sizes = [16, 128], strides = [1, 1]} : vector<16x384xf32> to vector<16x128xf32>
    %190 = vector.extract_strided_slice %185 {offsets = [0, 256], sizes = [16, 128], strides = [1, 1]} : vector<16x384xf32> to vector<16x128xf32>
    %191 = vector.extract_strided_slice %188 {offsets = [0, 0], sizes = [16, 32], strides = [1, 1]} : vector<16x128xf32> to vector<16x32xf32>
    %192 = vector.extract_strided_slice %189 {offsets = [0, 0], sizes = [16, 32], strides = [1, 1]} : vector<16x128xf32> to vector<16x32xf32>
    %cst_87 = arith.constant dense<0.000000e+00> : vector<16x16xf32>
    %193 = tpu.matmul %191, %192, %cst_87 {dimension_numbers = #tpu.dot_dimension_numbers<[1], [1], [0], [0], [0, 0, 1, 0], [], []>} : vector<16x32xf32>, vector<16x32xf32>, vector<16x16xf32> -> vector<16x16xf32>
    %194 = arith.addf %193, %1 : vector<16x16xf32>
    %cst_88 = arith.constant dense<0xFF800000> : vector<16xf32>
    %195 = vector.multi_reduction <maximumf>, %194, %cst_88 [1] : vector<16x16xf32> to vector<16xf32>
    %196 = vector.shape_cast %195 : vector<16xf32> to vector<16x1xf32>
    %197 = vector.broadcast %196 : vector<16x1xf32> to vector<16x16xf32>
    %198 = arith.subf %194, %197 : vector<16x16xf32>
    %199 = math.exp %198 : vector<16x16xf32>
    %cst_89 = arith.constant dense<0.000000e+00> : vector<16xf32>
    %200 = vector.multi_reduction <add>, %199, %cst_89 [1] : vector<16x16xf32> to vector<16xf32>
    %201 = vector.shape_cast %200 : vector<16xf32> to vector<16x1xf32>
    %202 = tpu.reciprocal %201 {approx = true} : vector<16x1xf32> -> vector<16x1xf32>
    %203 = vector.broadcast %202 : vector<16x1xf32> to vector<16x16xf32>
    %204 = arith.mulf %199, %203 : vector<16x16xf32>
    %205 = vector.extract_strided_slice %190 {offsets = [0, 0], sizes = [16, 32], strides = [1, 1]} : vector<16x128xf32> to vector<16x32xf32>
    %cst_90 = arith.constant dense<0.000000e+00> : vector<16x32xf32>
    %206 = tpu.matmul %204, %205, %cst_90 {dimension_numbers = #tpu.dot_dimension_numbers<[1], [0], [0], [1], [0, 0, 1, 1], [], []>} : vector<16x16xf32>, vector<16x32xf32>, vector<16x32xf32> -> vector<16x32xf32>
    %207 = vector.extract_strided_slice %188 {offsets = [0, 32], sizes = [16, 32], strides = [1, 1]} : vector<16x128xf32> to vector<16x32xf32>
    %208 = vector.extract_strided_slice %189 {offsets = [0, 32], sizes = [16, 32], strides = [1, 1]} : vector<16x128xf32> to vector<16x32xf32>
    %cst_91 = arith.constant dense<0.000000e+00> : vector<16x16xf32>
    %209 = tpu.matmul %207, %208, %cst_91 {dimension_numbers = #tpu.dot_dimension_numbers<[1], [1], [0], [0], [0, 0, 1, 0], [], []>} : vector<16x32xf32>, vector<16x32xf32>, vector<16x16xf32> -> vector<16x16xf32>
    %210 = arith.addf %209, %1 : vector<16x16xf32>
    %cst_92 = arith.constant dense<0xFF800000> : vector<16xf32>
    %211 = vector.multi_reduction <maximumf>, %210, %cst_92 [1] : vector<16x16xf32> to vector<16xf32>
    %212 = vector.shape_cast %211 : vector<16xf32> to vector<16x1xf32>
    %213 = vector.broadcast %212 : vector<16x1xf32> to vector<16x16xf32>
    %214 = arith.subf %210, %213 : vector<16x16xf32>
    %215 = math.exp %214 : vector<16x16xf32>
    %cst_93 = arith.constant dense<0.000000e+00> : vector<16xf32>
    %216 = vector.multi_reduction <add>, %215, %cst_93 [1] : vector<16x16xf32> to vector<16xf32>
    %217 = vector.shape_cast %216 : vector<16xf32> to vector<16x1xf32>
    %218 = tpu.reciprocal %217 {approx = true} : vector<16x1xf32> -> vector<16x1xf32>
    %219 = vector.broadcast %218 : vector<16x1xf32> to vector<16x16xf32>
    %220 = arith.mulf %215, %219 : vector<16x16xf32>
    %221 = vector.extract_strided_slice %190 {offsets = [0, 32], sizes = [16, 32], strides = [1, 1]} : vector<16x128xf32> to vector<16x32xf32>
    %cst_94 = arith.constant dense<0.000000e+00> : vector<16x32xf32>
    %222 = tpu.matmul %220, %221, %cst_94 {dimension_numbers = #tpu.dot_dimension_numbers<[1], [0], [0], [1], [0, 0, 1, 1], [], []>} : vector<16x16xf32>, vector<16x32xf32>, vector<16x32xf32> -> vector<16x32xf32>
    %223 = vector.extract_strided_slice %188 {offsets = [0, 64], sizes = [16, 32], strides = [1, 1]} : vector<16x128xf32> to vector<16x32xf32>
    %224 = vector.extract_strided_slice %189 {offsets = [0, 64], sizes = [16, 32], strides = [1, 1]} : vector<16x128xf32> to vector<16x32xf32>
    %cst_95 = arith.constant dense<0.000000e+00> : vector<16x16xf32>
    %225 = tpu.matmul %223, %224, %cst_95 {dimension_numbers = #tpu.dot_dimension_numbers<[1], [1], [0], [0], [0, 0, 1, 0], [], []>} : vector<16x32xf32>, vector<16x32xf32>, vector<16x16xf32> -> vector<16x16xf32>
    %226 = arith.addf %225, %1 : vector<16x16xf32>
    %cst_96 = arith.constant dense<0xFF800000> : vector<16xf32>
    %227 = vector.multi_reduction <maximumf>, %226, %cst_96 [1] : vector<16x16xf32> to vector<16xf32>
    %228 = vector.shape_cast %227 : vector<16xf32> to vector<16x1xf32>
    %229 = vector.broadcast %228 : vector<16x1xf32> to vector<16x16xf32>
    %230 = arith.subf %226, %229 : vector<16x16xf32>
    %231 = math.exp %230 : vector<16x16xf32>
    %cst_97 = arith.constant dense<0.000000e+00> : vector<16xf32>
    %232 = vector.multi_reduction <add>, %231, %cst_97 [1] : vector<16x16xf32> to vector<16xf32>
    %233 = vector.shape_cast %232 : vector<16xf32> to vector<16x1xf32>
    %234 = tpu.reciprocal %233 {approx = true} : vector<16x1xf32> -> vector<16x1xf32>
    %235 = vector.broadcast %234 : vector<16x1xf32> to vector<16x16xf32>
    %236 = arith.mulf %231, %235 : vector<16x16xf32>
    %237 = vector.extract_strided_slice %190 {offsets = [0, 64], sizes = [16, 32], strides = [1, 1]} : vector<16x128xf32> to vector<16x32xf32>
    %cst_98 = arith.constant dense<0.000000e+00> : vector<16x32xf32>
    %238 = tpu.matmul %236, %237, %cst_98 {dimension_numbers = #tpu.dot_dimension_numbers<[1], [0], [0], [1], [0, 0, 1, 1], [], []>} : vector<16x16xf32>, vector<16x32xf32>, vector<16x32xf32> -> vector<16x32xf32>
    %239 = vector.extract_strided_slice %188 {offsets = [0, 96], sizes = [16, 32], strides = [1, 1]} : vector<16x128xf32> to vector<16x32xf32>
    %240 = vector.extract_strided_slice %189 {offsets = [0, 96], sizes = [16, 32], strides = [1, 1]} : vector<16x128xf32> to vector<16x32xf32>
    %cst_99 = arith.constant dense<0.000000e+00> : vector<16x16xf32>
    %241 = tpu.matmul %239, %240, %cst_99 {dimension_numbers = #tpu.dot_dimension_numbers<[1], [1], [0], [0], [0, 0, 1, 0], [], []>} : vector<16x32xf32>, vector<16x32xf32>, vector<16x16xf32> -> vector<16x16xf32>
    %242 = arith.addf %241, %1 : vector<16x16xf32>
    %cst_100 = arith.constant dense<0xFF800000> : vector<16xf32>
    %243 = vector.multi_reduction <maximumf>, %242, %cst_100 [1] : vector<16x16xf32> to vector<16xf32>
    %244 = vector.shape_cast %243 : vector<16xf32> to vector<16x1xf32>
    %245 = vector.broadcast %244 : vector<16x1xf32> to vector<16x16xf32>
    %246 = arith.subf %242, %245 : vector<16x16xf32>
    %247 = math.exp %246 : vector<16x16xf32>
    %cst_101 = arith.constant dense<0.000000e+00> : vector<16xf32>
    %248 = vector.multi_reduction <add>, %247, %cst_101 [1] : vector<16x16xf32> to vector<16xf32>
    %249 = vector.shape_cast %248 : vector<16xf32> to vector<16x1xf32>
    %250 = tpu.reciprocal %249 {approx = true} : vector<16x1xf32> -> vector<16x1xf32>
    %251 = vector.broadcast %250 : vector<16x1xf32> to vector<16x16xf32>
    %252 = arith.mulf %247, %251 : vector<16x16xf32>
    %253 = vector.extract_strided_slice %190 {offsets = [0, 96], sizes = [16, 32], strides = [1, 1]} : vector<16x128xf32> to vector<16x32xf32>
    %cst_102 = arith.constant dense<0.000000e+00> : vector<16x32xf32>
    %254 = tpu.matmul %252, %253, %cst_102 {dimension_numbers = #tpu.dot_dimension_numbers<[1], [0], [0], [1], [0, 0, 1, 1], [], []>} : vector<16x16xf32>, vector<16x32xf32>, vector<16x32xf32> -> vector<16x32xf32>
    %255 = tpu.concatenate %206, %222, %238, %254 in 1 : vector<16x32xf32>, vector<16x32xf32>, vector<16x32xf32>, vector<16x32xf32> -> vector<16x128xf32>
    %c1_103 = arith.constant 1 : index
    %c0_104 = arith.constant 0 : index
    %c0_105 = arith.constant 0 : index
    %256 = vector.load %arg7[%c1_103, %c0_104, %c0_105] : memref<2x128x128xbf16, #tpu.memory_space<vmem>>, vector<1x128x128xbf16>
    %257 = vector.shape_cast %256 : vector<1x128x128xbf16> to vector<128x128xbf16>
    %258 = arith.extf %257 : vector<128x128xbf16> to vector<128x128xf32>
    %cst_106 = arith.constant dense<0.000000e+00> : vector<16x128xf32>
    %259 = tpu.matmul %255, %258, %cst_106 {dimension_numbers = #tpu.dot_dimension_numbers<[1], [0], [0], [1], [0, 0, 1, 1], [], []>} : vector<16x128xf32>, vector<128x128xf32>, vector<16x128xf32> -> vector<16x128xf32>
    %c1_107 = arith.constant 1 : index
    %c0_108 = arith.constant 0 : index
    %c0_109 = arith.constant 0 : index
    %260 = vector.load %arg8[%c1_107, %c0_108, %c0_109] : memref<2x1x128xf32, #tpu.memory_space<vmem>>, vector<1x1x128xf32>
    %261 = vector.shape_cast %260 : vector<1x1x128xf32> to vector<1x128xf32>
    %262 = vector.broadcast %261 : vector<1x128xf32> to vector<16x128xf32>
    %263 = arith.addf %259, %262 : vector<16x128xf32>
    %264 = arith.addf %177, %263 : vector<16x128xf32>
    %c1_110 = arith.constant 1 : index
    %c0_111 = arith.constant 0 : index
    %c0_112 = arith.constant 0 : index
    %265 = vector.load %arg9[%c1_110, %c0_111, %c0_112] : memref<2x1x128xf32, #tpu.memory_space<vmem>>, vector<1x1x128xf32>
    %266 = vector.shape_cast %265 : vector<1x1x128xf32> to vector<1x128xf32>
    %c1_113 = arith.constant 1 : index
    %c0_114 = arith.constant 0 : index
    %c0_115 = arith.constant 0 : index
    %267 = vector.load %arg10[%c1_113, %c0_114, %c0_115] : memref<2x1x128xf32, #tpu.memory_space<vmem>>, vector<1x1x128xf32>
    %268 = vector.shape_cast %267 : vector<1x1x128xf32> to vector<1x128xf32>
    %cst_116 = arith.constant dense<0.000000e+00> : vector<16xf32>
    %269 = vector.multi_reduction <add>, %264, %cst_116 [1] : vector<16x128xf32> to vector<16xf32>
    %270 = vector.shape_cast %269 : vector<16xf32> to vector<16x1xf32>
    %cst_117 = arith.constant 1.280000e+02 : f32
    %271 = vector.broadcast %cst_117 : f32 to vector<16x1xf32>
    %272 = arith.divf %270, %271 : vector<16x1xf32>
    %273 = vector.broadcast %272 : vector<16x1xf32> to vector<16x128xf32>
    %274 = arith.subf %264, %273 : vector<16x128xf32>
    %275 = arith.mulf %274, %274 : vector<16x128xf32>
    %cst_118 = arith.constant dense<0.000000e+00> : vector<16xf32>
    %276 = vector.multi_reduction <add>, %275, %cst_118 [1] : vector<16x128xf32> to vector<16xf32>
    %277 = vector.shape_cast %276 : vector<16xf32> to vector<16x1xf32>
    %cst_119 = arith.constant 1.280000e+02 : f32
    %278 = vector.broadcast %cst_119 : f32 to vector<16x1xf32>
    %279 = arith.divf %277, %278 : vector<16x1xf32>
    %280 = vector.broadcast %272 : vector<16x1xf32> to vector<16x128xf32>
    %281 = arith.subf %264, %280 : vector<16x128xf32>
    %cst_120 = arith.constant 9.99999996E-13 : f32
    %282 = vector.broadcast %cst_120 : f32 to vector<16x1xf32>
    %283 = arith.addf %279, %282 : vector<16x1xf32>
    %284 = math.rsqrt %283 : vector<16x1xf32>
    %285 = vector.broadcast %284 : vector<16x1xf32> to vector<16x128xf32>
    %286 = arith.mulf %281, %285 : vector<16x128xf32>
    %287 = vector.broadcast %266 : vector<1x128xf32> to vector<16x128xf32>
    %288 = arith.mulf %286, %287 : vector<16x128xf32>
    %289 = vector.broadcast %268 : vector<1x128xf32> to vector<16x128xf32>
    %290 = arith.addf %288, %289 : vector<16x128xf32>
    %c1_121 = arith.constant 1 : index
    %c0_122 = arith.constant 0 : index
    %c0_123 = arith.constant 0 : index
    %291 = vector.load %arg11[%c1_121, %c0_122, %c0_123] : memref<2x128x256xbf16, #tpu.memory_space<vmem>>, vector<1x128x256xbf16>
    %292 = vector.shape_cast %291 : vector<1x128x256xbf16> to vector<128x256xbf16>
    %293 = arith.extf %292 : vector<128x256xbf16> to vector<128x256xf32>
    %cst_124 = arith.constant dense<0.000000e+00> : vector<16x256xf32>
    %294 = tpu.matmul %290, %293, %cst_124 {dimension_numbers = #tpu.dot_dimension_numbers<[1], [0], [0], [1], [0, 0, 1, 1], [], []>} : vector<16x128xf32>, vector<128x256xf32>, vector<16x256xf32> -> vector<16x256xf32>
    %c1_125 = arith.constant 1 : index
    %c0_126 = arith.constant 0 : index
    %c0_127 = arith.constant 0 : index
    %295 = vector.load %arg12[%c1_125, %c0_126, %c0_127] : memref<2x1x256xf32, #tpu.memory_space<vmem>>, vector<1x1x256xf32>
    %296 = vector.shape_cast %295 : vector<1x1x256xf32> to vector<1x256xf32>
    %297 = vector.broadcast %296 : vector<1x256xf32> to vector<16x256xf32>
    %298 = arith.addf %294, %297 : vector<16x256xf32>
    %299 = arith.mulf %298, %298 : vector<16x256xf32>
    %300 = arith.mulf %298, %299 : vector<16x256xf32>
    %cst_128 = arith.constant 4.471500e-02 : f32
    %301 = vector.broadcast %cst_128 : f32 to vector<16x256xf32>
    %302 = arith.mulf %301, %300 : vector<16x256xf32>
    %303 = arith.addf %298, %302 : vector<16x256xf32>
    %cst_129 = arith.constant 0.797884583 : f32
    %304 = vector.broadcast %cst_129 : f32 to vector<16x256xf32>
    %305 = arith.mulf %304, %303 : vector<16x256xf32>
    %306 = math.tanh %305 : vector<16x256xf32>
    %cst_130 = arith.constant 1.000000e+00 : f32
    %307 = vector.broadcast %cst_130 : f32 to vector<16x256xf32>
    %308 = arith.addf %307, %306 : vector<16x256xf32>
    %cst_131 = arith.constant 5.000000e-01 : f32
    %309 = vector.broadcast %cst_131 : f32 to vector<16x256xf32>
    %310 = arith.mulf %309, %308 : vector<16x256xf32>
    %311 = arith.mulf %298, %310 : vector<16x256xf32>
    %c1_132 = arith.constant 1 : index
    %c0_133 = arith.constant 0 : index
    %c0_134 = arith.constant 0 : index
    %312 = vector.load %arg13[%c1_132, %c0_133, %c0_134] : memref<2x256x128xbf16, #tpu.memory_space<vmem>>, vector<1x256x128xbf16>
    %313 = vector.shape_cast %312 : vector<1x256x128xbf16> to vector<256x128xbf16>
    %314 = arith.extf %313 : vector<256x128xbf16> to vector<256x128xf32>
    %cst_135 = arith.constant dense<0.000000e+00> : vector<16x128xf32>
    %315 = tpu.matmul %311, %314, %cst_135 {dimension_numbers = #tpu.dot_dimension_numbers<[1], [0], [0], [1], [0, 0, 1, 1], [], []>} : vector<16x256xf32>, vector<256x128xf32>, vector<16x128xf32> -> vector<16x128xf32>
    %c1_136 = arith.constant 1 : index
    %c0_137 = arith.constant 0 : index
    %c0_138 = arith.constant 0 : index
    %316 = vector.load %arg14[%c1_136, %c0_137, %c0_138] : memref<2x1x128xf32, #tpu.memory_space<vmem>>, vector<1x1x128xf32>
    %317 = vector.shape_cast %316 : vector<1x1x128xf32> to vector<1x128xf32>
    %318 = vector.broadcast %317 : vector<1x128xf32> to vector<16x128xf32>
    %319 = arith.addf %315, %318 : vector<16x128xf32>
    %320 = arith.addf %290, %319 : vector<16x128xf32>
    %c1_139 = arith.constant 1 : index
    %c0_140 = arith.constant 0 : index
    %c0_141 = arith.constant 0 : index
    %321 = vector.load %arg15[%c1_139, %c0_140, %c0_141] : memref<2x1x128xf32, #tpu.memory_space<vmem>>, vector<1x1x128xf32>
    %322 = vector.shape_cast %321 : vector<1x1x128xf32> to vector<1x128xf32>
    %c1_142 = arith.constant 1 : index
    %c0_143 = arith.constant 0 : index
    %c0_144 = arith.constant 0 : index
    %323 = vector.load %arg16[%c1_142, %c0_143, %c0_144] : memref<2x1x128xf32, #tpu.memory_space<vmem>>, vector<1x1x128xf32>
    %324 = vector.shape_cast %323 : vector<1x1x128xf32> to vector<1x128xf32>
    %cst_145 = arith.constant dense<0.000000e+00> : vector<16xf32>
    %325 = vector.multi_reduction <add>, %320, %cst_145 [1] : vector<16x128xf32> to vector<16xf32>
    %326 = vector.shape_cast %325 : vector<16xf32> to vector<16x1xf32>
    %cst_146 = arith.constant 1.280000e+02 : f32
    %327 = vector.broadcast %cst_146 : f32 to vector<16x1xf32>
    %328 = arith.divf %326, %327 : vector<16x1xf32>
    %329 = vector.broadcast %328 : vector<16x1xf32> to vector<16x128xf32>
    %330 = arith.subf %320, %329 : vector<16x128xf32>
    %331 = arith.mulf %330, %330 : vector<16x128xf32>
    %cst_147 = arith.constant dense<0.000000e+00> : vector<16xf32>
    %332 = vector.multi_reduction <add>, %331, %cst_147 [1] : vector<16x128xf32> to vector<16xf32>
    %333 = vector.shape_cast %332 : vector<16xf32> to vector<16x1xf32>
    %cst_148 = arith.constant 1.280000e+02 : f32
    %334 = vector.broadcast %cst_148 : f32 to vector<16x1xf32>
    %335 = arith.divf %333, %334 : vector<16x1xf32>
    %336 = vector.broadcast %328 : vector<16x1xf32> to vector<16x128xf32>
    %337 = arith.subf %320, %336 : vector<16x128xf32>
    %cst_149 = arith.constant 9.99999996E-13 : f32
    %338 = vector.broadcast %cst_149 : f32 to vector<16x1xf32>
    %339 = arith.addf %335, %338 : vector<16x1xf32>
    %340 = math.rsqrt %339 : vector<16x1xf32>
    %341 = vector.broadcast %340 : vector<16x1xf32> to vector<16x128xf32>
    %342 = arith.mulf %337, %341 : vector<16x128xf32>
    %343 = vector.broadcast %322 : vector<1x128xf32> to vector<16x128xf32>
    %344 = arith.mulf %342, %343 : vector<16x128xf32>
    %345 = vector.broadcast %324 : vector<1x128xf32> to vector<16x128xf32>
    %346 = arith.addf %344, %345 : vector<16x128xf32>
    %cst_150 = arith.constant dense<0.000000e+00> : vector<8x128xf32>
    %347 = tpu.matmul %2, %346, %cst_150 {dimension_numbers = #tpu.dot_dimension_numbers<[1], [0], [0], [1], [0, 0, 1, 1], [], []>} : vector<8x16xf32>, vector<16x128xf32>, vector<8x128xf32> -> vector<8x128xf32>
    %c0_151 = arith.constant 0 : index
    %c0_152 = arith.constant 0 : index
    %348 = vector.load %arg17[%c0_151, %c0_152] : memref<128x128xbf16, #tpu.memory_space<vmem>>, vector<128x128xbf16>
    %349 = arith.extf %348 : vector<128x128xbf16> to vector<128x128xf32>
    %cst_153 = arith.constant dense<0.000000e+00> : vector<8x128xf32>
    %350 = tpu.matmul %347, %349, %cst_153 {dimension_numbers = #tpu.dot_dimension_numbers<[1], [0], [0], [1], [0, 0, 1, 1], [], []>} : vector<8x128xf32>, vector<128x128xf32>, vector<8x128xf32> -> vector<8x128xf32>
    %c0_154 = arith.constant 0 : index
    %c0_155 = arith.constant 0 : index
    %351 = vector.load %arg18[%c0_154, %c0_155] : memref<1x128xf32, #tpu.memory_space<vmem>>, vector<1x128xf32>
    %352 = vector.broadcast %351 : vector<1x128xf32> to vector<8x128xf32>
    %353 = arith.addf %350, %352 : vector<8x128xf32>
    %c0_156 = arith.constant 0 : index
    %c0_157 = arith.constant 0 : index
    %354 = vector.load %arg19[%c0_156, %c0_157] : memref<8x128xf32, #tpu.memory_space<vmem>>, vector<8x128xf32>
    tpu.vector_store %arg19[%c0_156, %c0_157], %353 {strides = array<i32>} : memref<8x128xf32, #tpu.memory_space<vmem>>, vector<8x128xf32>,
    return
  }
}

</mosaic_0001>

<bundles_post_ra>
// kernel: tpu_custom_call.1
= control target key start
LH: loop header
LB: loop body
LE: loop exit
PB: predicated region body
PF: predicated region fallthrough
CT: control target
= control target key end

     0   :  { %s6816_s0 = inlined_call_operand.hbm [shape: f32[16,128], index: 0, kind: input, shape index: {}]   ;;  %s6817_s1 = inlined_call_operand.hbm [shape: f32[16,16], index: 1, kind: input, shape index: {}]   ;;  %s6818_s2 = inlined_call_operand.hbm [shape: f32[8,16], index: 2, kind: input, shape index: {}]   ;;  %s6819_s3 = inlined_call_operand.hbm [shape: bf16[128,128], index: 3, kind: input, shape index: {}]   ;;  %s6820_s4 = inlined_call_operand.hbm [shape: f32[1,128], index: 4, kind: input, shape index: {}]   ;;  %s6821_s5 = inlined_call_operand.hbm [shape: bf16[2,128,384], index: 5, kind: input, shape index: {}]   ;;  %s6822_s6 = inlined_call_operand.hbm [shape: f32[2,1,384], index: 6, kind: input, shape index: {}]   ;;  %s6823_s7 = inlined_call_operand.hbm [shape: bf16[2,128,128], index: 7, kind: input, shape index: {}]   ;;  %s6824_s8 = inlined_call_operand.hbm [shape: f32[2,1,128], index: 8, kind: input, shape index: {}]   ;;  %s6825_s9 = inlined_call_operand.hbm [shape: f32[2,1,128], index: 9, kind: input, shape index: {}]   ;;  %s6826_s10 = inlined_call_operand.hbm [shape: f32[2,1,128], index: 10, kind: input, shape index: {}]   ;;  %s6827_s11 = inlined_call_operand.hbm [shape: bf16[2,128,256], index: 11, kind: input, shape index: {}]   ;;  %s6828_s12 = inlined_call_operand.hbm [shape: f32[2,1,256], index: 12, kind: input, shape index: {}]   ;;  %s6829_s13 = inlined_call_operand.hbm [shape: bf16[2,256,128], index: 13, kind: input, shape index: {}]   ;;  %s6830_s14 = inlined_call_operand.hbm [shape: f32[2,1,128], index: 14, kind: input, shape index: {}]   ;;  %s6831_s15 = inlined_call_operand.hbm [shape: f32[2,1,128], index: 15, kind: input, shape index: {}]   ;;  %s6832_s16 = inlined_call_operand.hbm [shape: f32[2,1,128], index: 16, kind: input, shape index: {}]   ;;  %s6833_s17 = inlined_call_operand.vmem [shape: bf16[128,128], index: 17, kind: input, shape index: {}]   ;;  %s6834_s18 = inlined_call_operand.vmem [shape: f32[1,128], index: 18, kind: input, shape index: {}]   ;;  %s6835_s19 = inlined_call_operand.hbm [shape: f32[8,128], index: 19, kind: output, shape index: {}]  }
   0x1   :  { %6849 = sst [smem:[#allocation40_spill]] %s6816_s0 }
   0x2   :  { %6850 = sst [smem:[#allocation41_spill]] %s6817_s1 }
   0x3   :  { %6851 = sst [smem:[#allocation42_spill]] %s6818_s2 }
   0x4   :  { %6852 = sst [smem:[#allocation43_spill]] %s6819_s3 }
   0x5   :  { %6853 = sst [smem:[#allocation44_spill]] %s6835_s19 }
   0x6   :  { %24 = vsyncpa [#allocation3], 0 }
   0x7   :  { %25 = vsyncpa [#allocation6], 0 }
   0x8   :  { %26 = vsyncpa [#allocation9], 0 }
   0x9   :  { %27 = vsyncpa [#allocation12], 0 }
   0xa   :  { %28 = vsyncpa [#allocation15], 0 }
   0xb   :  { %29 = vsyncpa [#allocation18], 0 }
   0xc   :  { %30 = vsyncpa [#allocation21], 0 }
   0xd   :  { %31 = vsyncpa [#allocation24], 0 }
   0xe   :  { %32 = vsyncpa [#allocation27], 0 }
   0xf   :  { %33 = vsyncpa [#allocation4], 0  ;;  %s6072_s0 = smov [#allocation5]   ;;  %s6073_s20 = smov [#allocation8]  }
  0x10   :  { %s51_s30 = sshll.u32 %s6072_s0, 4  ;;  %s73_s21 = sshll.u32 %s6073_s20, 4  ;;  %s52_s30 = int_to_ptr.vmem [resolvable:$true] %s51_s30  ;;  %s6206_s21 = int_to_ptr.vmem [resolvable:$true] %s73_s21 }
  0x11   :  { %s6854_s2 = sld [smem:[#allocation41_spill]] }
  0x17   :  { %s5656_s23 = scalar_lea.hbm %s6854_s2, 256 }
  0x18   :  { %p5657_p0 = scmp.ne.s32.totalorder %s6854_s2, %s5656_s23  ;;  %p5660_p1 = scmp.lt.u32.totalorder %s5656_s23, %s6854_s2 }
  0x1a   :  { %p5662_p2 = pnand %p5660_p1, %p5657_p0 }
  0x1c   :  { %5665 = shalt.err (!%p5662_p2)
}
  0x1d   :  { %s5666_s27 = scalar_lea.vmem %s52_s30, 256  ;;  %p5671_p4 = scmp.lt.s32.totalorder %s52_s30, %s52_s30 }
  0x1e   :  { %p5667_p3 = scmp.ne.s32.totalorder %s52_s30, %s5666_s27  ;;  %p5672_p5 = scmp.lt.s32.totalorder %s5666_s27, %s5666_s27 }
  0x20   :  { %p5673_p6 = por %p5672_p5, %p5671_p4 }
  0x22   :  { %p5674_p7 = pnand %p5673_p6, %p5667_p3 }
  0x24   :  { %5677 = shalt.err (!%p5674_p7)
}
  0x25   :  { %s6841_s28 = smov 128   ;;  %s6843_s29 = smov 8  }
  0x26   :  { %57 = dma.hbm_to_vmem [thread:$0]  %s6854_s2, 256, %s52_s30, [#allocation6], %s6841_s28, %s6841_s28, %s6843_s29  }
  0x27   :  { %s6855_s23 = sld [smem:[#allocation43_spill]] }
  0x2d   :  { %s5678_s24 = scalar_lea.hbm %s6855_s23, 1024 }
  0x2e   :  { %p5679_p8 = scmp.ne.s32.totalorder %s6855_s23, %s5678_s24  ;;  %p5682_p9 = scmp.lt.u32.totalorder %s5678_s24, %s6855_s23 }
  0x30   :  { %p5684_p10 = pnand %p5682_p9, %p5679_p8 }
  0x32   :  { %5687 = shalt.err (!%p5684_p10)
}
  0x33   :  { %s5688_s19 = scalar_lea.vmem %s6206_s21, 1024  ;;  %p5693_p12 = scmp.lt.s32.totalorder %s6206_s21, %s6206_s21 }
  0x34   :  { %p5689_p11 = scmp.ne.s32.totalorder %s6206_s21, %s5688_s19  ;;  %p5694_p13 = scmp.lt.s32.totalorder %s5688_s19, %s5688_s19 }
  0x36   :  { %p5695_p0 = por %p5694_p13, %p5693_p12 }
  0x38   :  { %p5696_p1 = pnand %p5695_p0, %p5689_p11 }
  0x3a   :  { %5699 = shalt.err (!%p5696_p1)
}
  0x3b   :  { %s6845_s30 = smov 64   ;;  %s6077_s2 = smov 4  }
  0x3c   :  { %79 = dma.hbm_to_vmem [thread:$0]  %s6855_s23, 1024, %s6206_s21, [#allocation9], %s6845_s30, %s6845_s30, %s6077_s2  }
  0x3d   :  { %s6078_s1 = smov [#allocation11]   ;;  %s5700_s19 = scalar_lea.hbm %s6821_s5, 6144 }
  0x3e   :  { %s95_s22 = sshll.u32 %s6078_s1, 4  ;;  %p5701_p2 = scmp.ne.s32.totalorder %s6821_s5, %s5700_s19  ;;  %s96_s22 = int_to_ptr.vmem [resolvable:$true] %s95_s22 }
  0x3f   :  { %p5704_p3 = scmp.lt.u32.totalorder %s5700_s19, %s6821_s5 }
  0x41   :  { %p5706_p4 = pnand %p5704_p3, %p5701_p2 }
  0x43   :  { %5709 = shalt.err (!%p5706_p4)
}
  0x44   :  { %s5710_s29 = scalar_lea.vmem %s96_s22, 6144  ;;  %p5715_p6 = scmp.lt.s32.totalorder %s96_s22, %s96_s22 }
  0x45   :  { %p5711_p5 = scmp.ne.s32.totalorder %s96_s22, %s5710_s29  ;;  %p5716_p7 = scmp.lt.s32.totalorder %s5710_s29, %s5710_s29 }
  0x47   :  { %p5717_p8 = por %p5716_p7, %p5715_p6 }
  0x49   :  { %p5718_p9 = pnand %p5717_p8, %p5711_p5 }
  0x4b   :  { %5721 = shalt.err (!%p5718_p9)
}
  0x4c   :  { %s6079_s21 = smov 192   ;;  %s6080_s23 = smov 12  }
  0x4d   :  { %101 = dma.hbm_to_vmem [thread:$0]  %s6821_s5, 6144, %s96_s22, [#allocation12], %s6079_s21, %s6079_s21, %s6080_s23  }
  0x4e   :  { %s6081_s1 = smov [#allocation14]   ;;  %s5722_s19 = scalar_lea.hbm %s6823_s7, 2048 }
  0x4f   :  { %s119_s24 = sshll.u32 %s6081_s1, 4  ;;  %p5723_p10 = scmp.ne.s32.totalorder %s6823_s7, %s5722_s19  ;;  %s120_s24 = int_to_ptr.vmem [resolvable:$true] %s119_s24 }
  0x50   :  { %p5726_p11 = scmp.lt.u32.totalorder %s5722_s19, %s6823_s7 }
  0x52   :  { %p5728_p12 = pnand %p5726_p11, %p5723_p10 }
  0x54   :  { %5731 = shalt.err (!%p5728_p12)
}
  0x55   :  { %s5732_s30 = scalar_lea.vmem %s120_s24, 2048  ;;  %p5737_p0 = scmp.lt.s32.totalorder %s120_s24, %s120_s24 }
  0x56   :  { %p5733_p13 = scmp.ne.s32.totalorder %s120_s24, %s5732_s30  ;;  %p5738_p1 = scmp.lt.s32.totalorder %s5732_s30, %s5732_s30 }
  0x58   :  { %p5739_p2 = por %p5738_p1, %p5737_p0 }
  0x5a   :  { %p5740_p3 = pnand %p5739_p2, %p5733_p13 }
  0x5c   :  { %5743 = shalt.err (!%p5740_p3)
}
  0x5d   :  { %s6856_s5 = smov 64   ;;  %s6082_s23 = smov [#allocation17]  }
  0x5e   :  { %125 = dma.hbm_to_vmem [thread:$0]  %s6823_s7, 2048, %s120_s24, [#allocation15], %s6856_s5, %s6856_s5, %s6077_s2  }
  0x5f   :  { %s143_s0 = sshll.u32 %s6082_s23, 4  ;;  %s6083_s20 = smov [#allocation20]   ;;  %s144_s0 = int_to_ptr.vmem [resolvable:$true] %s143_s0 }
  0x60   :  { %s167_s1 = sshll.u32 %s6083_s20, 4  ;;  %s5744_s30 = scalar_lea.hbm %s6825_s9, 32  ;;  %s6270_s1 = int_to_ptr.vmem [resolvable:$true] %s167_s1 }
  0x61   :  { %p5745_p4 = scmp.ne.s32.totalorder %s6825_s9, %s5744_s30  ;;  %p5748_p5 = scmp.lt.u32.totalorder %s5744_s30, %s6825_s9 }
  0x63   :  { %p5750_p6 = pnand %p5748_p5, %p5745_p4 }
  0x65   :  { %5753 = shalt.err (!%p5750_p6)
}
  0x66   :  { %s5754_s7 = scalar_lea.vmem %s144_s0, 32  ;;  %p5759_p8 = scmp.lt.s32.totalorder %s144_s0, %s144_s0 }
  0x67   :  { %p5755_p7 = scmp.ne.s32.totalorder %s144_s0, %s5754_s7  ;;  %p5760_p9 = scmp.lt.s32.totalorder %s5754_s7, %s5754_s7 }
  0x69   :  { %p5761_p10 = por %p5760_p9, %p5759_p8 }
  0x6b   :  { %p5762_p11 = pnand %p5761_p10, %p5755_p7 }
  0x6d   :  { %5765 = shalt.err (!%p5762_p11)
}
  0x6e   :  { %s6847_s24 = smov 16   ;;  %s6085_s27 = smov 1  }
  0x6f   :  { %149 = dma.hbm_to_vmem [thread:$0]  %s6825_s9, 32, %s144_s0, [#allocation18], %s6847_s24, %s6847_s24, %s6085_s27  }
  0x70   :  { %s5766_s28 = scalar_lea.hbm %s6827_s11, 4096 }
  0x71   :  { %p5767_p12 = scmp.ne.s32.totalorder %s6827_s11, %s5766_s28  ;;  %p5770_p13 = scmp.lt.u32.totalorder %s5766_s28, %s6827_s11 }
  0x73   :  { %p5772_p0 = pnand %p5770_p13, %p5767_p12 }
  0x75   :  { %5775 = shalt.err (!%p5772_p0)
}
  0x76   :  { %s5776_s26 = scalar_lea.vmem %s6270_s1, 4096  ;;  %p5781_p2 = scmp.lt.s32.totalorder %s6270_s1, %s6270_s1 }
  0x77   :  { %p5777_p1 = scmp.ne.s32.totalorder %s6270_s1, %s5776_s26  ;;  %p5782_p3 = scmp.lt.s32.totalorder %s5776_s26, %s5776_s26 }
  0x79   :  { %p5783_p4 = por %p5782_p3, %p5781_p2 }
  0x7b   :  { %p5784_p5 = pnand %p5783_p4, %p5777_p1 }
  0x7d   :  { %5787 = shalt.err (!%p5784_p5)
}
  0x7e   :  { %s6857_s9 = smov 8   ;;  %s6858_s0 = smov 128  }
  0x7f   :  { %173 = dma.hbm_to_vmem [thread:$0]  %s6827_s11, 4096, %s6270_s1, [#allocation21], %s6858_s0, %s6858_s0, %s6857_s9  }
  0x80   :  { %s6086_s22 = smov [#allocation23]   ;;  %s6087_s23 = smov [#allocation26]  }
  0x81   :  { %s191_s21 = sshll.u32 %s6086_s22, 4  ;;  %s215_s20 = sshll.u32 %s6087_s23, 4  ;;  %s192_s21 = int_to_ptr.vmem [resolvable:$true] %s191_s21  ;;  %s6307_s20 = int_to_ptr.vmem [resolvable:$true] %s215_s20 }
  0x82   :  { %s5788_s30 = scalar_lea.hbm %s6829_s13, 4096 }
  0x83   :  { %p5789_p6 = scmp.ne.s32.totalorder %s6829_s13, %s5788_s30  ;;  %p5792_p7 = scmp.lt.u32.totalorder %s5788_s30, %s6829_s13 }
  0x85   :  { %p5794_p8 = pnand %p5792_p7, %p5789_p6 }
  0x87   :  { %5797 = shalt.err (!%p5794_p8)
}
  0x88   :  { %s5798_s11 = scalar_lea.vmem %s192_s21, 4096  ;;  %p5803_p10 = scmp.lt.s32.totalorder %s192_s21, %s192_s21 }
  0x89   :  { %p5799_p9 = scmp.ne.s32.totalorder %s192_s21, %s5798_s11  ;;  %p5804_p11 = scmp.lt.s32.totalorder %s5798_s11, %s5798_s11 }
  0x8b   :  { %p5805_p12 = por %p5804_p11, %p5803_p10 }
  0x8d   :  { %p5806_p13 = pnand %p5805_p12, %p5799_p9 }
  0x8f   :  { %5809 = shalt.err (!%p5806_p13)
}
  0x90   :  { %197 = dma.hbm_to_vmem [thread:$0]  %s6829_s13, 4096, %s192_s21, [#allocation24], %s6856_s5, %s6856_s5, %s6077_s2  }
  0x91   :  { %s5810_s24 = scalar_lea.hbm %s6831_s15, 32 }
  0x92   :  { %p5811_p0 = scmp.ne.s32.totalorder %s6831_s15, %s5810_s24  ;;  %p5814_p1 = scmp.lt.u32.totalorder %s5810_s24, %s6831_s15 }
  0x94   :  { %p5816_p2 = pnand %p5814_p1, %p5811_p0 }
  0x96   :  { %5819 = shalt.err (!%p5816_p2)
}
  0x97   :  { %s5820_s19 = scalar_lea.vmem %s6307_s20, 32  ;;  %p5825_p4 = scmp.lt.s32.totalorder %s6307_s20, %s6307_s20 }
  0x98   :  { %p5821_p3 = scmp.ne.s32.totalorder %s6307_s20, %s5820_s19  ;;  %p5826_p5 = scmp.lt.s32.totalorder %s5820_s19, %s5820_s19 }
  0x9a   :  { %p5827_p6 = por %p5826_p5, %p5825_p4 }
  0x9c   :  { %p5828_p7 = pnand %p5827_p6, %p5821_p3 }
  0x9e   :  { %5831 = shalt.err (!%p5828_p7)
}
  0x9f   :  { %s6859_s13 = smov 16   ;;  %s6088_s3 = smov [#allocation2]  }
  0xa0   :  { %221 = dma.hbm_to_vmem [thread:$0]  %s6831_s15, 32, %s6307_s20, [#allocation27], %s6859_s13, %s6859_s13, %s6085_s27  }
  0xa1   :  { %s39_s26 = sshll.u32 %s6088_s3, 4  ;;  %s6089_s11 = smov [#allocation7]   ;;  %s40_s26 = int_to_ptr.vmem [resolvable:$true] %s39_s26 }
  0xa2   :  { %s64_s1 = sshll.u32 %s6089_s11, 4  ;;  %s6860_s22 = sld [smem:[#allocation40_spill]]  ;;  %s65_s1 = int_to_ptr.vmem [resolvable:$true] %s64_s1 }
  0xa8   :  { %s5832_s24 = scalar_lea.hbm %s6860_s22, 256 }
  0xa9   :  { %p5833_p8 = scmp.ne.s32.totalorder %s6860_s22, %s5832_s24  ;;  %p5836_p9 = scmp.lt.u32.totalorder %s5832_s24, %s6860_s22 }
  0xab   :  { %p5838_p10 = pnand %p5836_p9, %p5833_p8 }
  0xad   :  { %5841 = shalt.err (!%p5838_p10)
}
  0xae   :  { %s5842_s15 = scalar_lea.vmem %s40_s26, 256  ;;  %p5847_p12 = scmp.lt.s32.totalorder %s40_s26, %s40_s26 }
  0xaf   :  { %p5843_p11 = scmp.ne.s32.totalorder %s40_s26, %s5842_s15  ;;  %p5848_p13 = scmp.lt.s32.totalorder %s5842_s15, %s5842_s15 }
  0xb1   :  { %p5849_p0 = por %p5848_p13, %p5847_p12 }
  0xb3   :  { %p5850_p1 = pnand %p5849_p0, %p5843_p11 }
  0xb5   :  { %5853 = shalt.err (!%p5850_p1)
}
  0xb6   :  { %45 = dma.hbm_to_vmem [thread:$0]  %s6860_s22, 256, %s40_s26, [#allocation3], %s6858_s0, %s6858_s0, %s6857_s9  }
  0xb7   :  { %s6861_s3 = sld [smem:[#allocation42_spill]] }
  0xbd   :  { %s5854_s11 = scalar_lea.hbm %s6861_s3, 128 }
  0xbe   :  { %p5855_p2 = scmp.ne.s32.totalorder %s6861_s3, %s5854_s11  ;;  %p5858_p3 = scmp.lt.u32.totalorder %s5854_s11, %s6861_s3 }
  0xc0   :  { %p5860_p4 = pnand %p5858_p3, %p5855_p2 }
  0xc2   :  { %5863 = shalt.err (!%p5860_p4)
}
  0xc3   :  { %s5864_s28 = scalar_lea.vmem %s65_s1, 128  ;;  %p5869_p6 = scmp.lt.s32.totalorder %s65_s1, %s65_s1 }
  0xc4   :  { %p5865_p5 = scmp.ne.s32.totalorder %s65_s1, %s5864_s28  ;;  %p5870_p7 = scmp.lt.s32.totalorder %s5864_s28, %s5864_s28 }
  0xc6   :  { %p5871_p8 = por %p5870_p7, %p5869_p6 }
  0xc8   :  { %p5872_p9 = pnand %p5871_p8, %p5865_p5 }
  0xca   :  { %5875 = shalt.err (!%p5872_p9)
}
  0xcb   :  { %67 = dma.hbm_to_vmem [thread:$0]  %s6861_s3, 128, %s65_s1, [#allocation6]  }
  0xcc   :  { %s6090_s26 = smov [#allocation10]   ;;  %s6091_s25 = smov [#allocation13]  }
  0xcd   :  { %s86_s22 = sshll.u32 %s6090_s26, 4  ;;  %s107_s30 = sshll.u32 %s6091_s25, 4  ;;  %s87_s22 = int_to_ptr.vmem [resolvable:$true] %s86_s22  ;;  %s6371_s30 = int_to_ptr.vmem [resolvable:$true] %s107_s30 }
  0xce   :  { %s5876_s19 = scalar_lea.hbm %s6820_s4, 16 }
  0xcf   :  { %p5877_p10 = scmp.ne.s32.totalorder %s6820_s4, %s5876_s19  ;;  %p5880_p11 = scmp.lt.u32.totalorder %s5876_s19, %s6820_s4 }
  0xd1   :  { %p5882_p12 = pnand %p5880_p11, %p5877_p10 }
  0xd3   :  { %5885 = shalt.err (!%p5882_p12)
}
  0xd4   :  { %s5886_s1 = scalar_lea.vmem %s87_s22, 16  ;;  %s5890_s3 = scalar_lea.vmem %s87_s22, 32 }
  0xd5   :  { %p5887_p13 = scmp.ne.s32.totalorder %s87_s22, %s5886_s1  ;;  %p5891_p0 = scmp.lt.s32.totalorder %s87_s22, %s87_s22 }
  0xd6   :  { %p5892_p1 = scmp.lt.s32.totalorder %s5890_s3, %s5886_s1 }
  0xd8   :  { %p5893_p2 = por %p5892_p1, %p5891_p0 }
  0xda   :  { %p5894_p3 = pnand %p5893_p2, %p5887_p13 }
  0xdc   :  { %5897 = shalt.err (!%p5894_p3)
}
  0xdd   :  { %89 = dma.hbm_to_vmem [thread:$0]  %s6820_s4, 16, %s87_s22, [#allocation9]  }
  0xde   :  { %s5898_s9 = scalar_lea.hbm %s6822_s6, 96 }
  0xdf   :  { %p5899_p4 = scmp.ne.s32.totalorder %s6822_s6, %s5898_s9  ;;  %p5902_p5 = scmp.lt.u32.totalorder %s5898_s9, %s6822_s6 }
  0xe1   :  { %p5904_p6 = pnand %p5902_p5, %p5899_p4 }
  0xe3   :  { %5907 = shalt.err (!%p5904_p6)
}
  0xe4   :  { %s5908_s20 = scalar_lea.vmem %s6371_s30, 96  ;;  %p5913_p8 = scmp.lt.s32.totalorder %s6371_s30, %s6371_s30 }
  0xe5   :  { %p5909_p7 = scmp.ne.s32.totalorder %s6371_s30, %s5908_s20  ;;  %p5914_p9 = scmp.lt.s32.totalorder %s5908_s20, %s5908_s20 }
  0xe7   :  { %p5915_p10 = por %p5914_p9, %p5913_p8 }
  0xe9   :  { %p5916_p11 = pnand %p5915_p10, %p5909_p7 }
  0xeb   :  { %5919 = shalt.err (!%p5916_p11)
}
  0xec   :  { %s6092_s4 = smov 48   ;;  %s6093_s22 = smov 3  }
  0xed   :  { %113 = dma.hbm_to_vmem [thread:$0]  %s6822_s6, 96, %s6371_s30, [#allocation12], %s6092_s4, %s6092_s4, %s6093_s22  }
  0xee   :  { %s6094_s21 = smov [#allocation16]   ;;  %s6095_s29 = smov [#allocation19]  }
  0xef   :  { %s131_s11 = sshll.u32 %s6094_s21, 4  ;;  %s155_s1 = sshll.u32 %s6095_s29, 4  ;;  %s132_s11 = int_to_ptr.vmem [resolvable:$true] %s131_s11  ;;  %s6402_s1 = int_to_ptr.vmem [resolvable:$true] %s155_s1 }
  0xf0   :  { %s5920_s24 = scalar_lea.hbm %s6824_s8, 32 }
  0xf1   :  { %p5921_p12 = scmp.ne.s32.totalorder %s6824_s8, %s5920_s24  ;;  %p5924_p13 = scmp.lt.u32.totalorder %s5920_s24, %s6824_s8 }
  0xf3   :  { %p5926_p0 = pnand %p5924_p13, %p5921_p12 }
  0xf5   :  { %5929 = shalt.err (!%p5926_p0)
}
  0xf6   :  { %s5930_s6 = scalar_lea.vmem %s132_s11, 32  ;;  %p5935_p2 = scmp.lt.s32.totalorder %s132_s11, %s132_s11 }
  0xf7   :  { %p5931_p1 = scmp.ne.s32.totalorder %s132_s11, %s5930_s6  ;;  %p5936_p3 = scmp.lt.s32.totalorder %s5930_s6, %s5930_s6 }
  0xf9   :  { %p5937_p4 = por %p5936_p3, %p5935_p2 }
  0xfb   :  { %p5938_p5 = pnand %p5937_p4, %p5931_p1 }
  0xfd   :  { %5941 = shalt.err (!%p5938_p5)
}
  0xfe   :  { %137 = dma.hbm_to_vmem [thread:$0]  %s6824_s8, 32, %s132_s11, [#allocation15], %s6859_s13, %s6859_s13, %s6085_s27  }
  0xff   :  { %s5942_s20 = scalar_lea.hbm %s6826_s10, 32 }
 0x100   :  { %p5943_p6 = scmp.ne.s32.totalorder %s6826_s10, %s5942_s20  ;;  %p5946_p7 = scmp.lt.u32.totalorder %s5942_s20, %s6826_s10 }
 0x102   :  { %p5948_p8 = pnand %p5946_p7, %p5943_p6 }
 0x104   :  { %5951 = shalt.err (!%p5948_p8)
}
 0x105   :  { %s5952_s21 = scalar_lea.vmem %s6402_s1, 32  ;;  %p5957_p10 = scmp.lt.s32.totalorder %s6402_s1, %s6402_s1 }
 0x106   :  { %p5953_p9 = scmp.ne.s32.totalorder %s6402_s1, %s5952_s21  ;;  %p5958_p11 = scmp.lt.s32.totalorder %s5952_s21, %s5952_s21 }
 0x108   :  { %p5959_p12 = por %p5958_p11, %p5957_p10 }
 0x10a   :  { %p5960_p13 = pnand %p5959_p12, %p5953_p9 }
 0x10c   :  { %5963 = shalt.err (!%p5960_p13)
}
 0x10d   :  { %161 = dma.hbm_to_vmem [thread:$0]  %s6826_s10, 32, %s6402_s1, [#allocation18], %s6859_s13, %s6859_s13, %s6085_s27  }
 0x10e   :  { %s6096_s29 = smov [#allocation22]   ;;  %s5964_s23 = scalar_lea.hbm %s6828_s12, 64 }
 0x10f   :  { %s179_s3 = sshll.u32 %s6096_s29, 4  ;;  %p5965_p0 = scmp.ne.s32.totalorder %s6828_s12, %s5964_s23  ;;  %s180_s3 = int_to_ptr.vmem [resolvable:$true] %s179_s3 }
 0x110   :  { %p5968_p1 = scmp.lt.u32.totalorder %s5964_s23, %s6828_s12 }
 0x112   :  { %p5970_p2 = pnand %p5968_p1, %p5965_p0 }
 0x114   :  { %5973 = shalt.err (!%p5970_p2)
}
 0x115   :  { %s5974_s30 = scalar_lea.vmem %s180_s3, 64  ;;  %p5979_p4 = scmp.lt.s32.totalorder %s180_s3, %s180_s3 }
 0x116   :  { %p5975_p3 = scmp.ne.s32.totalorder %s180_s3, %s5974_s30  ;;  %p5980_p5 = scmp.lt.s32.totalorder %s5974_s30, %s5974_s30 }
 0x118   :  { %p5981_p6 = por %p5980_p5, %p5979_p4 }
 0x11a   :  { %p5982_p7 = pnand %p5981_p6, %p5975_p3 }
 0x11c   :  { %5985 = shalt.err (!%p5982_p7)
}
 0x11d   :  { %s6097_s10 = smov 32   ;;  %s6098_s1 = smov 2  }
 0x11e   :  { %185 = dma.hbm_to_vmem [thread:$0]  %s6828_s12, 64, %s180_s3, [#allocation21], %s6097_s10, %s6097_s10, %s6098_s1  }
 0x11f   :  { %s6099_s15 = smov [#allocation25]   ;;  %s6100_s4 = smov [#allocation28]  }
 0x120   :  { %s203_s20 = sshll.u32 %s6099_s15, 4  ;;  %s227_s22 = sshll.u32 %s6100_s4, 4  ;;  %s204_s20 = int_to_ptr.vmem [resolvable:$true] %s203_s20  ;;  %s228_s22 = int_to_ptr.vmem [resolvable:$true] %s227_s22 }
 0x121   :  { %s5986_s21 = scalar_lea.hbm %s6830_s14, 32 }
 0x122   :  { %p5987_p8 = scmp.ne.s32.totalorder %s6830_s14, %s5986_s21  ;;  %p5990_p9 = scmp.lt.u32.totalorder %s5986_s21, %s6830_s14 }
 0x124   :  { %p5992_p10 = pnand %p5990_p9, %p5987_p8 }
 0x126   :  { %5995 = shalt.err (!%p5992_p10)
}
 0x127   :  { %s5996_s12 = scalar_lea.vmem %s204_s20, 32  ;;  %p6001_p12 = scmp.lt.s32.totalorder %s204_s20, %s204_s20 }
 0x128   :  { %p5997_p11 = scmp.ne.s32.totalorder %s204_s20, %s5996_s12  ;;  %p6002_p13 = scmp.lt.s32.totalorder %s5996_s12, %s5996_s12 }
 0x12a   :  { %p6003_p0 = por %p6002_p13, %p6001_p12 }
 0x12c   :  { %p6004_p1 = pnand %p6003_p0, %p5997_p11 }
 0x12e   :  { %6007 = shalt.err (!%p6004_p1)
}
 0x12f   :  { %209 = dma.hbm_to_vmem [thread:$0]  %s6830_s14, 32, %s204_s20, [#allocation24], %s6859_s13, %s6859_s13, %s6085_s27  }
 0x130   :  { %s6008_s9 = scalar_lea.hbm %s6832_s16, 32 }
 0x131   :  { %p6009_p2 = scmp.ne.s32.totalorder %s6832_s16, %s6008_s9  ;;  %p6012_p3 = scmp.lt.u32.totalorder %s6008_s9, %s6832_s16 }
 0x133   :  { %p6014_p4 = pnand %p6012_p3, %p6009_p2 }
 0x135   :  { %6017 = shalt.err (!%p6014_p4)
}
 0x136   :  { %s6018_s26 = scalar_lea.vmem %s228_s22, 32  ;;  %p6023_p6 = scmp.lt.s32.totalorder %s228_s22, %s228_s22 }
 0x137   :  { %p6019_p5 = scmp.ne.s32.totalorder %s228_s22, %s6018_s26  ;;  %p6024_p7 = scmp.lt.s32.totalorder %s6018_s26, %s6018_s26 }
 0x139   :  { %p6025_p8 = por %p6024_p7, %p6023_p6 }
 0x13b   :  { %p6026_p9 = pnand %p6025_p8, %p6019_p5 }
 0x13d   :  { %6029 = shalt.err (!%p6026_p9)
}
 0x13e   :  { %233 = dma.hbm_to_vmem [thread:$0]  %s6832_s16, 32, %s228_s22, [#allocation27], %s6859_s13, %s6859_s13, %s6085_s27  }
 0x13f   :  { %6052 = dma.done.wait [#allocation3], 256  }
 0x140   :  { %6053 = vsyncadd [#allocation3], 4294967040 }
 0x141   :  { %6054 = dma.done.wait [#allocation6], 384  }
 0x142   :  { %6055 = vsyncadd [#allocation6], 4294966912 }
 0x143   :  { %6056 = dma.done.wait [#allocation9], 1040  }
 0x144   :  { %6057 = vsyncadd [#allocation9], 4294966256 }
 0x145   :  { %6058 = dma.done.wait [#allocation12], 6240  }
 0x146   :  { %6059 = vsyncadd [#allocation12], 4294961056 }
 0x147   :  { %6060 = dma.done.wait [#allocation15], 2080  }
 0x148   :  { %6061 = vsyncadd [#allocation15], 4294965216 }
 0x149   :  { %6062 = dma.done.wait [#allocation18], 64  }
 0x14a   :  { %6063 = vsyncadd [#allocation18], 4294967232 }
 0x14b   :  { %6064 = dma.done.wait [#allocation21], 4160  }
 0x14c   :  { %6065 = vsyncadd [#allocation21], 4294963136 }
 0x14d   :  { %6066 = dma.done.wait [#allocation24], 4128  }
 0x14e   :  { %6067 = vsyncadd [#allocation24], 4294963168 }
 0x14f   :  { %6068 = dma.done.wait [#allocation27], 64  }
 0x150   :  { %6069 = vsyncadd [#allocation27], 4294967232  ;;  %v3875_v0 = vld [vmem:[#allocation8] sm:$0xff]   ;;  %v4130_v1 = vld [vmem:[#allocation8 + $0x8] sm:$0xff]   ;;  %v6101_v34 = vmov 0.0   ;;  %v490_v40 = vlaneseq  ;;  %vm659_vm0 = vcmask 261120  }
 0x151   :  { %4768 = vmatprep.subr.bf16.mxu0 %v3875_v0  ;;  %v289_v2 = vld [vmem:[#allocation2] sm:$0xff]  ;;  %v4131_v3 = vld [vmem:[#allocation8 + $0x10] sm:$0xff]   ;;  %v4133_v10 = vld [vmem:[#allocation8 + $0x20] sm:$0xff]   ;;  %569 = vmatprep.mubr.f32.mxu1 %v6101_v34  ;;  %s6102_s16 = smov 96   ;;  %vm747_vm2 = vcmask 130048   ;;  %vm1479_vm3 = vcmask 523264  }
 0x152   :  { %4770 = vmatpush3.bf16.msra.mxu0 %v3875_v0  ;;  %4470 = vmatprep.mubr.f32.mxu0 %v289_v2  ;;  %v5446_v4 = vld [vmem:[#allocation11 + $0x4] ss:$12 sps:$4 sm:$0xff]   ;;  %v5448_v5 = vld [vmem:[#allocation11] ss:$12 sps:$4 sm:$0xff]   ;;  %v4132_v6 = vld [vmem:[#allocation8 + $0x18] sm:$0xff]   ;;  %v6493_v41 = vshrl.u32 %v490_v40, 7 }
 0x153   :  { %4772 = vmatprep.subr.bf16.mxu0 %v4130_v1  ;;  %4800 = vmatprep.subr.bf16.mxu1 %v5446_v4  ;;  %v5450_v7 = vld [vmem:[#allocation11 + $0x1c] ss:$12 sps:$4 sm:$0xff]   ;;  %v5452_v8 = vld [vmem:[#allocation11 + $0x18] ss:$12 sps:$4 sm:$0xff]   ;;  %v5454_v9 = vld [vmem:[#allocation11 + $0x34] ss:$12 sps:$4 sm:$0xff]  }
 0x154   :  { %4802 = vmatpush1.bf16.msra.mxu1 %v5448_v5  ;;  %v5456_v11 = vld [vmem:[#allocation11 + $0x30] ss:$12 sps:$4 sm:$0xff]   ;;  %v5458_v12 = vld [vmem:[#allocation11 + $0x4c] ss:$12 sps:$4 sm:$0xff]   ;;  %v5460_v14 = vld [vmem:[#allocation11 + $0x48] ss:$12 sps:$4 sm:$0xff]  }
 0x155   :  { %4804 = vmatprep.subr.bf16.mxu1 %v5450_v7  ;;  %v4134_v13 = vld [vmem:[#allocation8 + $0x28] sm:$0xff]   ;;  %v4135_v16 = vld [vmem:[#allocation8 + $0x30] sm:$0xff]   ;;  %v4136_v20 = vld [vmem:[#allocation8 + $0x38] sm:$0xff]   ;;  %v6496_v42 = vsub.s32 0, %v6493_v41  ;;  %v500_v44 = vsub.s32 2, %v6493_v41  ;;  %v6501_v46 = vsub.s32 1, %v6493_v41 }
 0x156   :  { %4774 = vmatpush3.bf16.msra.mxu0 %v4130_v1  ;;  %v5462_v15 = vld [vmem:[#allocation11 + $0x64] ss:$12 sps:$4 sm:$0xff]   ;;  %v5464_v17 = vld [vmem:[#allocation11 + $0x60] ss:$12 sps:$4 sm:$0xff]   ;;  %v5466_v18 = vld [vmem:[#allocation11 + $0x7c] ss:$12 sps:$4 sm:$0xff]  }
 0x157   :  { %4776 = vmatprep.subr.bf16.mxu0 %v4131_v3  ;;  %v5468_v19 = vld [vmem:[#allocation11 + $0x78] ss:$12 sps:$4 sm:$0xff]   ;;  %v5470_v21 = vld [vmem:[#allocation11 + $0x94] ss:$12 sps:$4 sm:$0xff]   ;;  %v5472_v23 = vld [vmem:[#allocation11 + $0x90] ss:$12 sps:$4 sm:$0xff]  }
 0x158   :  { %4806 = vmatpush1.bf16.msra.mxu1 %v5452_v8  ;;  %v5449_v22 = vld [vmem:[#allocation11 + $0x8] ss:$12 sps:$4 sm:$0xff]   ;;  %v290_v24 = vld [vmem:[#allocation2 + $0x8] sm:$0xff]  ;;  %v5474_v31 = vld [vmem:[#allocation11 + $0xac] ss:$12 sps:$4 sm:$0xff]   ;;  %vm1482_vm4 = vcmask 785408  }
 0x159   :  { %4808 = vmatprep.subr.bf16.mxu1 %v5454_v9  ;;  %v5453_v25 = vld [vmem:[#allocation11 + $0x20] ss:$12 sps:$4 sm:$0xff]   ;;  %v5457_v26 = vld [vmem:[#allocation11 + $0x38] ss:$12 sps:$4 sm:$0xff]   ;;  %v5461_v27 = vld [vmem:[#allocation11 + $0x50] ss:$12 sps:$4 sm:$0xff]  }
 0x15a   :  { %4778 = vmatpush3.bf16.msra.mxu0 %v4131_v3  ;;  %v5465_v28 = vld [vmem:[#allocation11 + $0x68] ss:$12 sps:$4 sm:$0xff]   ;;  %v5469_v29 = vld [vmem:[#allocation11 + $0x80] ss:$12 sps:$4 sm:$0xff]   ;;  %v5473_v30 = vld [vmem:[#allocation11 + $0x98] ss:$12 sps:$4 sm:$0xff]  }
 0x15b   :  { %4780 = vmatprep.subr.bf16.mxu0 %v4132_v6  ;;  %v5476_v32 = vld [vmem:[#allocation11 + $0xa8] ss:$12 sps:$4 sm:$0xff]   ;;  %v5477_v33 = vld [vmem:[#allocation11 + $0xb0] ss:$12 sps:$4 sm:$0xff]   ;;  %v488_v43 = vld [vmem:[#allocation13] sm:$0x7] }
 0x15c   :  { %4810 = vmatpush1.bf16.msra.mxu1 %v5456_v11  ;;  %v3811_v35 = vld [vmem:[#allocation10] ss:$0 sm:$0xff]  ;;  %v493_v45 = vrot.slane %v488_v43, %v6496_v42  ;;  %v501_v47 = vrot.slane %v488_v43, %v500_v44  ;;  %v497_v52 = vrot.slane %v488_v43, %v6501_v46  ;;  %vm6516_vm1 = vmpackc.low %vm659_vm0, %vm659_vm0  ;;  %v6530_v4 = vld [vmem:[#allocation5] sm:$0xff]  ;;  %vm6104_vm5 = vmmov 0   ;;  %s6105_s23 = smov [#allocation29]  }
 0x15d   :  { %4812 = vmatprep.subr.bf16.mxu1 %v5458_v12  ;;  %s3794_s28 = sshll.u32 %s6105_s23, 4  ;;  %s3795_s28 = int_to_ptr.vmem [resolvable:$true] %s3794_s28 }
 0x15e   :  { %4782 = vmatpush3.bf16.msra.mxu0 %v4132_v6  ;;  %v6532_v6 = vld [vmem:[#allocation5 + $0x8] sm:$0xff]  ;;  %s6030_s9 = scalar_lea.vmem %s3795_s28, 128  ;;  %p6035_p11 = scmp.lt.s32.totalorder %s3795_s28, %s3795_s28 }
 0x15f   :  { %4784 = vmatprep.subr.bf16.mxu0 %v4133_v10  ;;  %p6031_p10 = scmp.ne.s32.totalorder %s3795_s28, %s6030_s9  ;;  %p6036_p12 = scmp.lt.s32.totalorder %s6030_s9, %s6030_s9 }
 0x160   :  { %4814 = vmatpush1.bf16.msra.mxu1 %v5460_v14 }
 0x161   :  { %4816 = vmatprep.subr.bf16.mxu1 %v5462_v15  ;;  %p6037_p13 = por %p6036_p12, %p6035_p11 }
 0x162   :  { %4786 = vmatpush3.bf16.msra.mxu0 %v4133_v10 }
 0x163   :  { %4788 = vmatprep.subr.bf16.mxu0 %v4134_v13  ;;  %p6038_p0 = pnand %p6037_p13, %p6031_p10 }
 0x164   :  { %4818 = vmatpush1.bf16.msra.mxu1 %v5464_v17 }
 0x165   :  { %4820 = vmatprep.subr.bf16.mxu1 %v5466_v18 }
 0x166   :  { %4790 = vmatpush3.bf16.msra.mxu0 %v4134_v13 }
 0x167   :  { %4792 = vmatprep.subr.bf16.mxu0 %v4135_v16 }
 0x168   :  { %4822 = vmatpush1.bf16.msra.mxu1 %v5468_v19 }
 0x169   :  { %4824 = vmatprep.subr.bf16.mxu1 %v5470_v21 }
 0x16a   :  { %4794 = vmatpush3.bf16.msra.mxu0 %v4135_v16 }
 0x16b   :  { %4796 = vmatprep.subr.bf16.mxu0 %v4136_v20 }
 0x16c   :  { %4826 = vmatpush1.bf16.msra.mxu1 %v5472_v23 }
 0x16d   :  { %4828 = vmatprep.subr.bf16.mxu1 %v5474_v31 }
 0x16e   :  { %4798 = vmatpush3.bf16.msra.mxu0 %v4136_v20 }
 0x16f   :  { %4832 = vmatprep.subr.bf16.mxu0 %v5449_v22 }
 0x170   :  { %4830 = vmatpush1.bf16.msra.mxu1 %v5476_v32 }
 0x171   :  { %4471 = vmatmul.mubr.f32.vlgmr.msra.gmra.mrb[0].mxu0 %v290_v24 }
 0x172   :  { %4834 = vmatpush3.bf16.msra.mxu0 %v5449_v22 }
 0x173   :  { %4836 = vmatprep.subr.bf16.mxu0 %v5453_v25 }
 0x176   :  { %4838 = vmatpush3.bf16.msra.mxu0 %v5453_v25 }
 0x177   :  { %4840 = vmatprep.subr.bf16.mxu0 %v5457_v26 }
 0x17a   :  { %4842 = vmatpush3.bf16.msra.mxu0 %v5457_v26 }
 0x17b   :  { %4844 = vmatprep.subr.bf16.mxu0 %v5461_v27 }
 0x17e   :  { %4846 = vmatpush3.bf16.msra.mxu0 %v5461_v27 }
 0x17f   :  { %4848 = vmatprep.subr.bf16.mxu0 %v5465_v28 }
 0x182   :  { %4850 = vmatpush3.bf16.msra.mxu0 %v5465_v28 }
 0x183   :  { %4852 = vmatprep.subr.bf16.mxu0 %v5469_v29 }
 0x186   :  { %4854 = vmatpush3.bf16.msra.mxu0 %v5469_v29 }
 0x187   :  { %4856 = vmatprep.subr.bf16.mxu0 %v5473_v30 }
 0x18a   :  { %4858 = vmatpush3.bf16.msra.mxu0 %v5473_v30 }
 0x18b   :  { %4860 = vmatprep.subr.bf16.mxu0 %v5477_v33 }
 0x18e   :  { %4862 = vmatpush3.bf16.msra.mxu0 %v5477_v33 }
 0x244   :  { %v4472_v36 = vpop.f32.mrb[0].mxu0 }
 0x245   :  { %v399_v37 = vpop.f32.mrb[1].mxu0  ;;  %v6486_v39 = vadd.f32 %v4472_v36, %v3811_v35 }
 0x246   :  { %v6484_v38 = vadd.f32 %v3811_v35, %v399_v37 }
 0x248   :  { %570 = vmatmul.mubr.f32.vlgmr.msra.gmra.mrb[0].mxu1 %v6484_v38  ;;  %4505 = vmatprep.mubr.f32.mxu0 %v6484_v38 }
 0x249   :  { %4506 = vmatmul.mubr.f32.vlgmr.msra.gmra.mrb[2].mxu0 %v6486_v39  ;;  %575 = vmatprep.mubr.f32.mxu1 %v6101_v34 }
 0x24c   :  { %576 = vmatmul.mubr.f32.gmra.mrb[2].mxu1 %v6486_v39 }
 0x31b   :  { %v571_v48 = vpop.f32.mrb[0].mxu1 }
 0x31c   :  { %v572_v49 = vadd.f32 %v571_v48, %v493_v45  ;;  %v573_v50 = vpop.f32.mrb[1].mxu1  ;;  %v4507_v51 = vpop.f32.mrb[2].mxu0 }
 0x31d   :  { %v654_v53 = vadd.f32 %v4507_v51, %v501_v47  ;;  %v648_v54 = vpop.f32.mrb[3].mxu0  ;;  %v574_v61 = vadd.f32 %v573_v50, %v497_v52 }
 0x31e   :  { %v6506_v55 = vmul.f32 0.17677669, %v572_v49  ;;  %v649_v56 = vadd.f32 %v648_v54, %v501_v47 }
 0x31f   :  { %v577_v57 = vpop.f32.mrb[2].mxu1 }
 0x320   :  { %v579_v58 = vpop.f32.mrb[3].mxu1  ;;  %851 = vrot.lane.b32.xlu1 %v6506_v55, %s6102_s16  ;;  %4512 = vmatprep.mubr.msk.f32.mxu1 %vm659_vm0, %v6506_v55  ;;  %v4869_v59 = vpack.c.bf16 %v654_v53, %v649_v56  ;;  %v6512_v60 = vpack.i.bf16 %v654_v53, %v649_v56  ;;  %v578_v2 = vadd.f32 %v577_v57, %v493_v45 }
 0x321   :  { %v580_v62 = vadd.f32 %v579_v58, %v497_v52 }
 0x322   :  { %v6526_v3 = vmul.f32 0.17677669, %v578_v2 }
 0x323   :  { %v4863_v0 = vpack.c.bf16 %v580_v62, %v574_v61  ;;  %v6520_v1 = vpack.i.bf16 %v580_v62, %v574_v61 }
 0x325   :  { %4865 = vmatprep.subr.msk.bf16.mxu1 %vm6516_vm1, %v4863_v0 }
 0x326   :  { %4868 = vmatpush3.bf16.xpose.msk.msra.mxu1 %vm6516_vm1, %v4863_v0 }
 0x327   :  { %4870 = vmatprep.subr.bf16.mxu1 %v4869_v59 }
 0x32d   :  { %4513 = vmatmul.mubr.msk.f32.vlgmr.msra.gmra.mrb[4].mxu1 %vm659_vm0, %v6526_v3 }
 0x32e   :  { %4872 = vmatpush3.bf16.msra.mxu1 %v4869_v59 }
 0x392   :  { %v852_v26 = vpop.permute.xlu1 %851 }
 0x400   :  { %v4514_v5 = vpop.f32.mrb[4].mxu1 }
 0x401   :  { %v738_v7 = vpop.f32.mrb[5].mxu1  ;;  %v744_v9 = vadd.f32 %v4514_v5, %v6532_v6 }
 0x402   :  { %v739_v8 = vadd.f32 %v738_v7, %v6530_v4 }
 0x403   :  { %v751_v11 = vsel %vm747_vm2, %v744_v9, -inf }
 0x404   :  { %v748_v10 = vsel %vm747_vm2, %v739_v8, -inf }
 0x405   :  { %749 = vmax.xlane.f32.xlu0 %v748_v10 }
 0x409   :  { %752 = vmax.xlane.f32.xlu0 %v751_v11 }
 0x41f   :  { %5357 = vrot.lane.b32.xlu0 %v6520_v1, %s6102_s16 }
 0x492   :  { %v750_v12 = vpop.xlane.xlu0 %749 }
 0x493   :  { %v754_v13 = vsub.f32 %v739_v8, %v750_v12 }
 0x495   :  { %v756_v16 = vmul.f32 1.442695, %v754_v13 }
 0x496   :  { %v753_v14 = vpop.xlane.xlu0 %752 }
 0x497   :  { %v755_v15 = vsub.f32 %v744_v9, %v753_v14 }
 0x499   :  { %v758_v17 = vmul.f32 1.442695, %v755_v15 }
 0x49a   :  { %v5358_v18 = vpop.permute.xlu0 %5357 }
 0x49b   :  { %5558 = vpow2.f32 %v758_v17  ;;  %v5360_v19 = vunpack.i.h.bf16 %v5358_v18  ;;  %v5359_v20 = vunpack.i.l.bf16 %v5358_v18 }
 0x49c   :  { %5560 = vpow2.f32 %v756_v16 }
 0x49d   :  { %v4873_v21 = vpack.c.bf16 %v5360_v19, %v5359_v20 }
 0x49f   :  { %4875 = vmatprep.subr.msk.bf16.mxu1 %vm6516_vm1, %v4873_v21 }
 0x4a5   :  { %v5559_v22 = vpop.eup %5558 }
 0x4a6   :  { %v763_v23 = vsel %vm747_vm2, %v5559_v22, 0.0  ;;  %v5561_v24 = vpop.eup %5560 }
 0x4a7   :  { %764 = vadd.xlane.f32.xlu1 %v763_v23  ;;  %v760_v25 = vsel %vm747_vm2, %v5561_v24, 0.0 }
 0x4ab   :  { %761 = vadd.xlane.f32.xlu1 %v760_v25 }
 0x4bc   :  { %853 = vrot.lane.b32.xlu1 %v6526_v3, %s6102_s16 }
 0x534   :  { %v765_v27 = vpop.xlane.xlu1 %764 }
 0x535   :  { %5562 = vrcp.f32 %v765_v27 }
 0x538   :  { %v762_v28 = vpop.xlane.xlu1 %761 }
 0x539   :  { %5564 = vrcp.f32 %v762_v28 }
 0x53c   :  { %v854_v33 = vpop.permute.xlu1 %853 }
 0x53f   :  { %v5563_v29 = vpop.eup %5562 }
 0x540   :  { %v769_v32 = vmul.f32 %v5563_v29, %v5559_v22 }
 0x543   :  { %v5565_v30 = vpop.eup %5564 }
 0x544   :  { %v768_v31 = vmul.f32 %v5565_v30, %v5561_v24 }
 0x546   :  { %4519 = vmatprep.mubr.msk.f32.mxu1 %vm747_vm2, %v768_v31 }
 0x547   :  { %4520 = vmatmul.mubr.msk.f32.vlgmr.msra.gmra.mrb[6].mxu1 %vm747_vm2, %v769_v32 }
 0x548   :  { %4878 = vmatpush3.bf16.xpose.msk.msra.mxu1 %vm6516_vm1, %v4873_v21  ;;  %4526 = vmatprep.mubr.msk.f32.mxu1 %vm659_vm0, %v852_v26 }
 0x54f   :  { %4527 = vmatmul.mubr.msk.f32.vlgmr.msra.gmra.mrb[8].mxu1 %vm659_vm0, %v854_v33 }
 0x61a   :  { %v6552_v35 = vpop.f32.mrb[6].mxu1 }
 0x61b   :  { %v6554_v36 = vpop.f32.mrb[7].mxu1 }
 0x622   :  { %v4528_v37 = vpop.f32.mrb[8].mxu1 }
 0x623   :  { %v939_v40 = vadd.f32 %v4528_v37, %v6532_v6  ;;  %v933_v43 = vpop.f32.mrb[9].mxu1 }
 0x624   :  { %v934_v45 = vadd.f32 %v933_v43, %v6530_v4 }
 0x625   :  { %v945_v47 = vsel %vm747_vm2, %v939_v40, -inf }
 0x626   :  { %946 = vmax.xlane.f32.xlu0 %v945_v47  ;;  %v942_v48 = vsel %vm747_vm2, %v934_v45, -inf }
 0x627   :  { %943 = vmax.xlane.f32.xlu1 %v942_v48 }
 0x638   :  { %5362 = vrot.lane.b32.xlu1 %v6512_v60, %s6102_s16 }
 0x63c   :  { %5372 = vrot.lane.b32.xlu1 %v6520_v1, %s6097_s10 }
 0x640   :  { %1053 = vrot.lane.b32.xlu1 %v6506_v55, %s6856_s5 }
 0x644   :  { %1055 = vrot.lane.b32.xlu1 %v6526_v3, %s6856_s5 }
 0x648   :  { %1255 = vrot.lane.b32.xlu1 %v6526_v3, %s6097_s10 }
 0x6b3   :  { %v947_v49 = vpop.xlane.xlu0 %946 }
 0x6b4   :  { %v949_v50 = vsub.f32 %v939_v40, %v947_v49  ;;  %v944_v51 = vpop.xlane.xlu1 %943 }
 0x6b5   :  { %v948_v52 = vsub.f32 %v934_v45, %v944_v51 }
 0x6b6   :  { %v952_v53 = vmul.f32 1.442695, %v949_v50 }
 0x6b7   :  { %v950_v54 = vmul.f32 1.442695, %v948_v52 }
 0x6b8   :  { %5566 = vpow2.f32 %v952_v53  ;;  %v5363_v56 = vpop.permute.xlu1 %5362 }
 0x6b9   :  { %v5365_v57 = vunpack.i.h.bf16 %v5363_v56  ;;  %v5364_v58 = vunpack.i.l.bf16 %v5363_v56  ;;  %5568 = vpow2.f32 %v950_v54 }
 0x6bb   :  { %v4879_v59 = vpack.c.bf16 %v5365_v57, %v5364_v58 }
 0x6bc   :  { %v5373_v11 = vpop.permute.xlu1 %5372 }
 0x6bd   :  { %4880 = vmatprep.subr.bf16.mxu1 %v4879_v59  ;;  %v5375_v14 = vunpack.i.h.bf16 %v5373_v11  ;;  %v5374_v15 = vunpack.i.l.bf16 %v5373_v11 }
 0x6be   :  { %4882 = vmatpush3.bf16.msra.mxu1 %v4879_v59 }
 0x6c0   :  { %v1054_v17 = vpop.permute.xlu1 %1053 }
 0x6c2   :  { %v5567_v61 = vpop.eup %5566 }
 0x6c3   :  { %v957_v62 = vsel %vm747_vm2, %v5567_v61, 0.0  ;;  %v5569_v0 = vpop.eup %5568 }
 0x6c4   :  { %958 = vadd.xlane.f32.xlu0 %v957_v62  ;;  %v954_v2 = vsel %vm747_vm2, %v5569_v0, 0.0  ;;  %v1056_v18 = vpop.permute.xlu1 %1055 }
 0x6c8   :  { %955 = vadd.xlane.f32.xlu0 %v954_v2  ;;  %v1256_v20 = vpop.permute.xlu1 %1255 }
 0x6de   :  { %5367 = vrot.lane.b32.xlu0 %v6520_v1, %s6856_s5 }
 0x6e2   :  { %1253 = vrot.lane.b32.xlu0 %v6506_v55, %s6097_s10  ;;  %v4893_v55 = vpack.c.bf16 %v5375_v14, %v5374_v15 }
 0x751   :  { %v959_v3 = vpop.xlane.xlu0 %958 }
 0x752   :  { %5570 = vrcp.f32 %v959_v3 }
 0x755   :  { %v956_v5 = vpop.xlane.xlu0 %955 }
 0x756   :  { %5572 = vrcp.f32 %v956_v5 }
 0x759   :  { %v5368_v7 = vpop.permute.xlu0 %5367 }
 0x75a   :  { %v5370_v8 = vunpack.i.h.bf16 %v5368_v7  ;;  %v5369_v9 = vunpack.i.l.bf16 %v5368_v7 }
 0x75c   :  { %v4883_v10 = vpack.c.bf16 %v5370_v8, %v5369_v9  ;;  %v5571_v12 = vpop.eup %5570 }
 0x75d   :  { %v963_v16 = vmul.f32 %v5571_v12, %v5567_v61  ;;  %v1254_v19 = vpop.permute.xlu0 %1253 }
 0x75e   :  { %4885 = vmatprep.subr.msk.bf16.mxu1 %vm6516_vm1, %v4883_v10 }
 0x760   :  { %v5573_v13 = vpop.eup %5572 }
 0x761   :  { %v962_v1 = vmul.f32 %v5573_v13, %v5569_v0 }
 0x763   :  { %4533 = vmatprep.mubr.msk.f32.mxu1 %vm747_vm2, %v962_v1 }
 0x764   :  { %4534 = vmatmul.mubr.msk.f32.vlgmr.msra.gmra.mrb[10].mxu1 %vm747_vm2, %v963_v16 }
 0x765   :  { %4888 = vmatpush3.bf16.xpose.msk.msra.mxu1 %vm6516_vm1, %v4883_v10  ;;  %4540 = vmatprep.mubr.msk.f32.mxu1 %vm659_vm0, %v1054_v17 }
 0x766   :  { %4895 = vmatprep.subr.msk.bf16.mxu1 %vm6516_vm1, %v4893_v55 }
 0x76c   :  { %4541 = vmatmul.mubr.msk.f32.vlgmr.msra.gmra.mrb[12].mxu1 %vm659_vm0, %v1056_v18 }
 0x76d   :  { %4898 = vmatpush3.bf16.xpose.msk.msra.mxu1 %vm6516_vm1, %v4893_v55  ;;  %4554 = vmatprep.mubr.msk.f32.mxu1 %vm659_vm0, %v1254_v19 }
 0x774   :  { %4555 = vmatmul.mubr.msk.f32.vlgmr.msra.gmra.mrb[14].mxu1 %vm659_vm0, %v1256_v20 }
 0x775   :  { %1766 = vmatprep.mubr.f32.mxu1 %v6101_v34 }
 0x837   :  { %v4535_v21 = vpop.f32.mrb[10].mxu1 }
 0x838   :  { %v1044_v22 = vpop.f32.mrb[11].mxu1 }
 0x839   :  { %v5386_v23 = vpack.i.bf16 %v4535_v21, %v1044_v22  ;;  %v3907_v22 = vld [vmem:[#allocation14] sm:$0xff]  }
 0x83f   :  { %v4542_v24 = vpop.f32.mrb[12].mxu1 }
 0x840   :  { %v1141_v25 = vadd.f32 %v4542_v24, %v6532_v6  ;;  %v1135_v26 = vpop.f32.mrb[13].mxu1  ;;  %v4138_v24 = vld [vmem:[#allocation14 + $0x10] sm:$0xff]  }
 0x841   :  { %v1136_v27 = vadd.f32 %v1135_v26, %v6530_v4  ;;  %v4140_v26 = vld [vmem:[#allocation14 + $0x20] sm:$0xff]  }
 0x842   :  { %v1147_v28 = vsel %vm747_vm2, %v1141_v25, -inf }
 0x843   :  { %1148 = vmax.xlane.f32.xlu1 %v1147_v28  ;;  %v1144_v29 = vsel %vm747_vm2, %v1136_v27, -inf  ;;  %v4142_v28 = vld [vmem:[#allocation14 + $0x30] sm:$0xff]  }
 0x844   :  { %1145 = vmax.xlane.f32.xlu0 %v1144_v29  ;;  %v4143_v29 = vld [vmem:[#allocation14 + $0x38] sm:$0xff]  }
 0x847   :  { %v4556_v30 = vpop.f32.mrb[14].mxu1 }
 0x848   :  { %v1335_v31 = vpop.f32.mrb[15].mxu1  ;;  %v1341_v33 = vadd.f32 %v4556_v30, %v6532_v6 }
 0x849   :  { %v1336_v32 = vadd.f32 %v1335_v31, %v6530_v4 }
 0x84a   :  { %v1347_v40 = vsel %vm747_vm2, %v1341_v33, -inf }
 0x84b   :  { %v1344_v37 = vsel %vm747_vm2, %v1336_v32, -inf }
 0x84c   :  { %1345 = vmax.xlane.f32.xlu0 %v1344_v37 }
 0x850   :  { %1348 = vmax.xlane.f32.xlu0 %v1347_v40 }
 0x8d0   :  { %v1149_v43 = vpop.xlane.xlu1 %1148 }
 0x8d1   :  { %v1151_v45 = vsub.f32 %v1141_v25, %v1149_v43  ;;  %v1146_v47 = vpop.xlane.xlu0 %1145  ;;  %v4139_v25 = vld [vmem:[#allocation14 + $0x18] sm:$0xff]  }
 0x8d2   :  { %v1150_v48 = vsub.f32 %v1136_v27, %v1146_v47  ;;  %v4141_v27 = vld [vmem:[#allocation14 + $0x28] sm:$0xff]  }
 0x8d3   :  { %v1154_v49 = vmul.f32 1.442695, %v1151_v45 }
 0x8d4   :  { %v1152_v50 = vmul.f32 1.442695, %v1150_v48 }
 0x8d5   :  { %5574 = vpow2.f32 %v1154_v49 }
 0x8d6   :  { %5576 = vpow2.f32 %v1152_v50 }
 0x8d9   :  { %v1346_v51 = vpop.xlane.xlu0 %1345 }
 0x8da   :  { %v1350_v52 = vsub.f32 %v1336_v32, %v1346_v51 }
 0x8dc   :  { %v1352_v53 = vmul.f32 1.442695, %v1350_v52 }
 0x8dd   :  { %v1349_v4 = vpop.xlane.xlu0 %1348 }
 0x8de   :  { %5578 = vpow2.f32 %v1352_v53  ;;  %v1351_v6 = vsub.f32 %v1341_v33, %v1349_v4 }
 0x8df   :  { %v5575_v54 = vpop.eup %5574 }
 0x8e0   :  { %v5577_v56 = vpop.eup %5576  ;;  %v1354_v57 = vmul.f32 1.442695, %v1351_v6  ;;  %v1159_v58 = vsel %vm747_vm2, %v5575_v54, 0.0 }
 0x8e1   :  { %1160 = vadd.xlane.f32.xlu1 %v1159_v58  ;;  %v1156_v59 = vsel %vm747_vm2, %v5577_v56, 0.0 }
 0x8e2   :  { %5580 = vpow2.f32 %v1354_v57  ;;  %1157 = vadd.xlane.f32.xlu0 %v1156_v59  ;;  %v3836_v59 = vld [vmem:[#allocation16] ss:$0 sm:$0xff] }
 0x8e8   :  { %v5579_v61 = vpop.eup %5578 }
 0x8e9   :  { %v1356_v62 = vsel %vm747_vm2, %v5579_v61, 0.0 }
 0x8ea   :  { %1357 = vadd.xlane.f32.xlu0 %v1356_v62 }
 0x8ec   :  { %v5581_v0 = vpop.eup %5580 }
 0x8ed   :  { %v1359_v2 = vsel %vm747_vm2, %v5581_v0, 0.0 }
 0x8ee   :  { %1360 = vadd.xlane.f32.xlu1 %v1359_v2 }
 0x8ff   :  { %5382 = vrot.lane.b32.xlu1 %v6512_v60, %s6097_s10 }
 0x900   :  { %5377 = vrot.lane.b32.xlu0 %v6512_v60, %s6856_s5 }
 0x903   :  { %5387 = vrot.lane.b32.xlu1 %v5386_v23, %s6097_s10  ;;  %v4137_v23 = vld [vmem:[#allocation14 + $0x8] sm:$0xff]  }
 0x96e   :  { %v1161_v5 = vpop.xlane.xlu1 %1160 }
 0x96f   :  { %v1158_v3 = vpop.xlane.xlu0 %1157 }
 0x970   :  { %5582 = vrcp.f32 %v1158_v3 }
 0x971   :  { %5584 = vrcp.f32 %v1161_v5  ;;  %v5480_v5 = vld [vmem:[#allocation20] ss:$8 sps:$4 sm:$0xff]  }
 0x977   :  { %v1358_v7 = vpop.xlane.xlu0 %1357 }
 0x978   :  { %5586 = vrcp.f32 %v1358_v7  ;;  %v5481_v7 = vld [vmem:[#allocation20 + $0x14] ss:$8 sps:$4 sm:$0xff]  }
 0x97a   :  { %v5583_v8 = vpop.eup %5582 }
 0x97b   :  { %v1361_v9 = vpop.xlane.xlu1 %1360  ;;  %v5378_v10 = vpop.permute.xlu0 %5377  ;;  %v1164_v11 = vmul.f32 %v5583_v8, %v5577_v56  ;;  %v5483_v8 = vld [vmem:[#allocation20 + $0x10] ss:$8 sps:$4 sm:$0xff]  }
 0x97c   :  { %5588 = vrcp.f32 %v1361_v9  ;;  %v5380_v12 = vunpack.i.h.bf16 %v5378_v10  ;;  %v5379_v13 = vunpack.i.l.bf16 %v5378_v10  ;;  %v5585_v15 = vpop.eup %5584  ;;  %v5484_v9 = vld [vmem:[#allocation20 + $0x24] ss:$8 sps:$4 sm:$0xff]   ;;  %v5486_v10 = vld [vmem:[#allocation20 + $0x20] ss:$8 sps:$4 sm:$0xff]  }
 0x97d   :  { %4547 = vmatprep.mubr.msk.f32.mxu0 %vm747_vm2, %v1164_v11  ;;  %v1165_v17 = vmul.f32 %v5585_v15, %v5575_v54 }
 0x97e   :  { %v4889_v14 = vpack.c.bf16 %v5380_v12, %v5379_v13 }
 0x97f   :  { %v5383_v60 = vpop.permute.xlu1 %5382 }
 0x980   :  { %v5385_v1 = vunpack.i.h.bf16 %v5383_v60  ;;  %v5384_v16 = vunpack.i.l.bf16 %v5383_v60  ;;  %4890 = vmatprep.subr.bf16.mxu0 %v4889_v14 }
 0x981   :  { %4892 = vmatpush3.bf16.msra.mxu0 %v4889_v14 }
 0x982   :  { %v5587_v55 = vpop.eup %5586  ;;  %v4899_v18 = vpack.c.bf16 %v5385_v1, %v5384_v16  ;;  %v5487_v1 = vld [vmem:[#allocation20 + $0x34] ss:$8 sps:$4 sm:$0xff]   ;;  %v5489_v16 = vld [vmem:[#allocation20 + $0x30] ss:$8 sps:$4 sm:$0xff]  }
 0x983   :  { %v1364_v19 = vmul.f32 %v5587_v55, %v5579_v61  ;;  %v5388_v43 = vpop.permute.xlu1 %5387  ;;  %v5490_v55 = vld [vmem:[#allocation20 + $0x44] ss:$8 sps:$4 sm:$0xff]  }
 0x984   :  { %4548 = vmatmul.mubr.msk.f32.vlgmr.msra.gmra.mrb[4].mxu0 %vm747_vm2, %v1165_v17  ;;  %4900 = vmatprep.subr.bf16.mxu0 %v4899_v18  ;;  %v5390_v47 = vunpack.i.h.bf16 %v5388_v43  ;;  %v5389_v48 = vunpack.i.l.bf16 %v5388_v43  ;;  %v5492_v17 = vld [vmem:[#allocation20 + $0x40] ss:$8 sps:$4 sm:$0xff]  }
 0x985   :  { %4902 = vmatpush3.bf16.msra.mxu0 %v4899_v18  ;;  %4561 = vmatprep.mubr.msk.f32.mxu0 %vm747_vm2, %v1364_v19  ;;  %v5493_v18 = vld [vmem:[#allocation20 + $0x54] ss:$8 sps:$4 sm:$0xff]   ;;  %v5495_v19 = vld [vmem:[#allocation20 + $0x50] ss:$8 sps:$4 sm:$0xff]  }
 0x986   :  { %v5589_v20 = vpop.eup %5588  ;;  %4904 = vmatprep.subr.bf16.mxu0 %v3907_v22  ;;  %v1478_v52 = vsel %vm659_vm0, %v6552_v35, %v5390_v47  ;;  %v1477_v6 = vsel %vm659_vm0, %v6554_v36, %v5389_v48  ;;  %v5478_v36 = vld [vmem:[#allocation20 + $0x4] ss:$8 sps:$4 sm:$0xff]  }
 0x987   :  { %v1365_v21 = vmul.f32 %v5589_v20, %v5581_v0  ;;  %4936 = vmatprep.subr.bf16.mxu1 %v5478_v36  ;;  %v5496_v20 = vld [vmem:[#allocation20 + $0x64] ss:$8 sps:$4 sm:$0xff]  }
 0x988   :  { %4938 = vmatpush1.bf16.msra.mxu1 %v5480_v5 }
 0x989   :  { %4562 = vmatmul.mubr.msk.f32.vlgmr.msra.gmra.mrb[6].mxu0 %vm747_vm2, %v1365_v21  ;;  %4940 = vmatprep.subr.bf16.mxu1 %v5481_v7  ;;  %v5498_v21 = vld [vmem:[#allocation20 + $0x60] ss:$8 sps:$4 sm:$0xff]  }
 0x98a   :  { %4906 = vmatpush3.bf16.msra.mxu0 %v3907_v22  ;;  %v5499_v22 = vld [vmem:[#allocation20 + $0x74] ss:$8 sps:$4 sm:$0xff]  }
 0x98b   :  { %4908 = vmatprep.subr.bf16.mxu0 %v4137_v23 }
 0x98c   :  { %4942 = vmatpush1.bf16.msra.mxu1 %v5483_v8 }
 0x98d   :  { %4944 = vmatprep.subr.bf16.mxu1 %v5484_v9 }
 0x98e   :  { %4910 = vmatpush3.bf16.msra.mxu0 %v4137_v23  ;;  %v5501_v23 = vld [vmem:[#allocation20 + $0x70] ss:$8 sps:$4 sm:$0xff]  }
 0x98f   :  { %4912 = vmatprep.subr.bf16.mxu0 %v4138_v24 }
 0x990   :  { %4946 = vmatpush1.bf16.msra.mxu1 %v5486_v10 }
 0x991   :  { %4948 = vmatprep.subr.bf16.mxu1 %v5487_v1 }
 0x992   :  { %4914 = vmatpush3.bf16.msra.mxu0 %v4138_v24 }
 0x993   :  { %4916 = vmatprep.subr.bf16.mxu0 %v4139_v25 }
 0x994   :  { %4950 = vmatpush1.bf16.msra.mxu1 %v5489_v16 }
 0x995   :  { %4952 = vmatprep.subr.bf16.mxu1 %v5490_v55 }
 0x996   :  { %4918 = vmatpush3.bf16.msra.mxu0 %v4139_v25 }
 0x997   :  { %4920 = vmatprep.subr.bf16.mxu0 %v4140_v26 }
 0x998   :  { %4954 = vmatpush1.bf16.msra.mxu1 %v5492_v17 }
 0x999   :  { %4956 = vmatprep.subr.bf16.mxu1 %v5493_v18 }
 0x99a   :  { %4922 = vmatpush3.bf16.msra.mxu0 %v4140_v26 }
 0x99b   :  { %4924 = vmatprep.subr.bf16.mxu0 %v4141_v27 }
 0x99c   :  { %4958 = vmatpush1.bf16.msra.mxu1 %v5495_v19 }
 0x99d   :  { %4960 = vmatprep.subr.bf16.mxu1 %v5496_v20 }
 0x99e   :  { %4926 = vmatpush3.bf16.msra.mxu0 %v4141_v27 }
 0x99f   :  { %4928 = vmatprep.subr.bf16.mxu0 %v4142_v28 }
 0x9a0   :  { %4962 = vmatpush1.bf16.msra.mxu1 %v5498_v21 }
 0x9a1   :  { %4964 = vmatprep.subr.bf16.mxu1 %v5499_v22 }
 0x9a2   :  { %4930 = vmatpush3.bf16.msra.mxu0 %v4142_v28 }
 0x9a3   :  { %4932 = vmatprep.subr.bf16.mxu0 %v4143_v29 }
 0x9a4   :  { %4966 = vmatpush1.bf16.msra.mxu1 %v5501_v23 }
 0x9a6   :  { %4934 = vmatpush3.bf16.msra.mxu0 %v4143_v29 }
 0xa57   :  { %v4549_v30 = vpop.f32.mrb[4].mxu0 }
 0xa58   :  { %v1244_v31 = vpop.f32.mrb[5].mxu0 }
 0xa59   :  { %v5391_v32 = vpack.i.bf16 %v4549_v30, %v1244_v31  ;;  %v3837_v31 = vld [vmem:[#allocation17] ss:$0 sm:$0xff] }
 0xa5b   :  { %5392 = vrot.lane.b32.xlu1 %v5391_v32, %s6856_s5 }
 0xa5c   :  { %v4563_v33 = vpop.f32.mrb[6].mxu0 }
 0xa5d   :  { %v1444_v37 = vpop.f32.mrb[7].mxu0 }
 0xa5e   :  { %v5396_v40 = vpack.i.bf16 %v4563_v33, %v1444_v37  ;;  %v3838_v33 = vld [vmem:[#allocation19] ss:$0 sm:$0xff] }
 0xa60   :  { %5397 = vrot.lane.b32.xlu0 %v5396_v40, %s6102_s16 }
 0xacd   :  { %v5393_v45 = vpop.permute.xlu1 %5392 }
 0xace   :  { %v5395_v49 = vunpack.i.h.bf16 %v5393_v45  ;;  %v5394_v50 = vunpack.i.l.bf16 %v5393_v45 }
 0xad0   :  { %v1480_v54 = vsel %vm1479_vm3, %v1477_v6, %v5394_v50  ;;  %v1481_v56 = vsel %vm1479_vm3, %v1478_v52, %v5395_v49  ;;  %v4151_v49 = vld [vmem:[#allocation23 + $0x40] sm:$0xff]   ;;  %v4144_v52 = vld [vmem:[#allocation23 + $0x8] sm:$0xff]   ;;  %v4154_v6 = vld [vmem:[#allocation23 + $0x58] sm:$0xff]  }
 0xad1   :  { %4968 = vmatprep.subr.bf16.mxu0 %v4151_v49  ;;  %v3939_v50 = vld [vmem:[#allocation23] sm:$0xff]  }
 0xad2   :  { %v5398_v51 = vpop.permute.xlu0 %5397 }
 0xad3   :  { %v5400_v53 = vunpack.i.h.bf16 %v5398_v51  ;;  %v5399_v4 = vunpack.i.l.bf16 %v5398_v51  ;;  %v4152_v51 = vld [vmem:[#allocation23 + $0x48] sm:$0xff]  }
 0xad5   :  { %v1483_v57 = vsel %vm1482_vm4, %v1480_v54, %v5399_v4  ;;  %v1484_v58 = vsel %vm1482_vm4, %v1481_v56, %v5400_v53  ;;  %v4153_v53 = vld [vmem:[#allocation23 + $0x50] sm:$0xff]   ;;  %v4146_v54 = vld [vmem:[#allocation23 + $0x18] sm:$0xff]   ;;  %v4155_v56 = vld [vmem:[#allocation23 + $0x60] sm:$0xff]  }
 0xad6   :  { %4596 = vmatprep.mubr.f32.mxu0 %v1483_v57  ;;  %v4145_v4 = vld [vmem:[#allocation23 + $0x10] sm:$0xff]   ;;  %v4147_v57 = vld [vmem:[#allocation23 + $0x20] sm:$0xff]  }
 0xad7   :  { %4597 = vmatmul.mubr.f32.vlgmr.msra.gmra.mrb[8].mxu0 %v1484_v58  ;;  %v4156_v58 = vld [vmem:[#allocation23 + $0x68] sm:$0xff]  }
 0xad8   :  { %4970 = vmatpush3.bf16.msra.mxu0 %v3939_v50 }
 0xad9   :  { %4972 = vmatprep.subr.bf16.mxu0 %v4152_v51 }
 0xadc   :  { %4974 = vmatpush3.bf16.msra.mxu0 %v4144_v52 }
 0xadd   :  { %4976 = vmatprep.subr.bf16.mxu0 %v4153_v53 }
 0xae0   :  { %4978 = vmatpush3.bf16.msra.mxu0 %v4145_v4 }
 0xae1   :  { %4980 = vmatprep.subr.bf16.mxu0 %v4154_v6 }
 0xae4   :  { %4982 = vmatpush3.bf16.msra.mxu0 %v4146_v54 }
 0xae5   :  { %4984 = vmatprep.subr.bf16.mxu0 %v4155_v56  ;;  %v3839_v56 = vld [vmem:[#allocation25] ss:$0 sm:$0xff] }
 0xae8   :  { %4986 = vmatpush3.bf16.msra.mxu0 %v4147_v57 }
 0xae9   :  { %4988 = vmatprep.subr.bf16.mxu0 %v4156_v58 }
 0xbaa   :  { %v4598_v61 = vpop.f32.mrb[8].mxu0 }
 0xbab   :  { %v1596_v62 = vadd.f32 %v4598_v61, %v3836_v59  ;;  %v1590_v0 = vpop.f32.mrb[9].mxu0  ;;  %v4157_v61 = vld [vmem:[#allocation23 + $0x70] sm:$0xff]  }
 0xbac   :  { %v1591_v35 = vadd.f32 %v3836_v59, %v1590_v0  ;;  %v4148_v59 = vld [vmem:[#allocation23 + $0x28] sm:$0xff]   ;;  %v4158_v0 = vld [vmem:[#allocation23 + $0x78] sm:$0xff]  }
 0xbad   :  { %v1600_v2 = vadd.f32 %v1596_v62, %v6486_v39  ;;  %4990 = vmatpush3.bf16.msra.mxu0 %v4148_v59  ;;  %v4149_v62 = vld [vmem:[#allocation23 + $0x30] sm:$0xff]  }
 0xbae   :  { %v1599_v3 = vadd.f32 %v1591_v35, %v6484_v38  ;;  %4992 = vmatprep.subr.bf16.mxu0 %v4157_v61  ;;  %v4150_v35 = vld [vmem:[#allocation23 + $0x38] sm:$0xff]  }
 0xbaf   :  { %1605 = vadd.xlane.f32.xlu0 %v1600_v2 }
 0xbb0   :  { %1603 = vadd.xlane.f32.xlu1 %v1599_v3 }
 0xbb1   :  { %4994 = vmatpush3.bf16.msra.mxu0 %v4149_v62 }
 0xbb2   :  { %4996 = vmatprep.subr.bf16.mxu0 %v4158_v0 }
 0xbb5   :  { %4998 = vmatpush3.bf16.msra.mxu0 %v4150_v35 }
 0xc3c   :  { %v1606_v11 = vpop.xlane.xlu0 %1605 }
 0xc3d   :  { %v1604_v12 = vpop.xlane.xlu1 %1603  ;;  %v1609_v13 = vmul.f32 0.0078125, %v1606_v11 }
 0xc3e   :  { %v1608_v39 = vmul.f32 0.0078125, %v1604_v12 }
 0xc3f   :  { %v1611_v38 = vsub.f32 %v1600_v2, %v1609_v13  ;;  %v1690_v2 = vld [vmem:[#allocation22] sm:$0x3] }
 0xc40   :  { %v1610_v14 = vsub.f32 %v1599_v3, %v1608_v39  ;;  %v1695_v3 = vrot.slane %v1690_v2, %v6496_v42  ;;  %v1699_v36 = vrot.slane %v1690_v2, %v6501_v46 }
 0xc41   :  { %v1613_v60 = vmul.f32 %v1611_v38, %v1611_v38 }
 0xc42   :  { %v1612_v15 = vmul.f32 %v1610_v14, %v1610_v14 }
 0xc44   :  { %1614 = vadd.xlane.f32.xlu0 %v1612_v15 }
 0xc48   :  { %1616 = vadd.xlane.f32.xlu0 %v1613_v60 }
 0xcd1   :  { %v1615_v24 = vpop.xlane.xlu0 %1614 }
 0xcd2   :  { %v1618_v25 = vmul.f32 0.0078125, %v1615_v24 }
 0xcd4   :  { %v1620_v26 = vadd.f32 1e-12, %v1618_v25 }
 0xcd5   :  { %v1617_v27 = vpop.xlane.xlu0 %1616 }
 0xcd6   :  { %5590 = vrsqrt.f32 %v1620_v26  ;;  %v1619_v28 = vmul.f32 0.0078125, %v1617_v27 }
 0xcd8   :  { %v1621_v29 = vadd.f32 1e-12, %v1619_v28 }
 0xcda   :  { %5592 = vrsqrt.f32 %v1621_v29 }
 0xce0   :  { %v5591_v30 = vpop.eup %5590 }
 0xce1   :  { %v1624_v32 = vmul.f32 %v5591_v30, %v1610_v14 }
 0xce3   :  { %v1632_v37 = vmul.f32 %v3837_v31, %v1624_v32 }
 0xce4   :  { %v5593_v40 = vpop.eup %5592 }
 0xce5   :  { %v6624_v43 = vadd.f32 %v3838_v33, %v1632_v37  ;;  %v1625_v45 = vmul.f32 %v5593_v40, %v1611_v38 }
 0xce7   :  { %1767 = vmatmul.mubr.f32.vlgmr.msra.gmra.mrb[16].mxu1 %v6624_v43  ;;  %v1633_v47 = vmul.f32 %v3837_v31, %v1625_v45 }
 0xce8   :  { %1772 = vmatprep.mubr.f32.mxu1 %v6101_v34 }
 0xce9   :  { %v6628_v48 = vadd.f32 %v3838_v33, %v1633_v47 }
 0xceb   :  { %1773 = vmatmul.mubr.f32.gmra.mrb[18].mxu1 %v6628_v48 }
 0xcec   :  { %2166 = vmatprep.mubr.f32.mxu1 %v6101_v34 }
 0xdba   :  { %v1768_v5 = vpop.f32.mrb[16].mxu1 }
 0xdbb   :  { %v1769_v7 = vadd.f32 %v1768_v5, %v1695_v3  ;;  %v1770_v8 = vpop.f32.mrb[17].mxu1  ;;  %v5504_v5 = vld [vmem:[#allocation11 + $0xc0] ss:$12 sps:$4 sm:$0xff]  }
 0xdbc   :  { %v1771_v9 = vadd.f32 %v1770_v8, %v1699_v36  ;;  %v5508_v8 = vld [vmem:[#allocation11 + $0xc8] ss:$12 sps:$4 sm:$0xff]  }
 0xdbd   :  { %v1779_v10 = vmul.f32 %v1769_v7, %v1769_v7  ;;  %5032 = vmatprep.subr.bf16.mxu0 %v5508_v8 }
 0xdbe   :  { %v1780_v11 = vmul.f32 %v1771_v9, %v1771_v9  ;;  %v1774_v12 = vpop.f32.mrb[18].mxu1 }
 0xdbf   :  { %v1783_v13 = vmul.f32 %v1779_v10, %v1769_v7  ;;  %v1775_v39 = vadd.f32 %v1774_v12, %v1695_v3  ;;  %v1776_v14 = vpop.f32.mrb[19].mxu1  ;;  %v5507_v10 = vld [vmem:[#allocation11 + $0xd8] ss:$12 sps:$4 sm:$0xff]  }
 0xdc0   :  { %v1784_v38 = vmul.f32 %v1780_v11, %v1771_v9  ;;  %v1777_v15 = vadd.f32 %v1776_v14, %v1699_v36  ;;  %v5502_v36 = vld [vmem:[#allocation11 + $0xc4] ss:$12 sps:$4 sm:$0xff]   ;;  %v5509_v11 = vld [vmem:[#allocation11 + $0xf4] ss:$12 sps:$4 sm:$0xff]  }
 0xdc1   :  { %v1787_v60 = vmul.f32 0.044715, %v1783_v13  ;;  %v1781_v1 = vmul.f32 %v1775_v39, %v1775_v39  ;;  %5000 = vmatprep.subr.bf16.mxu1 %v5502_v36 }
 0xdc2   :  { %v1788_v16 = vmul.f32 0.044715, %v1784_v38  ;;  %v1782_v55 = vmul.f32 %v1777_v15, %v1777_v15  ;;  %5002 = vmatpush1.bf16.msra.mxu1 %v5504_v5 }
 0xdc3   :  { %v1791_v17 = vadd.f32 %v1787_v60, %v1769_v7  ;;  %v1785_v18 = vmul.f32 %v1781_v1, %v1775_v39  ;;  %v5513_v1 = vld [vmem:[#allocation11 + $0x10c] ss:$12 sps:$4 sm:$0xff]  }
 0xdc4   :  { %v1792_v19 = vadd.f32 %v1788_v16, %v1771_v9  ;;  %v1786_v20 = vmul.f32 %v1782_v55, %v1777_v15  ;;  %v5516_v16 = vld [vmem:[#allocation11 + $0xf8] ss:$12 sps:$4 sm:$0xff]   ;;  %v5515_v55 = vld [vmem:[#allocation11 + $0x108] ss:$12 sps:$4 sm:$0xff]  }
 0xdc5   :  { %v1795_v21 = vmul.f32 0.7978846, %v1791_v17  ;;  %v1789_v22 = vmul.f32 0.044715, %v1785_v18  ;;  %v5517_v17 = vld [vmem:[#allocation11 + $0x124] ss:$12 sps:$4 sm:$0xff]  }
 0xdc6   :  { %v1796_v23 = vmul.f32 0.7978846, %v1792_v19  ;;  %v1790_v24 = vmul.f32 0.044715, %v1786_v20  ;;  %v5520_v18 = vld [vmem:[#allocation11 + $0x110] ss:$12 sps:$4 sm:$0xff]  }
 0xdc7   :  { %5594 = vtanh.f32 %v1795_v21  ;;  %v1793_v25 = vadd.f32 %v1789_v22, %v1775_v39  ;;  %v5519_v19 = vld [vmem:[#allocation11 + $0x120] ss:$12 sps:$4 sm:$0xff]   ;;  %v5521_v20 = vld [vmem:[#allocation11 + $0x13c] ss:$12 sps:$4 sm:$0xff]   ;;  %v5523_v22 = vld [vmem:[#allocation11 + $0x138] ss:$12 sps:$4 sm:$0xff]  }
 0xdc8   :  { %v1794_v26 = vadd.f32 %v1790_v24, %v1777_v15  ;;  %5596 = vtanh.f32 %v1796_v23  ;;  %v5524_v21 = vld [vmem:[#allocation11 + $0x128] ss:$12 sps:$4 sm:$0xff]   ;;  %v5528_v24 = vld [vmem:[#allocation11 + $0x140] ss:$12 sps:$4 sm:$0xff]  }
 0xdc9   :  { %v1797_v27 = vmul.f32 0.7978846, %v1793_v25  ;;  %v5525_v23 = vld [vmem:[#allocation11 + $0x154] ss:$12 sps:$4 sm:$0xff]   ;;  %v5527_v25 = vld [vmem:[#allocation11 + $0x150] ss:$12 sps:$4 sm:$0xff]  }
 0xdca   :  { %v1798_v28 = vmul.f32 0.7978846, %v1794_v26  ;;  %v5529_v26 = vld [vmem:[#allocation11 + $0x16c] ss:$12 sps:$4 sm:$0xff]  }
 0xdcb   :  { %5598 = vtanh.f32 %v1797_v27  ;;  %v5531_v27 = vld [vmem:[#allocation11 + $0x168] ss:$12 sps:$4 sm:$0xff]  }
 0xdcc   :  { %5600 = vtanh.f32 %v1798_v28  ;;  %v5532_v28 = vld [vmem:[#allocation11 + $0x158] ss:$12 sps:$4 sm:$0xff]  }
 0xdd1   :  { %v5595_v29 = vpop.eup %5594 }
 0xdd2   :  { %v5597_v30 = vpop.eup %5596  ;;  %v1803_v31 = vadd.f32 1.0, %v5595_v29  ;;  %v5533_v29 = vld [vmem:[#allocation11 + $0x170] ss:$12 sps:$4 sm:$0xff]  }
 0xdd3   :  { %v1804_v32 = vadd.f32 1.0, %v5597_v30 }
 0xdd4   :  { %v1807_v33 = vmul.f32 0.5, %v1803_v31 }
 0xdd5   :  { %v5599_v37 = vpop.eup %5598  ;;  %v1808_v40 = vmul.f32 0.5, %v1804_v32 }
 0xdd6   :  { %v5601_v45 = vpop.eup %5600  ;;  %v1805_v47 = vadd.f32 1.0, %v5599_v37  ;;  %v1811_v51 = vmul.f32 %v1807_v33, %v1769_v7  ;;  %v5505_v7 = vld [vmem:[#allocation11 + $0xdc] ss:$12 sps:$4 sm:$0xff]  }
 0xdd7   :  { %v1812_v49 = vmul.f32 %v1808_v40, %v1771_v9  ;;  %v1806_v50 = vadd.f32 1.0, %v5601_v45  ;;  %v5512_v9 = vld [vmem:[#allocation11 + $0xe0] ss:$12 sps:$4 sm:$0xff]   ;;  %5004 = vmatprep.subr.bf16.mxu1 %v5505_v7 }
 0xdd8   :  { %v1809_v52 = vmul.f32 0.5, %v1805_v47  ;;  %5006 = vmatpush1.bf16.msra.mxu1 %v5507_v10  ;;  %v3840_v47 = vld [vmem:[#allocation26] ss:$0 sm:$0xff] }
 0xdd9   :  { %1950 = vmatprep.mubr.f32.mxu0 %v1812_v49  ;;  %v1810_v53 = vmul.f32 0.5, %v1806_v50  ;;  %5008 = vmatprep.subr.bf16.mxu1 %v5509_v11  ;;  %v3841_v50 = vld [vmem:[#allocation28] ss:$0 sm:$0xff] }
 0xdda   :  { %1951 = vmatmul.mubr.f32.vlgmr.msra.gmra.mrb[10].mxu0 %v1811_v51  ;;  %v1813_v6 = vmul.f32 %v1809_v52, %v1775_v39 }
 0xddb   :  { %v1814_v4 = vmul.f32 %v1810_v53, %v1777_v15  ;;  %5034 = vmatpush3.bf16.msra.mxu0 %v5508_v8 }
 0xddc   :  { %5036 = vmatprep.subr.bf16.mxu0 %v5512_v9 }
 0xddd   :  { %1955 = vmatprep.mubr.f32.mxu0 %v1814_v4 }
 0xdde   :  { %1956 = vmatmul.mubr.f32.gmra.mrb[12].mxu0 %v1813_v6 }
 0xddf   :  { %5038 = vmatpush3.bf16.msra.mxu0 %v5512_v9 }
 0xde0   :  { %5040 = vmatprep.subr.bf16.mxu0 %v5516_v16 }
 0xde3   :  { %5042 = vmatpush3.bf16.msra.mxu0 %v5516_v16 }
 0xde4   :  { %5044 = vmatprep.subr.bf16.mxu0 %v5520_v18 }
 0xde7   :  { %5046 = vmatpush3.bf16.msra.mxu0 %v5520_v18 }
 0xde8   :  { %5048 = vmatprep.subr.bf16.mxu0 %v5524_v21 }
 0xdeb   :  { %5050 = vmatpush3.bf16.msra.mxu0 %v5524_v21 }
 0xdec   :  { %5052 = vmatprep.subr.bf16.mxu0 %v5528_v24 }
 0xdef   :  { %5054 = vmatpush3.bf16.msra.mxu0 %v5528_v24 }
 0xdf0   :  { %5056 = vmatprep.subr.bf16.mxu0 %v5532_v28 }
 0xdf3   :  { %5058 = vmatpush3.bf16.msra.mxu0 %v5532_v28 }
 0xdf4   :  { %5060 = vmatprep.subr.bf16.mxu0 %v5533_v29 }
 0xdf7   :  { %5062 = vmatpush3.bf16.msra.mxu0 %v5533_v29 }
 0xead   :  { %v4306_v54 = vpop.f32.mrb[10].mxu0 }
 0xeae   :  { %v4307_v57 = vpop.f32.mrb[11].mxu0 }
 0xeaf   :  { %v4308_v58 = vadd.f32 %v4307_v57, %v4306_v54 }
 0xeb1   :  { %v1953_v59 = vadd.f32 %v4308_v58, %v3839_v56  ;;  %v4309_v61 = vpop.f32.mrb[12].mxu0 }
 0xeb2   :  { %v4310_v62 = vpop.f32.mrb[13].mxu0 }
 0xeb3   :  { %v4311_v0 = vadd.f32 %v4310_v62, %v4309_v61  ;;  %v1961_v35 = vadd.f32 %v1953_v59, %v6624_v43  ;;  %v5511_v43 = vld [vmem:[#allocation11 + $0xf0] ss:$12 sps:$4 sm:$0xff]  }
 0xeb4   :  { %5010 = vmatpush1.bf16.msra.mxu1 %v5511_v43 }
 0xeb5   :  { %v1958_v2 = vadd.f32 %v4311_v0, %v3839_v56  ;;  %1965 = vadd.xlane.f32.xlu1 %v1961_v35  ;;  %5012 = vmatprep.subr.bf16.mxu1 %v5513_v1  ;;  %v2085_v56 = vld [vmem:[#allocation13 + $0x3] sm:$0x7] }
 0xeb6   :  { %v2090_v57 = vrot.slane %v2085_v56, %v6496_v42  ;;  %v2098_v62 = vrot.slane %v2085_v56, %v500_v44  ;;  %v2094_v0 = vrot.slane %v2085_v56, %v6501_v46 }
 0xeb7   :  { %v1962_v3 = vadd.f32 %v1958_v2, %v6628_v48 }
 0xeb8   :  { %5014 = vmatpush1.bf16.msra.mxu1 %v5515_v55 }
 0xeb9   :  { %1967 = vadd.xlane.f32.xlu0 %v1962_v3  ;;  %5016 = vmatprep.subr.bf16.mxu1 %v5517_v17 }
 0xebc   :  { %5018 = vmatpush1.bf16.msra.mxu1 %v5519_v19 }
 0xebd   :  { %5020 = vmatprep.subr.bf16.mxu1 %v5521_v20 }
 0xec0   :  { %5022 = vmatpush1.bf16.msra.mxu1 %v5523_v22 }
 0xec1   :  { %5024 = vmatprep.subr.bf16.mxu1 %v5525_v23 }
 0xec4   :  { %5026 = vmatpush1.bf16.msra.mxu1 %v5527_v25 }
 0xec5   :  { %5028 = vmatprep.subr.bf16.mxu1 %v5529_v26 }
 0xec8   :  { %5030 = vmatpush1.bf16.msra.mxu1 %v5531_v27 }
 0xf42   :  { %v1966_v48 = vpop.xlane.xlu1 %1965 }
 0xf43   :  { %v1969_v12 = vmul.f32 0.0078125, %v1966_v48 }
 0xf45   :  { %v1971_v13 = vsub.f32 %v1961_v35, %v1969_v12 }
 0xf46   :  { %v1968_v39 = vpop.xlane.xlu0 %1967 }
 0xf47   :  { %v1970_v14 = vmul.f32 0.0078125, %v1968_v39  ;;  %v1973_v38 = vmul.f32 %v1971_v13, %v1971_v13  ;;  %v6665_v39 = vld [vmem:[#allocation5 + $0x8] sm:$0xff] }
 0xf49   :  { %v1972_v15 = vsub.f32 %v1962_v3, %v1970_v14  ;;  %1975 = vadd.xlane.f32.xlu1 %v1973_v38 }
 0xf4b   :  { %v1974_v60 = vmul.f32 %v1972_v15, %v1972_v15 }
 0xf4d   :  { %1977 = vadd.xlane.f32.xlu0 %v1974_v60 }
 0xfd6   :  { %v1976_v30 = vpop.xlane.xlu1 %1975 }
 0xfd7   :  { %v1979_v31 = vmul.f32 0.0078125, %v1976_v30 }
 0xfd9   :  { %v1981_v32 = vadd.f32 1e-12, %v1979_v31 }
 0xfda   :  { %v1978_v33 = vpop.xlane.xlu0 %1977 }
 0xfdb   :  { %5602 = vrsqrt.f32 %v1981_v32  ;;  %v1980_v37 = vmul.f32 0.0078125, %v1978_v33 }
 0xfdd   :  { %v1982_v40 = vadd.f32 1e-12, %v1980_v37 }
 0xfdf   :  { %5604 = vrsqrt.f32 %v1982_v40 }
 0xfe5   :  { %v5603_v45 = vpop.eup %5602 }
 0xfe6   :  { %v1985_v49 = vmul.f32 %v5603_v45, %v1971_v13 }
 0xfe8   :  { %v1993_v51 = vmul.f32 %v3840_v47, %v1985_v49 }
 0xfe9   :  { %v5605_v52 = vpop.eup %5604 }
 0xfea   :  { %v6636_v53 = vadd.f32 %v3841_v50, %v1993_v51  ;;  %v1986_v4 = vmul.f32 %v5605_v52, %v1972_v15  ;;  %v6668_v15 = vld [vmem:[#allocation5] sm:$0xff] }
 0xfec   :  { %2167 = vmatmul.mubr.f32.vlgmr.msra.gmra.mrb[20].mxu1 %v6636_v53  ;;  %4631 = vmatprep.mubr.f32.mxu0 %v6636_v53  ;;  %v1994_v6 = vmul.f32 %v3840_v47, %v1986_v4 }
 0xfed   :  { %2172 = vmatprep.mubr.f32.mxu1 %v6101_v34 }
 0xfee   :  { %v6641_v54 = vadd.f32 %v3841_v50, %v1994_v6 }
 0xff0   :  { %2173 = vmatmul.mubr.f32.gmra.mrb[22].mxu1 %v6641_v54  ;;  %4632 = vmatmul.mubr.f32.vlgmr.msra.gmra.mrb[14].mxu0 %v6641_v54 }
0x10bf   :  { %v2168_v58 = vpop.f32.mrb[20].mxu1 }
0x10c0   :  { %v2169_v59 = vadd.f32 %v2168_v58, %v2090_v57  ;;  %v2170_v61 = vpop.f32.mrb[21].mxu1 }
0x10c1   :  { %v2171_v8 = vadd.f32 %v2170_v61, %v2094_v0 }
0x10c2   :  { %v6649_v35 = vmul.f32 0.17677669, %v2169_v59 }
0x10c3   :  { %v2174_v2 = vpop.f32.mrb[22].mxu1  ;;  %v4633_v3 = vpop.f32.mrb[14].mxu0 }
0x10c4   :  { %v2251_v36 = vadd.f32 %v4633_v3, %v2098_v62  ;;  %v2176_v5 = vpop.f32.mrb[23].mxu1  ;;  %v2245_v7 = vpop.f32.mrb[15].mxu0  ;;  %4638 = vmatprep.mubr.msk.f32.mxu1 %vm659_vm0, %v6649_v35  ;;  %v2175_v44 = vadd.f32 %v2174_v2, %v2090_v57 }
0x10c5   :  { %v2177_v9 = vadd.f32 %v2176_v5, %v2094_v0  ;;  %v2246_v10 = vadd.f32 %v2245_v7, %v2098_v62 }
0x10c6   :  { %v6661_v12 = vmul.f32 0.17677669, %v2175_v44 }
0x10c7   :  { %v5063_v11 = vpack.c.bf16 %v2177_v9, %v2171_v8  ;;  %v5069_v43 = vpack.c.bf16 %v2251_v36, %v2246_v10  ;;  %v6653_v48 = vpack.i.bf16 %v2177_v9, %v2171_v8  ;;  %v6655_v41 = vpack.i.bf16 %v2251_v36, %v2246_v10 }
0x10c9   :  { %5065 = vmatprep.subr.msk.bf16.mxu1 %vm6516_vm1, %v5063_v11 }
0x10ca   :  { %5068 = vmatpush3.bf16.xpose.msk.msra.mxu1 %vm6516_vm1, %v5063_v11 }
0x10cb   :  { %5070 = vmatprep.subr.bf16.mxu1 %v5069_v43 }
0x10d1   :  { %4639 = vmatmul.mubr.msk.f32.vlgmr.msra.gmra.mrb[24].mxu1 %vm659_vm0, %v6661_v12 }
0x10d2   :  { %5072 = vmatpush3.bf16.msra.mxu1 %v5069_v43 }
0x11a4   :  { %v4640_v13 = vpop.f32.mrb[24].mxu1 }
0x11a5   :  { %v2340_v14 = vadd.f32 %v6665_v39, %v4640_v13  ;;  %v2334_v38 = vpop.f32.mrb[25].mxu1 }
0x11a6   :  { %v2335_v60 = vadd.f32 %v6668_v15, %v2334_v38 }
0x11a7   :  { %v2346_v1 = vsel %vm747_vm2, %v2340_v14, -inf }
0x11a8   :  { %2347 = vmax.xlane.f32.xlu0 %v2346_v1  ;;  %v2343_v16 = vsel %vm747_vm2, %v2335_v60, -inf }
0x11a9   :  { %2344 = vmax.xlane.f32.xlu1 %v2343_v16 }
0x11ba   :  { %5402 = vrot.lane.b32.xlu1 %v6653_v48, %s6102_s16 }
0x1235   :  { %v2348_v55 = vpop.xlane.xlu0 %2347 }
0x1236   :  { %v2350_v17 = vsub.f32 %v2340_v14, %v2348_v55  ;;  %v2345_v18 = vpop.xlane.xlu1 %2344 }
0x1237   :  { %v2349_v19 = vsub.f32 %v2335_v60, %v2345_v18 }
0x1238   :  { %v2353_v20 = vmul.f32 1.442695, %v2350_v17 }
0x1239   :  { %v2351_v21 = vmul.f32 1.442695, %v2349_v19 }
0x123a   :  { %5606 = vpow2.f32 %v2353_v20  ;;  %v5403_v22 = vpop.permute.xlu1 %5402 }
0x123b   :  { %5608 = vpow2.f32 %v2351_v21  ;;  %v5405_v23 = vunpack.i.h.bf16 %v5403_v22  ;;  %v5404_v24 = vunpack.i.l.bf16 %v5403_v22 }
0x123d   :  { %v5073_v25 = vpack.c.bf16 %v5405_v23, %v5404_v24 }
0x123f   :  { %5075 = vmatprep.subr.msk.bf16.mxu1 %vm6516_vm1, %v5073_v25 }
0x1244   :  { %v5607_v26 = vpop.eup %5606 }
0x1245   :  { %v5609_v27 = vpop.eup %5608  ;;  %v2358_v28 = vsel %vm747_vm2, %v5607_v26, 0.0 }
0x1246   :  { %2359 = vadd.xlane.f32.xlu0 %v2358_v28  ;;  %v2355_v29 = vsel %vm747_vm2, %v5609_v27, 0.0 }
0x1247   :  { %2356 = vadd.xlane.f32.xlu1 %v2355_v29 }
0x1258   :  { %2448 = vrot.lane.b32.xlu1 %v6661_v12, %s6102_s16 }
0x125c   :  { %2446 = vrot.lane.b32.xlu0 %v6649_v35, %s6102_s16 }
0x12d3   :  { %v2360_v30 = vpop.xlane.xlu0 %2359 }
0x12d4   :  { %5610 = vrcp.f32 %v2360_v30  ;;  %v2357_v31 = vpop.xlane.xlu1 %2356 }
0x12d5   :  { %5612 = vrcp.f32 %v2357_v31 }
0x12d7   :  { %v2447_v45 = vpop.permute.xlu0 %2446 }
0x12d8   :  { %v2449_v47 = vpop.permute.xlu1 %2448 }
0x12de   :  { %v5611_v32 = vpop.eup %5610 }
0x12df   :  { %v5613_v33 = vpop.eup %5612  ;;  %v2364_v40 = vmul.f32 %v5611_v32, %v5607_v26 }
0x12e0   :  { %v2363_v37 = vmul.f32 %v5613_v33, %v5609_v27 }
0x12e2   :  { %4645 = vmatprep.mubr.msk.f32.mxu1 %vm747_vm2, %v2363_v37 }
0x12e3   :  { %4646 = vmatmul.mubr.msk.f32.vlgmr.msra.gmra.mrb[26].mxu1 %vm747_vm2, %v2364_v40 }
0x12e4   :  { %5078 = vmatpush3.bf16.xpose.msk.msra.mxu1 %vm6516_vm1, %v5073_v25  ;;  %4652 = vmatprep.mubr.msk.f32.mxu1 %vm659_vm0, %v2447_v45 }
0x12eb   :  { %4653 = vmatmul.mubr.msk.f32.vlgmr.msra.gmra.mrb[28].mxu1 %vm659_vm0, %v2449_v47 }
0x13b6   :  { %v6689_v49 = vpop.f32.mrb[26].mxu1 }
0x13b7   :  { %v6691_v50 = vpop.f32.mrb[27].mxu1 }
0x13be   :  { %v4654_v51 = vpop.f32.mrb[28].mxu1 }
0x13bf   :  { %v2534_v52 = vadd.f32 %v6665_v39, %v4654_v51  ;;  %v2528_v4 = vpop.f32.mrb[29].mxu1 }
0x13c0   :  { %v2529_v6 = vadd.f32 %v6668_v15, %v2528_v4 }
0x13c1   :  { %v2540_v56 = vsel %vm747_vm2, %v2534_v52, -inf }
0x13c2   :  { %2541 = vmax.xlane.f32.xlu0 %v2540_v56  ;;  %v2537_v57 = vsel %vm747_vm2, %v2529_v6, -inf }
0x13c3   :  { %2538 = vmax.xlane.f32.xlu1 %v2537_v57 }
0x144f   :  { %v2542_v58 = vpop.xlane.xlu0 %2541 }
0x1450   :  { %v2544_v59 = vsub.f32 %v2534_v52, %v2542_v58  ;;  %v2539_v61 = vpop.xlane.xlu1 %2538 }
0x1451   :  { %v2543_v62 = vsub.f32 %v2529_v6, %v2539_v61 }
0x1452   :  { %v2547_v0 = vmul.f32 1.442695, %v2544_v59 }
0x1453   :  { %v2545_v2 = vmul.f32 1.442695, %v2543_v62 }
0x1454   :  { %5614 = vpow2.f32 %v2547_v0 }
0x1455   :  { %5616 = vpow2.f32 %v2545_v2 }
0x145e   :  { %v5615_v3 = vpop.eup %5614 }
0x145f   :  { %v5617_v36 = vpop.eup %5616  ;;  %v2552_v5 = vsel %vm747_vm2, %v5615_v3, 0.0 }
0x1460   :  { %2553 = vadd.xlane.f32.xlu1 %v2552_v5  ;;  %v2549_v7 = vsel %vm747_vm2, %v5617_v36, 0.0 }
0x1461   :  { %2550 = vadd.xlane.f32.xlu0 %v2549_v7 }
0x1471   :  { %5412 = vrot.lane.b32.xlu1 %v6653_v48, %s6856_s5 }
0x1475   :  { %5417 = vrot.lane.b32.xlu1 %v6653_v48, %s6097_s10 }
0x1477   :  { %5407 = vrot.lane.b32.xlu0 %v6655_v41, %s6102_s16 }
0x1479   :  { %2648 = vrot.lane.b32.xlu1 %v6649_v35, %s6856_s5 }
0x147b   :  { %2650 = vrot.lane.b32.xlu0 %v6661_v12, %s6856_s5 }
0x147d   :  { %2848 = vrot.lane.b32.xlu1 %v6649_v35, %s6097_s10 }
0x147f   :  { %2850 = vrot.lane.b32.xlu0 %v6661_v12, %s6097_s10 }
0x14ed   :  { %v2554_v8 = vpop.xlane.xlu1 %2553 }
0x14ee   :  { %5618 = vrcp.f32 %v2554_v8  ;;  %v2551_v9 = vpop.xlane.xlu0 %2550 }
0x14ef   :  { %5620 = vrcp.f32 %v2551_v9 }
0x14f1   :  { %v5413_v10 = vpop.permute.xlu1 %5412 }
0x14f2   :  { %v5408_v11 = vpop.permute.xlu0 %5407  ;;  %v5415_v43 = vunpack.i.h.bf16 %v5413_v10  ;;  %v5414_v48 = vunpack.i.l.bf16 %v5413_v10 }
0x14f3   :  { %v5410_v44 = vunpack.i.h.bf16 %v5408_v11  ;;  %v5409_v13 = vunpack.i.l.bf16 %v5408_v11 }
0x14f4   :  { %v5083_v38 = vpack.c.bf16 %v5415_v43, %v5414_v48 }
0x14f5   :  { %v5079_v14 = vpack.c.bf16 %v5410_v44, %v5409_v13  ;;  %v5418_v60 = vpop.permute.xlu1 %5417 }
0x14f6   :  { %v5420_v55 = vunpack.i.h.bf16 %v5418_v60  ;;  %v5419_v17 = vunpack.i.l.bf16 %v5418_v60  ;;  %v2651_v20 = vpop.permute.xlu0 %2650 }
0x14f7   :  { %5080 = vmatprep.subr.bf16.mxu1 %v5079_v14 }
0x14f8   :  { %v5619_v1 = vpop.eup %5618  ;;  %5082 = vmatpush3.bf16.msra.mxu1 %v5079_v14  ;;  %v5093_v19 = vpack.c.bf16 %v5420_v55, %v5419_v17 }
0x14f9   :  { %v5621_v35 = vpop.eup %5620  ;;  %5085 = vmatprep.subr.msk.bf16.mxu1 %vm6516_vm1, %v5083_v38  ;;  %v2558_v16 = vmul.f32 %v5619_v1, %v5615_v3  ;;  %v2649_v18 = vpop.permute.xlu1 %2648 }
0x14fa   :  { %v2557_v12 = vmul.f32 %v5621_v35, %v5617_v36  ;;  %v2851_v22 = vpop.permute.xlu0 %2850 }
0x14fc   :  { %4659 = vmatprep.mubr.msk.f32.mxu1 %vm747_vm2, %v2557_v12 }
0x14fd   :  { %4660 = vmatmul.mubr.msk.f32.vlgmr.msra.gmra.mrb[30].mxu1 %vm747_vm2, %v2558_v16  ;;  %v2849_v21 = vpop.permute.xlu1 %2848 }
0x14fe   :  { %4666 = vmatprep.mubr.msk.f32.mxu1 %vm659_vm0, %v2649_v18 }
0x1501   :  { %5088 = vmatpush3.bf16.xpose.msk.msra.mxu1 %vm6516_vm1, %v5083_v38 }
0x1502   :  { %5095 = vmatprep.subr.msk.bf16.mxu1 %vm6516_vm1, %v5093_v19 }
0x1508   :  { %4667 = vmatmul.mubr.msk.f32.vlgmr.msra.gmra.mrb[32].mxu1 %vm659_vm0, %v2651_v20 }
0x1509   :  { %5098 = vmatpush3.bf16.xpose.msk.msra.mxu1 %vm6516_vm1, %v5093_v19  ;;  %4680 = vmatprep.mubr.msk.f32.mxu1 %vm659_vm0, %v2849_v21  ;;  %v4003_v21 = vld [vmem:[#allocation14 + $0x40] sm:$0xff]  }
0x1510   :  { %4681 = vmatmul.mubr.msk.f32.vlgmr.msra.gmra.mrb[34].mxu1 %vm659_vm0, %v2851_v22  ;;  %v4159_v22 = vld [vmem:[#allocation14 + $0x48] sm:$0xff]  }
0x1511   :  { %3364 = vmatprep.mubr.f32.mxu1 %v6101_v34 }
0x15d0   :  { %v4661_v23 = vpop.f32.mrb[30].mxu1 }
0x15d1   :  { %v2639_v24 = vpop.f32.mrb[31].mxu1 }
0x15d2   :  { %v5431_v25 = vpack.i.bf16 %v4661_v23, %v2639_v24  ;;  %v4160_v23 = vld [vmem:[#allocation14 + $0x50] sm:$0xff]   ;;  %v4161_v24 = vld [vmem:[#allocation14 + $0x58] sm:$0xff]  }
0x15db   :  { %v4668_v26 = vpop.f32.mrb[32].mxu1 }
0x15dc   :  { %v2736_v27 = vadd.f32 %v6665_v39, %v4668_v26  ;;  %v2730_v28 = vpop.f32.mrb[33].mxu1  ;;  %v4163_v26 = vld [vmem:[#allocation14 + $0x68] sm:$0xff]  }
0x15dd   :  { %v2731_v29 = vadd.f32 %v6668_v15, %v2730_v28  ;;  %v4165_v28 = vld [vmem:[#allocation14 + $0x78] sm:$0xff]  }
0x15de   :  { %v2742_v30 = vsel %vm747_vm2, %v2736_v27, -inf }
0x15df   :  { %2743 = vmax.xlane.f32.xlu0 %v2742_v30  ;;  %v2739_v63 = vsel %vm747_vm2, %v2731_v29, -inf }
0x15e0   :  { %2740 = vmax.xlane.f32.xlu1 %v2739_v63 }
0x15e3   :  { %v4682_v31 = vpop.f32.mrb[34].mxu1 }
0x15e4   :  { %v2930_v32 = vpop.f32.mrb[35].mxu1  ;;  %v2936_v37 = vadd.f32 %v6665_v39, %v4682_v31 }
0x15e5   :  { %v2931_v33 = vadd.f32 %v6668_v15, %v2930_v32 }
0x15e6   :  { %v2942_v45 = vsel %vm747_vm2, %v2936_v37, -inf }
0x15e7   :  { %v2939_v40 = vsel %vm747_vm2, %v2931_v33, -inf }
0x15e8   :  { %2940 = vmax.xlane.f32.xlu0 %v2939_v40 }
0x15ec   :  { %2943 = vmax.xlane.f32.xlu0 %v2942_v45 }
0x166c   :  { %v2744_v47 = vpop.xlane.xlu0 %2743 }
0x166d   :  { %v2746_v51 = vsub.f32 %v2736_v27, %v2744_v47  ;;  %v2741_v52 = vpop.xlane.xlu1 %2740  ;;  %v4164_v27 = vld [vmem:[#allocation14 + $0x70] sm:$0xff]  }
0x166e   :  { %v2745_v4 = vsub.f32 %v2731_v29, %v2741_v52 }
0x166f   :  { %v2749_v6 = vmul.f32 1.442695, %v2746_v51 }
0x1670   :  { %v2747_v56 = vmul.f32 1.442695, %v2745_v4 }
0x1671   :  { %5622 = vpow2.f32 %v2749_v6 }
0x1672   :  { %5624 = vpow2.f32 %v2747_v56 }
0x1675   :  { %v2941_v57 = vpop.xlane.xlu0 %2940 }
0x1676   :  { %v2945_v58 = vsub.f32 %v2931_v33, %v2941_v57 }
0x1678   :  { %v2947_v59 = vmul.f32 1.442695, %v2945_v58 }
0x1679   :  { %v2944_v15 = vpop.xlane.xlu0 %2943 }
0x167a   :  { %5626 = vpow2.f32 %v2947_v59  ;;  %v2946_v39 = vsub.f32 %v2936_v37, %v2944_v15 }
0x167b   :  { %v5623_v61 = vpop.eup %5622 }
0x167c   :  { %v5625_v62 = vpop.eup %5624  ;;  %v2949_v0 = vmul.f32 1.442695, %v2946_v39  ;;  %v2754_v2 = vsel %vm747_vm2, %v5623_v61, 0.0 }
0x167d   :  { %2755 = vadd.xlane.f32.xlu0 %v2754_v2  ;;  %v2751_v3 = vsel %vm747_vm2, %v5625_v62, 0.0 }
0x167e   :  { %5628 = vpow2.f32 %v2949_v0  ;;  %2752 = vadd.xlane.f32.xlu1 %v2751_v3 }
0x1684   :  { %v5627_v36 = vpop.eup %5626 }
0x1685   :  { %v2951_v5 = vsel %vm747_vm2, %v5627_v36, 0.0 }
0x1686   :  { %2952 = vadd.xlane.f32.xlu1 %v2951_v5 }
0x1688   :  { %v5629_v7 = vpop.eup %5628 }
0x1689   :  { %v2954_v8 = vsel %vm747_vm2, %v5629_v7, 0.0 }
0x168a   :  { %2955 = vadd.xlane.f32.xlu0 %v2954_v8  ;;  %v5537_v8 = vld [vmem:[#allocation20 + $0x94] ss:$8 sps:$4 sm:$0xff]  }
0x1697   :  { %5422 = vrot.lane.b32.xlu1 %v6655_v41, %s6856_s5 }
0x169b   :  { %5432 = vrot.lane.b32.xlu1 %v5431_v25, %s6097_s10  ;;  %v4162_v25 = vld [vmem:[#allocation14 + $0x60] sm:$0xff]  }
0x16a0   :  { %5427 = vrot.lane.b32.xlu0 %v6655_v41, %s6097_s10 }
0x170a   :  { %v2756_v10 = vpop.xlane.xlu0 %2755 }
0x170b   :  { %v2753_v9 = vpop.xlane.xlu1 %2752 }
0x170c   :  { %5630 = vrcp.f32 %v2753_v9  ;;  %v5539_v9 = vld [vmem:[#allocation20 + $0x90] ss:$8 sps:$4 sm:$0xff]  }
0x170d   :  { %5632 = vrcp.f32 %v2756_v10  ;;  %v5540_v10 = vld [vmem:[#allocation20 + $0xa4] ss:$8 sps:$4 sm:$0xff]  }
0x1713   :  { %v2953_v11 = vpop.xlane.xlu1 %2952 }
0x1714   :  { %5634 = vrcp.f32 %v2953_v11  ;;  %v5542_v11 = vld [vmem:[#allocation20 + $0xa0] ss:$8 sps:$4 sm:$0xff]  }
0x1716   :  { %v5631_v43 = vpop.eup %5630 }
0x1717   :  { %v2956_v48 = vpop.xlane.xlu0 %2955  ;;  %v5423_v44 = vpop.permute.xlu1 %5422  ;;  %v2759_v13 = vmul.f32 %v5631_v43, %v5625_v62  ;;  %v3866_v62 = vld [vmem:[#allocation16 + $0x1] ss:$0 sm:$0xff] }
0x1718   :  { %5636 = vrcp.f32 %v2956_v48  ;;  %v5425_v14 = vunpack.i.h.bf16 %v5423_v44  ;;  %v5424_v38 = vunpack.i.l.bf16 %v5423_v44  ;;  %v5633_v1 = vpop.eup %5632 }
0x1719   :  { %4673 = vmatprep.mubr.msk.f32.mxu0 %vm747_vm2, %v2759_v13  ;;  %v2760_v55 = vmul.f32 %v5633_v1, %v5623_v61  ;;  %v5545_v1 = vld [vmem:[#allocation20 + $0xb0] ss:$8 sps:$4 sm:$0xff]  }
0x171a   :  { %v5089_v60 = vpack.c.bf16 %v5425_v14, %v5424_v38 }
0x171b   :  { %v5428_v35 = vpop.permute.xlu0 %5427  ;;  %v5433_v37 = vpop.permute.xlu1 %5432 }
0x171c   :  { %v5430_v12 = vunpack.i.h.bf16 %v5428_v35  ;;  %v5429_v41 = vunpack.i.l.bf16 %v5428_v35  ;;  %5090 = vmatprep.subr.bf16.mxu0 %v5089_v60  ;;  %v5435_v45 = vunpack.i.h.bf16 %v5433_v37  ;;  %v5434_v47 = vunpack.i.l.bf16 %v5433_v37  ;;  %v5546_v35 = vld [vmem:[#allocation20 + $0xc4] ss:$8 sps:$4 sm:$0xff]  }
0x171d   :  { %5092 = vmatpush3.bf16.msra.mxu0 %v5089_v60  ;;  %v5543_v60 = vld [vmem:[#allocation20 + $0xb4] ss:$8 sps:$4 sm:$0xff]  }
0x171e   :  { %v5635_v16 = vpop.eup %5634  ;;  %v5099_v17 = vpack.c.bf16 %v5430_v12, %v5429_v41  ;;  %v3073_v6 = vsel %vm659_vm0, %v6689_v49, %v5435_v45  ;;  %v3072_v58 = vsel %vm659_vm0, %v6691_v50, %v5434_v47  ;;  %v5534_v50 = vld [vmem:[#allocation20 + $0x84] ss:$8 sps:$4 sm:$0xff]   ;;  %v5548_v12 = vld [vmem:[#allocation20 + $0xc0] ss:$8 sps:$4 sm:$0xff]   ;;  %v5549_v41 = vld [vmem:[#allocation20 + $0xd4] ss:$8 sps:$4 sm:$0xff]  }
0x171f   :  { %v2959_v18 = vmul.f32 %v5635_v16, %v5627_v36  ;;  %5136 = vmatprep.subr.bf16.mxu1 %v5534_v50  ;;  %v5551_v16 = vld [vmem:[#allocation20 + $0xd0] ss:$8 sps:$4 sm:$0xff]   ;;  %v4035_v45 = vld [vmem:[#allocation23 + $0x80] sm:$0xff]  }
0x1720   :  { %4674 = vmatmul.mubr.msk.f32.vlgmr.msra.gmra.mrb[16].mxu0 %vm747_vm2, %v2760_v55  ;;  %5100 = vmatprep.subr.bf16.mxu0 %v5099_v17  ;;  %v5552_v55 = vld [vmem:[#allocation20 + $0xe4] ss:$8 sps:$4 sm:$0xff]  }
0x1721   :  { %5102 = vmatpush3.bf16.msra.mxu0 %v5099_v17  ;;  %4687 = vmatprep.mubr.msk.f32.mxu0 %vm747_vm2, %v2959_v18  ;;  %v5554_v17 = vld [vmem:[#allocation20 + $0xe0] ss:$8 sps:$4 sm:$0xff]   ;;  %v5555_v18 = vld [vmem:[#allocation20 + $0xf4] ss:$8 sps:$4 sm:$0xff]   ;;  %v4174_v47 = vld [vmem:[#allocation23 + $0xc8] sm:$0xff]  }
0x1722   :  { %v5637_v19 = vpop.eup %5636  ;;  %5104 = vmatprep.subr.bf16.mxu0 %v4003_v21 }
0x1723   :  { %v2960_v20 = vmul.f32 %v5637_v19, %v5629_v7  ;;  %v5536_v7 = vld [vmem:[#allocation20 + $0x80] ss:$8 sps:$4 sm:$0xff]   ;;  %v5557_v19 = vld [vmem:[#allocation20 + $0xf0] ss:$8 sps:$4 sm:$0xff]  }
0x1724   :  { %5138 = vmatpush1.bf16.msra.mxu1 %v5536_v7 }
0x1725   :  { %4688 = vmatmul.mubr.msk.f32.vlgmr.msra.gmra.mrb[18].mxu0 %vm747_vm2, %v2960_v20  ;;  %5140 = vmatprep.subr.bf16.mxu1 %v5537_v8 }
0x1726   :  { %5106 = vmatpush3.bf16.msra.mxu0 %v4003_v21 }
0x1727   :  { %5108 = vmatprep.subr.bf16.mxu0 %v4159_v22 }
0x1728   :  { %5142 = vmatpush1.bf16.msra.mxu1 %v5539_v9 }
0x1729   :  { %5144 = vmatprep.subr.bf16.mxu1 %v5540_v10 }
0x172a   :  { %5110 = vmatpush3.bf16.msra.mxu0 %v4159_v22 }
0x172b   :  { %5112 = vmatprep.subr.bf16.mxu0 %v4160_v23 }
0x172c   :  { %5146 = vmatpush1.bf16.msra.mxu1 %v5542_v11 }
0x172d   :  { %5148 = vmatprep.subr.bf16.mxu1 %v5543_v60 }
0x172e   :  { %5114 = vmatpush3.bf16.msra.mxu0 %v4160_v23 }
0x172f   :  { %5116 = vmatprep.subr.bf16.mxu0 %v4161_v24 }
0x1730   :  { %5150 = vmatpush1.bf16.msra.mxu1 %v5545_v1 }
0x1731   :  { %5152 = vmatprep.subr.bf16.mxu1 %v5546_v35 }
0x1732   :  { %5118 = vmatpush3.bf16.msra.mxu0 %v4161_v24 }
0x1733   :  { %5120 = vmatprep.subr.bf16.mxu0 %v4162_v25 }
0x1734   :  { %5154 = vmatpush1.bf16.msra.mxu1 %v5548_v12 }
0x1735   :  { %5156 = vmatprep.subr.bf16.mxu1 %v5549_v41 }
0x1736   :  { %5122 = vmatpush3.bf16.msra.mxu0 %v4162_v25 }
0x1737   :  { %5124 = vmatprep.subr.bf16.mxu0 %v4163_v26 }
0x1738   :  { %5158 = vmatpush1.bf16.msra.mxu1 %v5551_v16 }
0x1739   :  { %5160 = vmatprep.subr.bf16.mxu1 %v5552_v55 }
0x173a   :  { %5126 = vmatpush3.bf16.msra.mxu0 %v4163_v26 }
0x173b   :  { %5128 = vmatprep.subr.bf16.mxu0 %v4164_v27 }
0x173c   :  { %5162 = vmatpush1.bf16.msra.mxu1 %v5554_v17 }
0x173d   :  { %5164 = vmatprep.subr.bf16.mxu1 %v5555_v18 }
0x173e   :  { %5130 = vmatpush3.bf16.msra.mxu0 %v4164_v27  ;;  %v3867_v27 = vld [vmem:[#allocation17 + $0x1] ss:$0 sm:$0xff] }
0x173f   :  { %5132 = vmatprep.subr.bf16.mxu0 %v4165_v28 }
0x1740   :  { %5166 = vmatpush1.bf16.msra.mxu1 %v5557_v19 }
0x1742   :  { %5134 = vmatpush3.bf16.msra.mxu0 %v4165_v28 }
0x17f3   :  { %v4675_v29 = vpop.f32.mrb[16].mxu0 }
0x17f4   :  { %v2839_v30 = vpop.f32.mrb[17].mxu0 }
0x17f5   :  { %v5436_v63 = vpack.i.bf16 %v4675_v29, %v2839_v30  ;;  %v3868_v29 = vld [vmem:[#allocation19 + $0x1] ss:$0 sm:$0xff] }
0x17f7   :  { %5437 = vrot.lane.b32.xlu1 %v5436_v63, %s6856_s5 }
0x17f8   :  { %v4689_v31 = vpop.f32.mrb[18].mxu0 }
0x17f9   :  { %v3039_v32 = vpop.f32.mrb[19].mxu0 }
0x17fa   :  { %v5441_v33 = vpack.i.bf16 %v4689_v31, %v3039_v32 }
0x17fc   :  { %5442 = vrot.lane.b32.xlu1 %v5441_v33, %s6102_s16 }
0x1869   :  { %v5438_v40 = vpop.permute.xlu1 %5437 }
0x186a   :  { %v5440_v51 = vunpack.i.h.bf16 %v5438_v40  ;;  %v5439_v52 = vunpack.i.l.bf16 %v5438_v40  ;;  %v4173_v40 = vld [vmem:[#allocation23 + $0xc0] sm:$0xff]  }
0x186b   :  { %5168 = vmatprep.subr.bf16.mxu0 %v4173_v40 }
0x186c   :  { %v3074_v59 = vsel %vm1479_vm3, %v3072_v58, %v5439_v52  ;;  %v3075_v15 = vsel %vm1479_vm3, %v3073_v6, %v5440_v51  ;;  %v4166_v51 = vld [vmem:[#allocation23 + $0x88] sm:$0xff]   ;;  %v4175_v52 = vld [vmem:[#allocation23 + $0xd0] sm:$0xff]   ;;  %v4176_v6 = vld [vmem:[#allocation23 + $0xd8] sm:$0xff]  }
0x186d   :  { %v4169_v58 = vld [vmem:[#allocation23 + $0xa0] sm:$0xff]  }
0x186e   :  { %v5443_v4 = vpop.permute.xlu1 %5442 }
0x186f   :  { %v5445_v56 = vunpack.i.h.bf16 %v5443_v4  ;;  %v5444_v57 = vunpack.i.l.bf16 %v5443_v4  ;;  %v4167_v4 = vld [vmem:[#allocation23 + $0x90] sm:$0xff]  }
0x1871   :  { %v3076_v39 = vsel %vm1482_vm4, %v3074_v59, %v5444_v57  ;;  %v3077_v61 = vsel %vm1482_vm4, %v3075_v15, %v5445_v56  ;;  %v4168_v56 = vld [vmem:[#allocation23 + $0x98] sm:$0xff]   ;;  %v4177_v57 = vld [vmem:[#allocation23 + $0xe0] sm:$0xff]   ;;  %v4178_v59 = vld [vmem:[#allocation23 + $0xe8] sm:$0xff]  }
0x1872   :  { %4722 = vmatprep.mubr.f32.mxu0 %v3076_v39  ;;  %v4170_v15 = vld [vmem:[#allocation23 + $0xa8] sm:$0xff]   ;;  %v4179_v39 = vld [vmem:[#allocation23 + $0xf0] sm:$0xff]  }
0x1873   :  { %4723 = vmatmul.mubr.f32.vlgmr.msra.gmra.mrb[20].mxu0 %v3077_v61  ;;  %v4171_v61 = vld [vmem:[#allocation23 + $0xb0] sm:$0xff]  }
0x1874   :  { %5170 = vmatpush3.bf16.msra.mxu0 %v4035_v45 }
0x1875   :  { %5172 = vmatprep.subr.bf16.mxu0 %v4174_v47 }
0x1878   :  { %5174 = vmatpush3.bf16.msra.mxu0 %v4166_v51  ;;  %v3869_v51 = vld [vmem:[#allocation25 + $0x1] ss:$0 sm:$0xff] }
0x1879   :  { %5176 = vmatprep.subr.bf16.mxu0 %v4175_v52 }
0x187c   :  { %5178 = vmatpush3.bf16.msra.mxu0 %v4167_v4 }
0x187d   :  { %5180 = vmatprep.subr.bf16.mxu0 %v4176_v6 }
0x1880   :  { %5182 = vmatpush3.bf16.msra.mxu0 %v4168_v56 }
0x1881   :  { %5184 = vmatprep.subr.bf16.mxu0 %v4177_v57 }
0x1884   :  { %5186 = vmatpush3.bf16.msra.mxu0 %v4169_v58 }
0x1885   :  { %5188 = vmatprep.subr.bf16.mxu0 %v4178_v59 }
0x1888   :  { %5190 = vmatpush3.bf16.msra.mxu0 %v4170_v15 }
0x1889   :  { %5192 = vmatprep.subr.bf16.mxu0 %v4179_v39 }
0x188c   :  { %5194 = vmatpush3.bf16.msra.mxu0 %v4171_v61 }
0x1946   :  { %v4724_v0 = vpop.f32.mrb[20].mxu0 }
0x1947   :  { %v3191_v2 = vadd.f32 %v4724_v0, %v3866_v62  ;;  %v3185_v3 = vpop.f32.mrb[21].mxu0  ;;  %v4172_v0 = vld [vmem:[#allocation23 + $0xb8] sm:$0xff]  }
0x1948   :  { %v3186_v49 = vadd.f32 %v3866_v62, %v3185_v3  ;;  %v4180_v62 = vld [vmem:[#allocation23 + $0xf8] sm:$0xff]  }
0x1949   :  { %v3195_v36 = vadd.f32 %v3191_v2, %v6641_v54  ;;  %5196 = vmatprep.subr.bf16.mxu0 %v4180_v62  ;;  %v3288_v2 = vld [vmem:[#allocation22 + $0x2] sm:$0x3] }
0x194a   :  { %v3194_v5 = vadd.f32 %v3186_v49, %v6636_v53  ;;  %5198 = vmatpush3.bf16.msra.mxu0 %v4172_v0  ;;  %v3293_v3 = vrot.slane %v3288_v2, %v6496_v42  ;;  %v3297_v49 = vrot.slane %v3288_v2, %v6501_v46 }
0x194b   :  { %3202 = vadd.xlane.f32.xlu1 %v3195_v36 }
0x194c   :  { %3200 = vadd.xlane.f32.xlu0 %v3194_v5 }
0x19d8   :  { %v3203_v43 = vpop.xlane.xlu1 %3202 }
0x19d9   :  { %v3201_v48 = vpop.xlane.xlu0 %3200  ;;  %v3205_v44 = vmul.f32 0.0078125, %v3203_v43 }
0x19da   :  { %v3204_v54 = vmul.f32 0.0078125, %v3201_v48 }
0x19db   :  { %v3207_v53 = vsub.f32 %v3195_v36, %v3205_v44 }
0x19dc   :  { %v3206_v13 = vsub.f32 %v3194_v5, %v3204_v54 }
0x19dd   :  { %v3209_v38 = vmul.f32 %v3207_v53, %v3207_v53 }
0x19de   :  { %v3208_v14 = vmul.f32 %v3206_v13, %v3206_v13 }
0x19e0   :  { %3210 = vadd.xlane.f32.xlu0 %v3208_v14 }
0x19e4   :  { %3212 = vadd.xlane.f32.xlu0 %v3209_v38 }
0x1a6d   :  { %v3211_v20 = vpop.xlane.xlu0 %3210 }
0x1a6e   :  { %v3214_v21 = vmul.f32 0.0078125, %v3211_v20 }
0x1a70   :  { %v3216_v22 = vadd.f32 1e-12, %v3214_v21 }
0x1a71   :  { %v3213_v23 = vpop.xlane.xlu0 %3212 }
0x1a72   :  { %5638 = vrsqrt.f32 %v3216_v22  ;;  %v3215_v24 = vmul.f32 0.0078125, %v3213_v23 }
0x1a74   :  { %v3217_v25 = vadd.f32 1e-12, %v3215_v24 }
0x1a76   :  { %5640 = vrsqrt.f32 %v3217_v25 }
0x1a7c   :  { %v5639_v26 = vpop.eup %5638 }
0x1a7d   :  { %v3220_v28 = vmul.f32 %v5639_v26, %v3206_v13 }
0x1a7f   :  { %v3228_v30 = vmul.f32 %v3867_v27, %v3220_v28 }
0x1a80   :  { %v5641_v63 = vpop.eup %5640 }
0x1a81   :  { %v6761_v31 = vadd.f32 %v3868_v29, %v3228_v30  ;;  %v3221_v32 = vmul.f32 %v5641_v63, %v3207_v53 }
0x1a83   :  { %3365 = vmatmul.mubr.f32.vlgmr.msra.gmra.mrb[36].mxu1 %v6761_v31  ;;  %v3229_v33 = vmul.f32 %v3867_v27, %v3221_v32 }
0x1a84   :  { %3370 = vmatprep.mubr.f32.mxu1 %v6101_v34 }
0x1a85   :  { %v6765_v37 = vadd.f32 %v3868_v29, %v3229_v33 }
0x1a87   :  { %3371 = vmatmul.mubr.f32.gmra.mrb[38].mxu1 %v6765_v37 }
0x1a88   :  { %4729 = vmatprep.mubr.msk.f32.mxu1 %vm6104_vm5, %v6101_v34 }
0x1b56   :  { %v3366_v36 = vpop.f32.mrb[36].mxu1 }
0x1b57   :  { %v3367_v5 = vadd.f32 %v3366_v36, %v3293_v3  ;;  %v3368_v50 = vpop.f32.mrb[37].mxu1 }
0x1b58   :  { %v3369_v7 = vadd.f32 %v3368_v50, %v3297_v49  ;;  %v6103_v50 = vmov 0.0|0.0  }
0x1b59   :  { %v3377_v8 = vmul.f32 %v3367_v5, %v3367_v5  ;;  %5199 = vmatprep.subr.bf16.mxu1 %v6103_v50 }
0x1b5a   :  { %v3378_v9 = vmul.f32 %v3369_v7, %v3369_v7  ;;  %v3372_v10 = vpop.f32.mrb[38].mxu1 }
0x1b5b   :  { %v3381_v11 = vmul.f32 %v3377_v8, %v3367_v5  ;;  %v3373_v43 = vadd.f32 %v3372_v10, %v3293_v3  ;;  %v3374_v48 = vpop.f32.mrb[39].mxu1 }
0x1b5c   :  { %v3382_v44 = vmul.f32 %v3378_v9, %v3369_v7  ;;  %v3375_v54 = vadd.f32 %v3374_v48, %v3297_v49  ;;  %v3870_v48 = vld [vmem:[#allocation26 + $0x1] ss:$0 sm:$0xff] }
0x1b5d   :  { %v3385_v13 = vmul.f32 0.044715, %v3381_v11  ;;  %v3379_v53 = vmul.f32 %v3373_v43, %v3373_v43 }
0x1b5e   :  { %v3386_v14 = vmul.f32 0.044715, %v3382_v44  ;;  %v3380_v38 = vmul.f32 %v3375_v54, %v3375_v54 }
0x1b5f   :  { %v3389_v60 = vadd.f32 %v3385_v13, %v3367_v5  ;;  %v3383_v42 = vmul.f32 %v3379_v53, %v3373_v43  ;;  %v3871_v53 = vld [vmem:[#allocation28 + $0x1] ss:$0 sm:$0xff] }
0x1b60   :  { %v3390_v1 = vadd.f32 %v3386_v14, %v3369_v7  ;;  %v3384_v46 = vmul.f32 %v3380_v38, %v3375_v54 }
0x1b61   :  { %v3393_v35 = vmul.f32 0.7978846, %v3389_v60  ;;  %v3387_v12 = vmul.f32 0.044715, %v3383_v42 }
0x1b62   :  { %v3394_v41 = vmul.f32 0.7978846, %v3390_v1  ;;  %v3388_v16 = vmul.f32 0.044715, %v3384_v46  ;;  %v293_v1 = vld [vmem:[#allocation7] sm:$0xff] }
0x1b63   :  { %5642 = vtanh.f32 %v3393_v35  ;;  %v3391_v55 = vadd.f32 %v3387_v12, %v3373_v43  ;;  %v4099_v46 = vld [vmem:[%s6833_s17] sm:$0xff]   ;;  %v4181_v35 = vld [vmem:[%s6833_s17 + $0x8] sm:$0xff]   ;;  %v4182_v12 = vld [vmem:[%s6833_s17 + $0x10] sm:$0xff]  }
0x1b64   :  { %v3392_v17 = vadd.f32 %v3388_v16, %v3375_v54  ;;  %5644 = vtanh.f32 %v3394_v41  ;;  %v4183_v41 = vld [vmem:[%s6833_s17 + $0x18] sm:$0xff]   ;;  %v4185_v16 = vld [vmem:[%s6833_s17 + $0x28] sm:$0xff]  }
0x1b65   :  { %v3395_v18 = vmul.f32 0.7978846, %v3391_v55  ;;  %v4186_v55 = vld [vmem:[%s6833_s17 + $0x30] sm:$0xff]  }
0x1b66   :  { %v3396_v19 = vmul.f32 0.7978846, %v3392_v17  ;;  %v4187_v17 = vld [vmem:[%s6833_s17 + $0x38] sm:$0xff]  }
0x1b67   :  { %5646 = vtanh.f32 %v3395_v18 }
0x1b68   :  { %5648 = vtanh.f32 %v3396_v19 }
0x1b6d   :  { %v5643_v20 = vpop.eup %5642 }
0x1b6e   :  { %v5645_v21 = vpop.eup %5644  ;;  %v3401_v22 = vadd.f32 1.0, %v5643_v20  ;;  %v3873_v20 = vld [vmem:[%s6834_s18] ss:$0 sm:$0xff] }
0x1b6f   :  { %v3402_v23 = vadd.f32 1.0, %v5645_v21 }
0x1b70   :  { %v3405_v24 = vmul.f32 0.5, %v3401_v22 }
0x1b71   :  { %v5647_v25 = vpop.eup %5646  ;;  %v3406_v26 = vmul.f32 0.5, %v3402_v23 }
0x1b72   :  { %v5649_v27 = vpop.eup %5648  ;;  %v3403_v28 = vadd.f32 1.0, %v5647_v25  ;;  %v3409_v63 = vmul.f32 %v3405_v24, %v3367_v5 }
0x1b73   :  { %v3410_v29 = vmul.f32 %v3406_v26, %v3369_v7  ;;  %v3404_v30 = vadd.f32 1.0, %v5649_v27 }
0x1b74   :  { %v3407_v32 = vmul.f32 0.5, %v3403_v28 }
0x1b75   :  { %3550 = vmatprep.mubr.f32.mxu0 %v3410_v29  ;;  %v3408_v33 = vmul.f32 0.5, %v3404_v30 }
0x1b76   :  { %3551 = vmatmul.mubr.f32.vlgmr.msra.gmra.mrb[22].mxu0 %v3409_v63  ;;  %v3411_v45 = vmul.f32 %v3407_v32, %v3373_v43 }
0x1b77   :  { %v3412_v40 = vmul.f32 %v3408_v33, %v3375_v54 }
0x1b79   :  { %3555 = vmatprep.mubr.f32.mxu0 %v3412_v40 }
0x1b7a   :  { %3556 = vmatmul.mubr.f32.gmra.mrb[24].mxu0 %v3411_v45 }
0x1c49   :  { %v4412_v47 = vpop.f32.mrb[22].mxu0 }
0x1c4a   :  { %v4413_v52 = vpop.f32.mrb[23].mxu0 }
0x1c4b   :  { %v4414_v4 = vadd.f32 %v4413_v52, %v4412_v47 }
0x1c4d   :  { %v3553_v6 = vadd.f32 %v4414_v4, %v3869_v51  ;;  %v4415_v56 = vpop.f32.mrb[24].mxu0 }
0x1c4e   :  { %v4416_v57 = vpop.f32.mrb[25].mxu0 }
0x1c4f   :  { %v4417_v58 = vadd.f32 %v4416_v57, %v4415_v56  ;;  %v3561_v59 = vadd.f32 %v3553_v6, %v6761_v31 }
0x1c51   :  { %v3558_v15 = vadd.f32 %v4417_v58, %v3869_v51  ;;  %3567 = vadd.xlane.f32.xlu0 %v3561_v59 }
0x1c53   :  { %v3562_v39 = vadd.f32 %v3558_v15, %v6765_v37 }
0x1c55   :  { %3569 = vadd.xlane.f32.xlu1 %v3562_v39 }
0x1cde   :  { %v3568_v61 = vpop.xlane.xlu0 %3567 }
0x1cdf   :  { %v3571_v62 = vmul.f32 0.0078125, %v3568_v61 }
0x1ce1   :  { %v3573_v0 = vsub.f32 %v3561_v59, %v3571_v62 }
0x1ce2   :  { %v3570_v2 = vpop.xlane.xlu1 %3569 }
0x1ce3   :  { %v3572_v3 = vmul.f32 0.0078125, %v3570_v2  ;;  %v3575_v49 = vmul.f32 %v3573_v0, %v3573_v0 }
0x1ce5   :  { %v3574_v36 = vsub.f32 %v3562_v39, %v3572_v3  ;;  %3577 = vadd.xlane.f32.xlu0 %v3575_v49 }
0x1ce7   :  { %v3576_v5 = vmul.f32 %v3574_v36, %v3574_v36 }
0x1ce9   :  { %3579 = vadd.xlane.f32.xlu1 %v3576_v5 }
0x1d72   :  { %v3578_v31 = vpop.xlane.xlu0 %3577 }
0x1d73   :  { %v3581_v7 = vmul.f32 0.0078125, %v3578_v31 }
0x1d75   :  { %v3583_v37 = vadd.f32 1e-12, %v3581_v7 }
0x1d76   :  { %v3580_v8 = vpop.xlane.xlu1 %3579 }
0x1d77   :  { %5650 = vrsqrt.f32 %v3583_v37  ;;  %v3582_v9 = vmul.f32 0.0078125, %v3580_v8 }
0x1d79   :  { %v3584_v10 = vadd.f32 1e-12, %v3582_v9 }
0x1d7b   :  { %5652 = vrsqrt.f32 %v3584_v10 }
0x1d81   :  { %v5651_v11 = vpop.eup %5650 }
0x1d82   :  { %v3587_v43 = vmul.f32 %v5651_v11, %v3573_v0 }
0x1d84   :  { %v3595_v13 = vmul.f32 %v3870_v48, %v3587_v43 }
0x1d85   :  { %v5653_v44 = vpop.eup %5652 }
0x1d86   :  { %v3588_v54 = vmul.f32 %v5653_v44, %v3574_v36  ;;  %v3603_v38 = vadd.f32 %v3871_v53, %v3595_v13 }
0x1d88   :  { %v3596_v14 = vmul.f32 %v3870_v48, %v3588_v54 }
0x1d8a   :  { %v3604_v60 = vadd.f32 %v3871_v53, %v3596_v14 }
0x1d8c   :  { %v5200_v42 = vpack.c.bf16 %v3604_v60, %v3603_v38 }
0x1d8e   :  { %5201 = vmatpush3.bf16.msra.mxu1 %v5200_v42 }
0x1d8f   :  { %5202 = vmatprep.subr.bf16.mxu1 %v6103_v50 }
0x1d91   :  { %4730 = vmatmul.mubr.msk.f32.vlgmr.msra.gmra.mrb[40].mxu1 %vm747_vm2, %v293_v1 }
0x1d92   :  { %5204 = vmatpush3.bf16.msra.mxu1 %v4099_v46  ;;  %4764 = vmatprep.mubr.msk.f32.mxu1 %vm6104_vm5, %v6101_v34  ;;  %v4184_v34 = vld [vmem:[%s6833_s17 + $0x20] sm:$0xff]  }
0x1d93   :  { %5205 = vmatprep.subr.bf16.mxu1 %v6103_v50 }
0x1d96   :  { %5207 = vmatpush3.bf16.msra.mxu1 %v4181_v35 }
0x1d97   :  { %5208 = vmatprep.subr.bf16.mxu1 %v6103_v50 }
0x1d9a   :  { %5210 = vmatpush3.bf16.msra.mxu1 %v4182_v12 }
0x1d9b   :  { %5211 = vmatprep.subr.bf16.mxu1 %v6103_v50 }
0x1d9e   :  { %5213 = vmatpush3.bf16.msra.mxu1 %v4183_v41 }
0x1d9f   :  { %5214 = vmatprep.subr.bf16.mxu1 %v6103_v50 }
0x1da2   :  { %5216 = vmatpush3.bf16.msra.mxu1 %v4184_v34 }
0x1da3   :  { %5217 = vmatprep.subr.bf16.mxu1 %v6103_v50 }
0x1da6   :  { %5219 = vmatpush3.bf16.msra.mxu1 %v4185_v16 }
0x1da7   :  { %5220 = vmatprep.subr.bf16.mxu1 %v6103_v50 }
0x1daa   :  { %5222 = vmatpush3.bf16.msra.mxu1 %v4186_v55 }
0x1dab   :  { %5223 = vmatprep.subr.bf16.mxu1 %v6103_v50 }
0x1dae   :  { %5225 = vmatpush3.bf16.msra.mxu1 %v4187_v17 }
0x1e64   :  { %v3674_v18 = vpop.f32.mrb[40].mxu1 }
0x1e65   :  { %v4731_v19 = vpop.f32.mrb[41].mxu1  ;;  %4765 = vmatmul.mubr.f32.vlgmr.msra.gmra.mrb[42].mxu1 %v3674_v18 }
0x1f38   :  { %v3783_v21 = vpop.f32.mrb[42].mxu1 }
0x1f39   :  { %v3784_v22 = vadd.f32 %v3873_v20, %v3783_v21  ;;  %v4766_v23 = vpop.f32.mrb[43].mxu1 }
0x1f3b   :  { %3787 = vst [vmem:[#allocation29] sm:$0xff] %v3784_v22 }
0x1f3c   :  { %6041 = shalt.err (!%p6038_p0)
}
0x1f3d   :  { %s6864_s6 = sld [smem:[#allocation44_spill]] }
0x1f43   :  { %s6042_s30 = scalar_lea.hbm %s6864_s6, 128 }
0x1f44   :  { %p6043_p1 = scmp.ne.s32.totalorder %s6864_s6, %s6042_s30  ;;  %p6046_p2 = scmp.lt.u32.totalorder %s6042_s30, %s6864_s6 }
0x1f46   :  { %p6048_p3 = pnand %p6046_p2, %p6043_p1 }
0x1f48   :  { %6051 = shalt.err (!%p6048_p3)
}
0x1f49   :  { %3797 = dma.vmem_to_hbm [thread:$0]  %s3795_s28, 128, %s6864_s6, [#allocation4]  }
0x1f4a   :  { %6070 = dma.done.wait [#allocation4], 128  }
0x1f4b   :  { %6071 = vsyncadd [#allocation4], 4294967168 }
0x1f4c   :  { %3801 = vsyncpa [#allocation3], 1 }
0x1f4d   :  { %3802 = vsyncpa [#allocation6], 1 }
0x1f4e   :  { %3803 = vsyncpa [#allocation9], 1 }
0x1f4f   :  { %3804 = vsyncpa [#allocation12], 1 }
0x1f50   :  { %3805 = vsyncpa [#allocation15], 1 }
0x1f51   :  { %3806 = vsyncpa [#allocation18], 1 }
0x1f52   :  { %3807 = vsyncpa [#allocation21], 1 }
0x1f53   :  { %3808 = vsyncpa [#allocation24], 1 }
0x1f54   :  { %3809 = vsyncpa [#allocation27], 1 }
0x1f55   :  { %3810 = vsyncpa [#allocation4], 1 }

</bundles_post_ra>
